<compile_context>
chip_gen: v7x
topology: tpu7x:2x2x1
jax: 0.10.0
libtpu: 0.0.40
codegen_flags: <defaults>
</compile_context>

<pallas_src>
import functools
import numpy as np
import jax
import jax.numpy as jnp
from jax import lax
from jax.experimental import pallas as pl
from jax.experimental.pallas import tpu as pltpu

# ---------------- configuration (small shapes consistent with the module) ----
DIM_POS_FEATURE    = 4
DIM_EXPRESSION     = 5
DIM_FRAME_LATENT   = 3
DIM_CONDITION      = DIM_EXPRESSION + DIM_FRAME_LATENT      # 8
NUM_TEXTURE_BASIS  = 6
NUM_BASIS_PAD      = 8                                       # sublane-padded output rows
DIM_GLOBAL_HIDDEN  = 32
NUM_GLOBAL_LAYERS  = 3
DIM_SPATIAL_HIDDEN = 16
NUM_SPATIAL_LAYERS = 2
TEMPERATURE        = 1.0
BATCH              = 2

D_IN_SPATIAL = DIM_POS_FEATURE + 6                           # pos_feature + normal + viewdir = 10
SPATIAL_DIMS = ([D_IN_SPATIAL]
                + [DIM_SPATIAL_HIDDEN] * (NUM_SPATIAL_LAYERS - 1)
                + [NUM_TEXTURE_BASIS])                       # [10, 16, 6]
NUM_SP_W = [SPATIAL_DIMS[i - 1] * SPATIAL_DIMS[i] for i in range(1, len(SPATIAL_DIMS))]
N_DYN = sum(NUM_SP_W)                                        # 160 + 96 = 256
GLOBAL_DIMS = ([DIM_CONDITION]
               + [DIM_GLOBAL_HIDDEN] * (NUM_GLOBAL_LAYERS - 1)
               + [N_DYN])                                    # [8, 32, 32, 256]


# --------------------------------- kernel ------------------------------------
def texture_basis_projector_kernel(x_ref, y_ref, g0_ref, g1_ref, g2_ref,
                                   t_ref, r_ref, out_ref, *, matmul_dtype):
    dt = matmul_dtype

    def mm(a, b):
        # MXU matmul; bf16 inputs allowed on v6e/v7x, accumulation always f32.
        return jnp.dot(a.astype(dt), b.astype(dt), preferred_element_type=jnp.float32)

    # ----- P_global: condition -> dynamic weights theta (feature-major) ------
    x = x_ref[...]                                           # (dim_condition, TB)
    w0t = g0_ref[:, 0:DIM_CONDITION]                         # (H, C)
    b0  = g0_ref[:, DIM_CONDITION:DIM_CONDITION + 1]         # (H, 1)
    a0  = g0_ref[:, DIM_CONDITION + 1:DIM_CONDITION + 2]     # (H, 1)
    h = mm(w0t, x) + b0
    h = jnp.where(h >= 0.0, h, a0 * h)                       # PReLU (per-channel), f32 elementwise

    w1t = g1_ref[:, 0:DIM_GLOBAL_HIDDEN]
    b1  = g1_ref[:, DIM_GLOBAL_HIDDEN:DIM_GLOBAL_HIDDEN + 1]
    a1  = g1_ref[:, DIM_GLOBAL_HIDDEN + 1:DIM_GLOBAL_HIDDEN + 2]
    h = mm(w1t, h) + b1
    h = jnp.where(h >= 0.0, h, a1 * h)

    w2t = g2_ref[:, 0:DIM_GLOBAL_HIDDEN]
    b2  = g2_ref[:, DIM_GLOBAL_HIDDEN:DIM_GLOBAL_HIDDEN + 1]
    theta = mm(w2t, h) + b2                                  # (N_DYN, TB) dynamic weights (f32)

    # ----- P_spatial: per-sample dynamic-weight tiny MLP ----------------------
    #   y_out = R^T @ ((T^T @ y) * theta)   (reshape-free selector reformulation)
    y = y_ref[...]                                           # (D_in, TB)
    t0t = t_ref[:, 0:D_IN_SPATIAL]                           # (N_DYN, D_in)
    r0t = r_ref[0:DIM_SPATIAL_HIDDEN, :]                     # (H_sp, N_DYN)
    y = mm(r0t, mm(t0t, y) * theta)                          # (H_sp, TB)
    y = jnp.maximum(y, 0.0)                                  # ReLU between spatial layers

    t1t = t_ref[:, D_IN_SPATIAL:D_IN_SPATIAL + DIM_SPATIAL_HIDDEN]
    r1t = r_ref[DIM_SPATIAL_HIDDEN:DIM_SPATIAL_HIDDEN + NUM_BASIS_PAD, :]
    logits = mm(r1t, mm(t1t, y) * theta)                     # (8, TB); rows 6..7 are zero

    # ----- softmax over the texture-basis (sublane) axis ----------------------
    if TEMPERATURE != 1.0:                                   # trace-time: drop dead multiply
        logits = logits * TEMPERATURE
    # Mask the 2 padding rows so the 8-row softmax equals the 6-class one; rows
    # 6..7 come out exactly 0 and are sliced away by the wrapper.
    row = lax.broadcasted_iota(jnp.int32, logits.shape, 0)
    logits = jnp.where(row < NUM_TEXTURE_BASIS, logits, jnp.finfo(jnp.float32).min)
    logits = logits - jnp.max(logits, axis=0, keepdims=True)
    e = jnp.exp(logits)
    denom = jnp.sum(e, axis=0, keepdims=True)
    # approx=False keeps the 1e-5-class agreement with the f32 reference.
    out_ref[...] = e * pl.reciprocal(denom, approx=False)


# -------------------------------- tiling -------------------------------------
def _device_kind():
    try:
        return jax.devices()[0].device_kind.lower()
    except Exception:
        return ""


def _select_tile_b(batch):
    """Batch-tile selection.

    512-2048 lane tiles amortize the ~0.35 us/grid-step overhead (measured: 128-wide
    tiles reach ~29% of roofline vs ~85% at 512-1024).  Per-tile VMEM is only a few
    MB even at tile_b=2048 (largest intermediates are (N_DYN=256, tile_b) f32), far
    below v5e's 16 MiB scoped-VMEM default and v7x's 64 MiB physical VMEM — so tiles
    are never shrunk "for VMEM"; the only v7x-specific knob is grid length >= 2 so
    the 2 TensorCores both get work.
    """
    kind = _device_kind()
    b128 = max(128, pl.cdiv(max(batch, 1), 128) * 128)
    tile = min(1024, b128)                 # big default on all generations
    if "v5" in kind:
        tile = min(tile, 2048)             # v5e scoped-VMEM cap (no-op at the 1024 base)
    if "v7" in kind and b128 >= 256:
        # v7x has 2 TCs per chip: keep >= 2 grid steps on the 'parallel' batch axis.
        if pl.cdiv(b128, tile) < 2:
            tile = max(128, (b128 // 2 // 128) * 128)
    return tile


# -------------------------------- wrappers -----------------------------------
def _projector_feature_major(xT, yT, packed, *, tile_b, matmul_dtype=jnp.float32):
    """Core call on lane-padded feature-major inputs.

    xT: (dim_condition, Bp), yT: (d_in_spatial, Bp) with Bp a multiple of tile_b.
    Returns the feature-major (NUM_BASIS_PAD, Bp) softmax slab (rows 6..7 are zero).
    """
    b_pad = xT.shape[1]
    assert b_pad % tile_b == 0 and yT.shape[1] == b_pad

    kernel = functools.partial(texture_basis_projector_kernel,
                               matmul_dtype=matmul_dtype)

    def build(single_buffer_params):
        def param_spec(p):
            # Parameters are grid-invariant (index_map always (0,0)); request a
            # single VMEM buffer instead of the default double buffer.
            if single_buffer_params:
                return pl.BlockSpec(p.shape, lambda i: (0, 0),
                                    pipeline_mode=pl.Buffered(1))
            return pl.BlockSpec(p.shape, lambda i: (0, 0))

        return pl.pallas_call(
            kernel,
            out_shape=jax.ShapeDtypeStruct((NUM_BASIS_PAD, b_pad), jnp.float32),
            grid=(b_pad // tile_b,),
            in_specs=[
                pl.BlockSpec((DIM_CONDITION, tile_b), lambda i: (0, i)),
                pl.BlockSpec((D_IN_SPATIAL, tile_b), lambda i: (0, i)),
                param_spec(packed['g0']),
                param_spec(packed['g1']),
                param_spec(packed['g2']),
                param_spec(packed['t']),
                param_spec(packed['r']),
            ],
            out_specs=pl.BlockSpec((NUM_BASIS_PAD, tile_b), lambda i: (0, i)),
            compiler_params=pltpu.CompilerParams(
                dimension_semantics=("parallel",)),   # shard batch across TCs on v7x
        )

    args = (xT, yT, packed['g0'], packed['g1'], packed['g2'],
            packed['t'], packed['r'])
    try:
        return build(True)(*args)
    except Exception:
        # Installed JAX rejected single-buffered specs: fall back to defaults.
        return build(False)(*args)


def texture_basis_projector(pos_feature, normal, viewdir, conds, packed,
                            *, tile_b=None, matmul_dtype=jnp.float32):
    """PyTorch-interface wrapper: sample-major (B, F) inputs, (B, num_basis) output."""
    x_cond = jnp.concatenate(conds, axis=-1)
    assert x_cond.shape[-1] == DIM_CONDITION
    y_in = jnp.concatenate([pos_feature, normal, viewdir], axis=-1)
    batch = x_cond.shape[0]

    if tile_b is None:
        tile_b = _select_tile_b(batch)
    b_pad = pl.cdiv(batch, tile_b) * tile_b

    # Feature-major (transposed) layout: batch rides the lane axis so every
    # in-kernel load/store is lane-dense.  Skip the materialized pad copies when
    # the batch already fills the tiles.
    # TODO(synk): for large-B production, feed feature-major (F, B) arrays straight
    # into _projector_feature_major to avoid the wrapper transpose round-trip.
    if batch == b_pad:
        xT = x_cond.T.astype(jnp.float32)
        yT = y_in.T.astype(jnp.float32)
    else:
        xT = jnp.zeros((DIM_CONDITION, b_pad), jnp.float32).at[:, :batch].set(x_cond.T)
        yT = jnp.zeros((D_IN_SPATIAL, b_pad), jnp.float32).at[:, :batch].set(y_in.T)

    outT = _projector_feature_major(xT, yT, packed,
                                    tile_b=tile_b, matmul_dtype=matmul_dtype)
    return outT[:NUM_TEXTURE_BASIS, :batch].T                # back to (batch, num_basis)


# --------------------------- deterministic params ----------------------------
def init_params(key):
    """Base (PyTorch-layout) parameters used by the pure-JAX reference."""
    params = {}
    keys = jax.random.split(key, 2 * NUM_GLOBAL_LAYERS)
    for i in range(NUM_GLOBAL_LAYERS):
        din, dout = GLOBAL_DIMS[i], GLOBAL_DIMS[i + 1]
        scale = 1.0 / np.sqrt(din)
        # weights stored (in, out) so the reference does x @ W + b
        params[f'w{i}'] = jax.random.uniform(keys[2 * i], (din, dout), jnp.float32, -scale, scale)
        params[f'b{i}'] = jax.random.uniform(keys[2 * i + 1], (1, dout), jnp.float32, -scale, scale)
        if i < NUM_GLOBAL_LAYERS - 1:
            params[f'a{i}'] = jnp.full((1, dout), 0.1, jnp.float32)   # nn.PReLU(init=0.1)
    return params


def pack_params(params):
    """Pack the 12 small tensors into 5 feature-major buffers for the kernel."""
    packed = {
        'g0': jnp.concatenate([params['w0'].T, params['b0'].T, params['a0'].T], axis=1),  # (32, 10)
        'g1': jnp.concatenate([params['w1'].T, params['b1'].T, params['a1'].T], axis=1),  # (32, 34)
        'g2': jnp.concatenate([params['w2'].T, params['b2'].T], axis=1),                  # (256, 33)
    }
    # Constant expand/reduce selector matrices (transposed): T^T scatters y into
    # the flat theta slot layout (o*din + i), R^T reduces per output channel.
    # The final layer's reduce rows are padded to NUM_BASIS_PAD (=8) so the output
    # block is a full 8-sublane slab (unmasked stores); the extra rows are zero.
    offset = 0
    t_cols, r_rows = [], []
    for li in range(NUM_SPATIAL_LAYERS):
        din, dout = SPATIAL_DIMS[li], SPATIAL_DIMS[li + 1]
        rrows = dout if li < NUM_SPATIAL_LAYERS - 1 else NUM_BASIS_PAD
        Tt = np.zeros((N_DYN, din), np.float32)
        Rt = np.zeros((rrows, N_DYN), np.float32)
        for o in range(dout):
            for i in range(din):
                Tt[offset + o * din + i, i] = 1.0
                Rt[o, offset + o * din + i] = 1.0
        t_cols.append(Tt)
        r_rows.append(Rt)
        offset += din * dout
    packed['t'] = jnp.asarray(np.concatenate(t_cols, axis=1))    # (N_DYN, 10 + 16)
    packed['r'] = jnp.asarray(np.concatenate(r_rows, axis=0))    # (16 + 8, N_DYN)
    return packed


# ---------------------------- pure-JAX reference -----------------------------
def ref_forward(pos_feature, normal, viewdir, conds, params):
    x = jnp.concatenate(conds, axis=-1)
    for i in range(NUM_GLOBAL_LAYERS):
        x = x @ params[f'w{i}'] + params[f'b{i}']
        if i < NUM_GLOBAL_LAYERS - 1:
            x = jnp.where(x >= 0.0, x, params[f'a{i}'] * x)
    y = jnp.concatenate([pos_feature, normal, viewdir], axis=-1)
    idx = 0
    for i in range(NUM_SPATIAL_LAYERS):
        din, dout = SPATIAL_DIMS[i], SPATIAL_DIMS[i + 1]
        nw = din * dout
        W = x[:, idx:idx + nw].reshape(-1, dout, din)
        idx += nw
        y = jnp.einsum('boi,bi->bo', W, y)
        if i < NUM_SPATIAL_LAYERS - 1:
            y = jnp.maximum(y, 0.0)
    return jax.nn.softmax(y * TEMPERATURE, axis=-1)


# ----------------------------------- main ------------------------------------
if __name__ == "__main__":
    key = jax.random.PRNGKey(0)
    k_p, k1, k2, k3, k4, k5 = jax.random.split(key, 6)
    params = init_params(k_p)
    packed = pack_params(params)

    pos_feature  = jax.random.normal(k1, (BATCH, DIM_POS_FEATURE), jnp.float32)
    normal       = jax.random.normal(k2, (BATCH, 3), jnp.float32)
    viewdir      = jax.random.normal(k3, (BATCH, 3), jnp.float32)
    expression   = jax.random.normal(k4, (BATCH, DIM_EXPRESSION), jnp.float32)
    frame_latent = jax.random.normal(k5, (BATCH, DIM_FRAME_LATENT), jnp.float32)

    # f32 matmul path so the 1e-5-class check against the f32 reference holds.
    # (Production on v6e/v7x: pass matmul_dtype=jnp.bfloat16 and relax tolerances.)
    out = texture_basis_projector(pos_feature, normal, viewdir,
                                  (expression, frame_latent), packed)
    out = jax.block_until_ready(out)

    ref = ref_forward(pos_feature, normal, viewdir, (expression, frame_latent), params)
    assert out.shape == (BATCH, NUM_TEXTURE_BASIS)
    np.testing.assert_allclose(np.asarray(out), np.asarray(ref), rtol=1e-4, atol=1e-5)

    print("KERNEL_OK")
</pallas_src>

<mosaic_0001>
module attributes {stable_mosaic.version = 11 : i64} {
  func.func @texture_basis_projector_kernel(%arg0: i32, %arg1: memref<8x128xf32, #tpu.memory_space<vmem>>, %arg2: memref<10x128xf32, #tpu.memory_space<vmem>>, %arg3: memref<32x10xf32, #tpu.memory_space<vmem>>, %arg4: memref<32x34xf32, #tpu.memory_space<vmem>>, %arg5: memref<256x33xf32, #tpu.memory_space<vmem>>, %arg6: memref<256x26xf32, #tpu.memory_space<vmem>>, %arg7: memref<24x256xf32, #tpu.memory_space<vmem>>, %arg8: memref<8x128xf32, #tpu.memory_space<vmem>>) attributes {dimension_semantics = [#tpu.dimension_semantics<parallel>], iteration_bounds = array<i64: 1>, scalar_prefetch = 0 : i64, scratch_operands = 0 : i64, tpu.core_type = #tpu.core_type<tc>, window_params = [{transform_indices = @transform_0, window_bounds = array<i64: 8, 128>}, {transform_indices = @transform_1, window_bounds = array<i64: 10, 128>}, {pipeline_mode = #tpu.pipeline_mode<synchronous>, transform_indices = @transform_2, window_bounds = array<i64: 32, 10>}, {pipeline_mode = #tpu.pipeline_mode<synchronous>, transform_indices = @transform_3, window_bounds = array<i64: 32, 34>}, {pipeline_mode = #tpu.pipeline_mode<synchronous>, transform_indices = @transform_4, window_bounds = array<i64: 256, 33>}, {pipeline_mode = #tpu.pipeline_mode<synchronous>, transform_indices = @transform_5, window_bounds = array<i64: 256, 26>}, {pipeline_mode = #tpu.pipeline_mode<synchronous>, transform_indices = @transform_6, window_bounds = array<i64: 24, 256>}, {transform_indices = @transform_7, window_bounds = array<i64: 8, 128>}]} {
    %c0 = arith.constant 0 : index
    %c0_0 = arith.constant 0 : index
    %0 = vector.load %arg1[%c0, %c0_0] : memref<8x128xf32, #tpu.memory_space<vmem>>, vector<8x128xf32>
    %c0_1 = arith.constant 0 : index
    %c0_2 = arith.constant 0 : index
    %1 = vector.load %arg3[%c0_1, %c0_2] : memref<32x10xf32, #tpu.memory_space<vmem>>, vector<32x8xf32>
    %c0_3 = arith.constant 0 : index
    %c8 = arith.constant 8 : index
    %2 = vector.load %arg3[%c0_3, %c8] : memref<32x10xf32, #tpu.memory_space<vmem>>, vector<32x1xf32>
    %c0_4 = arith.constant 0 : index
    %c9 = arith.constant 9 : index
    %3 = vector.load %arg3[%c0_4, %c9] : memref<32x10xf32, #tpu.memory_space<vmem>>, vector<32x1xf32>
    %cst = arith.constant dense<0.000000e+00> : vector<32x128xf32>
    %4 = tpu.matmul %1, %0, %cst {dimension_numbers = #tpu.dot_dimension_numbers<[1], [0], [0], [1], [0, 0, 1, 1], [], []>} : vector<32x8xf32>, vector<8x128xf32>, vector<32x128xf32> -> vector<32x128xf32>
    %5 = vector.broadcast %2 : vector<32x1xf32> to vector<32x128xf32>
    %6 = arith.addf %4, %5 : vector<32x128xf32>
    %cst_5 = arith.constant 0.000000e+00 : f32
    %7 = vector.broadcast %cst_5 : f32 to vector<32x128xf32>
    %8 = arith.cmpf oge, %6, %7 : vector<32x128xf32>
    %9 = vector.broadcast %3 : vector<32x1xf32> to vector<32x128xf32>
    %10 = arith.mulf %9, %6 : vector<32x128xf32>
    %11 = arith.select %8, %6, %10 : vector<32x128xi1>, vector<32x128xf32>
    %c0_6 = arith.constant 0 : index
    %c0_7 = arith.constant 0 : index
    %12 = vector.load %arg4[%c0_6, %c0_7] : memref<32x34xf32, #tpu.memory_space<vmem>>, vector<32x32xf32>
    %c0_8 = arith.constant 0 : index
    %c32 = arith.constant 32 : index
    %13 = vector.load %arg4[%c0_8, %c32] : memref<32x34xf32, #tpu.memory_space<vmem>>, vector<32x1xf32>
    %c0_9 = arith.constant 0 : index
    %c33 = arith.constant 33 : index
    %14 = vector.load %arg4[%c0_9, %c33] : memref<32x34xf32, #tpu.memory_space<vmem>>, vector<32x1xf32>
    %cst_10 = arith.constant dense<0.000000e+00> : vector<32x128xf32>
    %15 = tpu.matmul %12, %11, %cst_10 {dimension_numbers = #tpu.dot_dimension_numbers<[1], [0], [0], [1], [0, 0, 1, 1], [], []>} : vector<32x32xf32>, vector<32x128xf32>, vector<32x128xf32> -> vector<32x128xf32>
    %16 = vector.broadcast %13 : vector<32x1xf32> to vector<32x128xf32>
    %17 = arith.addf %15, %16 : vector<32x128xf32>
    %cst_11 = arith.constant 0.000000e+00 : f32
    %18 = vector.broadcast %cst_11 : f32 to vector<32x128xf32>
    %19 = arith.cmpf oge, %17, %18 : vector<32x128xf32>
    %20 = vector.broadcast %14 : vector<32x1xf32> to vector<32x128xf32>
    %21 = arith.mulf %20, %17 : vector<32x128xf32>
    %22 = arith.select %19, %17, %21 : vector<32x128xi1>, vector<32x128xf32>
    %c0_12 = arith.constant 0 : index
    %c0_13 = arith.constant 0 : index
    %23 = vector.load %arg5[%c0_12, %c0_13] : memref<256x33xf32, #tpu.memory_space<vmem>>, vector<256x32xf32>
    %c0_14 = arith.constant 0 : index
    %c32_15 = arith.constant 32 : index
    %24 = vector.load %arg5[%c0_14, %c32_15] : memref<256x33xf32, #tpu.memory_space<vmem>>, vector<256x1xf32>
    %cst_16 = arith.constant dense<0.000000e+00> : vector<256x128xf32>
    %25 = tpu.matmul %23, %22, %cst_16 {dimension_numbers = #tpu.dot_dimension_numbers<[1], [0], [0], [1], [0, 0, 1, 1], [], []>} : vector<256x32xf32>, vector<32x128xf32>, vector<256x128xf32> -> vector<256x128xf32>
    %26 = vector.broadcast %24 : vector<256x1xf32> to vector<256x128xf32>
    %27 = arith.addf %25, %26 : vector<256x128xf32>
    %c0_17 = arith.constant 0 : index
    %c0_18 = arith.constant 0 : index
    %28 = vector.load %arg2[%c0_17, %c0_18] : memref<10x128xf32, #tpu.memory_space<vmem>>, vector<10x128xf32>
    %c0_19 = arith.constant 0 : index
    %c0_20 = arith.constant 0 : index
    %29 = vector.load %arg6[%c0_19, %c0_20] : memref<256x26xf32, #tpu.memory_space<vmem>>, vector<256x10xf32>
    %c0_21 = arith.constant 0 : index
    %c0_22 = arith.constant 0 : index
    %30 = vector.load %arg7[%c0_21, %c0_22] : memref<24x256xf32, #tpu.memory_space<vmem>>, vector<16x256xf32>
    %cst_23 = arith.constant dense<0.000000e+00> : vector<256x128xf32>
    %31 = tpu.matmul %29, %28, %cst_23 {dimension_numbers = #tpu.dot_dimension_numbers<[1], [0], [0], [1], [0, 0, 1, 1], [], []>} : vector<256x10xf32>, vector<10x128xf32>, vector<256x128xf32> -> vector<256x128xf32>
    %32 = arith.mulf %31, %27 : vector<256x128xf32>
    %cst_24 = arith.constant dense<0.000000e+00> : vector<16x128xf32>
    %33 = tpu.matmul %30, %32, %cst_24 {dimension_numbers = #tpu.dot_dimension_numbers<[1], [0], [0], [1], [0, 0, 1, 1], [], []>} : vector<16x256xf32>, vector<256x128xf32>, vector<16x128xf32> -> vector<16x128xf32>
    %cst_25 = arith.constant 0.000000e+00 : f32
    %34 = vector.broadcast %cst_25 : f32 to vector<16x128xf32>
    %35 = arith.maximumf %33, %34 : vector<16x128xf32>
    %c0_26 = arith.constant 0 : index
    %c10 = arith.constant 10 : index
    %36 = vector.load %arg6[%c0_26, %c10] : memref<256x26xf32, #tpu.memory_space<vmem>>, vector<256x16xf32>
    %c16 = arith.constant 16 : index
    %c0_27 = arith.constant 0 : index
    %37 = vector.load %arg7[%c16, %c0_27] : memref<24x256xf32, #tpu.memory_space<vmem>>, vector<8x256xf32>
    %cst_28 = arith.constant dense<0.000000e+00> : vector<256x128xf32>
    %38 = tpu.matmul %36, %35, %cst_28 {dimension_numbers = #tpu.dot_dimension_numbers<[1], [0], [0], [1], [0, 0, 1, 1], [], []>} : vector<256x16xf32>, vector<16x128xf32>, vector<256x128xf32> -> vector<256x128xf32>
    %39 = arith.mulf %38, %27 : vector<256x128xf32>
    %cst_29 = arith.constant dense<0.000000e+00> : vector<8x128xf32>
    %40 = tpu.matmul %37, %39, %cst_29 {dimension_numbers = #tpu.dot_dimension_numbers<[1], [0], [0], [1], [0, 0, 1, 1], [], []>} : vector<8x256xf32>, vector<256x128xf32>, vector<8x128xf32> -> vector<8x128xf32>
    %41 = tpu.iota {dimensions = array<i32: 0>} : vector<8x128xi32>
    %c6_i32 = arith.constant 6 : i32
    %42 = vector.broadcast %c6_i32 : i32 to vector<8x128xi32>
    %43 = arith.cmpi slt, %41, %42 : vector<8x128xi32>
    %cst_30 = arith.constant -3.40282347E+38 : f32
    %44 = vector.broadcast %cst_30 : f32 to vector<8x128xf32>
    %45 = arith.select %43, %40, %44 : vector<8x128xi1>, vector<8x128xf32>
    %cst_31 = arith.constant dense<0xFF800000> : vector<128xf32>
    %46 = vector.multi_reduction <maximumf>, %45, %cst_31 [0] : vector<8x128xf32> to vector<128xf32>
    %47 = vector.shape_cast %46 : vector<128xf32> to vector<1x128xf32>
    %48 = vector.broadcast %47 : vector<1x128xf32> to vector<8x128xf32>
    %49 = arith.subf %45, %48 : vector<8x128xf32>
    %50 = math.exp %49 : vector<8x128xf32>
    %cst_32 = arith.constant dense<0.000000e+00> : vector<128xf32>
    %51 = vector.multi_reduction <add>, %50, %cst_32 [0] : vector<8x128xf32> to vector<128xf32>
    %52 = vector.shape_cast %51 : vector<128xf32> to vector<1x128xf32>
    %53 = tpu.reciprocal %52 : vector<1x128xf32> -> vector<1x128xf32>
    %54 = vector.broadcast %53 : vector<1x128xf32> to vector<8x128xf32>
    %55 = arith.mulf %50, %54 : vector<8x128xf32>
    %c0_33 = arith.constant 0 : index
    %c0_34 = arith.constant 0 : index
    %56 = vector.load %arg8[%c0_33, %c0_34] : memref<8x128xf32, #tpu.memory_space<vmem>>, vector<8x128xf32>
    tpu.vector_store %arg8[%c0_33, %c0_34], %55 {strides = array<i32>} : memref<8x128xf32, #tpu.memory_space<vmem>>, vector<8x128xf32>,
    return
  }
  func.func @transform_0(%arg0: i32) -> (i32, i32) {
    %c0_i32 = arith.constant 0 : i32
    %c0_i32_0 = arith.constant 0 : i32
    return %c0_i32, %arg0 : i32, i32
  }
  func.func @transform_1(%arg0: i32) -> (i32, i32) {
    %c0_i32 = arith.constant 0 : i32
    %c0_i32_0 = arith.constant 0 : i32
    return %c0_i32, %arg0 : i32, i32
  }
  func.func @transform_2(%arg0: i32) -> (i32, i32) {
    %c0_i32 = arith.constant 0 : i32
    %c0_i32_0 = arith.constant 0 : i32
    %c0_i32_1 = arith.constant 0 : i32
    return %c0_i32, %c0_i32_0 : i32, i32
  }
  func.func @transform_3(%arg0: i32) -> (i32, i32) {
    %c0_i32 = arith.constant 0 : i32
    %c0_i32_0 = arith.constant 0 : i32
    %c0_i32_1 = arith.constant 0 : i32
    return %c0_i32, %c0_i32_0 : i32, i32
  }
  func.func @transform_4(%arg0: i32) -> (i32, i32) {
    %c0_i32 = arith.constant 0 : i32
    %c0_i32_0 = arith.constant 0 : i32
    %c0_i32_1 = arith.constant 0 : i32
    return %c0_i32, %c0_i32_0 : i32, i32
  }
  func.func @transform_5(%arg0: i32) -> (i32, i32) {
    %c0_i32 = arith.constant 0 : i32
    %c0_i32_0 = arith.constant 0 : i32
    %c0_i32_1 = arith.constant 0 : i32
    return %c0_i32, %c0_i32_0 : i32, i32
  }
  func.func @transform_6(%arg0: i32) -> (i32, i32) {
    %c0_i32 = arith.constant 0 : i32
    %c0_i32_0 = arith.constant 0 : i32
    %c0_i32_1 = arith.constant 0 : i32
    return %c0_i32, %c0_i32_0 : i32, i32
  }
  func.func @transform_7(%arg0: i32) -> (i32, i32) {
    %c0_i32 = arith.constant 0 : i32
    %c0_i32_0 = arith.constant 0 : i32
    return %c0_i32, %arg0 : i32, i32
  }
}

module attributes {stable_mosaic.version = 11 : i64} {
  func.func @texture_basis_projector_kernel(%arg0: i32, %arg1: memref<8x128xf32, #tpu.memory_space<vmem>>, %arg2: memref<10x128xf32, #tpu.memory_space<vmem>>, %arg3: memref<32x10xf32, #tpu.memory_space<vmem>>, %arg4: memref<32x34xf32, #tpu.memory_space<vmem>>, %arg5: memref<256x33xf32, #tpu.memory_space<vmem>>, %arg6: memref<256x26xf32, #tpu.memory_space<vmem>>, %arg7: memref<24x256xf32, #tpu.memory_space<vmem>>, %arg8: memref<8x128xf32, #tpu.memory_space<vmem>>) attributes {dimension_semantics = [#tpu.dimension_semantics<parallel>], iteration_bounds = array<i64: 1>, scalar_prefetch = 0 : i64, scratch_operands = 0 : i64, tpu.core_type = #tpu.core_type<tc>, window_params = [{transform_indices = @transform_0, window_bounds = array<i64: 8, 128>}, {transform_indices = @transform_1, window_bounds = array<i64: 10, 128>}, {pipeline_mode = #tpu.pipeline_mode<synchronous>, transform_indices = @transform_2, window_bounds = array<i64: 32, 10>}, {pipeline_mode = #tpu.pipeline_mode<synchronous>, transform_indices = @transform_3, window_bounds = array<i64: 32, 34>}, {pipeline_mode = #tpu.pipeline_mode<synchronous>, transform_indices = @transform_4, window_bounds = array<i64: 256, 33>}, {pipeline_mode = #tpu.pipeline_mode<synchronous>, transform_indices = @transform_5, window_bounds = array<i64: 256, 26>}, {pipeline_mode = #tpu.pipeline_mode<synchronous>, transform_indices = @transform_6, window_bounds = array<i64: 24, 256>}, {transform_indices = @transform_7, window_bounds = array<i64: 8, 128>}]} {
    %c0 = arith.constant 0 : index
    %c0_0 = arith.constant 0 : index
    %0 = vector.load %arg1[%c0, %c0_0] : memref<8x128xf32, #tpu.memory_space<vmem>>, vector<8x128xf32>
    %c0_1 = arith.constant 0 : index
    %c0_2 = arith.constant 0 : index
    %1 = vector.load %arg3[%c0_1, %c0_2] : memref<32x10xf32, #tpu.memory_space<vmem>>, vector<32x8xf32>
    %c0_3 = arith.constant 0 : index
    %c8 = arith.constant 8 : index
    %2 = vector.load %arg3[%c0_3, %c8] : memref<32x10xf32, #tpu.memory_space<vmem>>, vector<32x1xf32>
    %c0_4 = arith.constant 0 : index
    %c9 = arith.constant 9 : index
    %3 = vector.load %arg3[%c0_4, %c9] : memref<32x10xf32, #tpu.memory_space<vmem>>, vector<32x1xf32>
    %cst = arith.constant dense<0.000000e+00> : vector<32x128xf32>
    %4 = tpu.matmul %1, %0, %cst {dimension_numbers = #tpu.dot_dimension_numbers<[1], [0], [0], [1], [0, 0, 1, 1], [], []>} : vector<32x8xf32>, vector<8x128xf32>, vector<32x128xf32> -> vector<32x128xf32>
    %5 = vector.broadcast %2 : vector<32x1xf32> to vector<32x128xf32>
    %6 = arith.addf %4, %5 : vector<32x128xf32>
    %cst_5 = arith.constant 0.000000e+00 : f32
    %7 = vector.broadcast %cst_5 : f32 to vector<32x128xf32>
    %8 = arith.cmpf oge, %6, %7 : vector<32x128xf32>
    %9 = vector.broadcast %3 : vector<32x1xf32> to vector<32x128xf32>
    %10 = arith.mulf %9, %6 : vector<32x128xf32>
    %11 = arith.select %8, %6, %10 : vector<32x128xi1>, vector<32x128xf32>
    %c0_6 = arith.constant 0 : index
    %c0_7 = arith.constant 0 : index
    %12 = vector.load %arg4[%c0_6, %c0_7] : memref<32x34xf32, #tpu.memory_space<vmem>>, vector<32x32xf32>
    %c0_8 = arith.constant 0 : index
    %c32 = arith.constant 32 : index
    %13 = vector.load %arg4[%c0_8, %c32] : memref<32x34xf32, #tpu.memory_space<vmem>>, vector<32x1xf32>
    %c0_9 = arith.constant 0 : index
    %c33 = arith.constant 33 : index
    %14 = vector.load %arg4[%c0_9, %c33] : memref<32x34xf32, #tpu.memory_space<vmem>>, vector<32x1xf32>
    %cst_10 = arith.constant dense<0.000000e+00> : vector<32x128xf32>
    %15 = tpu.matmul %12, %11, %cst_10 {dimension_numbers = #tpu.dot_dimension_numbers<[1], [0], [0], [1], [0, 0, 1, 1], [], []>} : vector<32x32xf32>, vector<32x128xf32>, vector<32x128xf32> -> vector<32x128xf32>
    %16 = vector.broadcast %13 : vector<32x1xf32> to vector<32x128xf32>
    %17 = arith.addf %15, %16 : vector<32x128xf32>
    %cst_11 = arith.constant 0.000000e+00 : f32
    %18 = vector.broadcast %cst_11 : f32 to vector<32x128xf32>
    %19 = arith.cmpf oge, %17, %18 : vector<32x128xf32>
    %20 = vector.broadcast %14 : vector<32x1xf32> to vector<32x128xf32>
    %21 = arith.mulf %20, %17 : vector<32x128xf32>
    %22 = arith.select %19, %17, %21 : vector<32x128xi1>, vector<32x128xf32>
    %c0_12 = arith.constant 0 : index
    %c0_13 = arith.constant 0 : index
    %23 = vector.load %arg5[%c0_12, %c0_13] : memref<256x33xf32, #tpu.memory_space<vmem>>, vector<256x32xf32>
    %c0_14 = arith.constant 0 : index
    %c32_15 = arith.constant 32 : index
    %24 = vector.load %arg5[%c0_14, %c32_15] : memref<256x33xf32, #tpu.memory_space<vmem>>, vector<256x1xf32>
    %cst_16 = arith.constant dense<0.000000e+00> : vector<256x128xf32>
    %25 = tpu.matmul %23, %22, %cst_16 {dimension_numbers = #tpu.dot_dimension_numbers<[1], [0], [0], [1], [0, 0, 1, 1], [], []>} : vector<256x32xf32>, vector<32x128xf32>, vector<256x128xf32> -> vector<256x128xf32>
    %26 = vector.broadcast %24 : vector<256x1xf32> to vector<256x128xf32>
    %27 = arith.addf %25, %26 : vector<256x128xf32>
    %c0_17 = arith.constant 0 : index
    %c0_18 = arith.constant 0 : index
    %28 = vector.load %arg2[%c0_17, %c0_18] : memref<10x128xf32, #tpu.memory_space<vmem>>, vector<10x128xf32>
    %c0_19 = arith.constant 0 : index
    %c0_20 = arith.constant 0 : index
    %29 = vector.load %arg6[%c0_19, %c0_20] : memref<256x26xf32, #tpu.memory_space<vmem>>, vector<256x10xf32>
    %c0_21 = arith.constant 0 : index
    %c0_22 = arith.constant 0 : index
    %30 = vector.load %arg7[%c0_21, %c0_22] : memref<24x256xf32, #tpu.memory_space<vmem>>, vector<16x256xf32>
    %cst_23 = arith.constant dense<0.000000e+00> : vector<256x128xf32>
    %31 = tpu.matmul %29, %28, %cst_23 {dimension_numbers = #tpu.dot_dimension_numbers<[1], [0], [0], [1], [0, 0, 1, 1], [], []>} : vector<256x10xf32>, vector<10x128xf32>, vector<256x128xf32> -> vector<256x128xf32>
    %32 = arith.mulf %31, %27 : vector<256x128xf32>
    %cst_24 = arith.constant dense<0.000000e+00> : vector<16x128xf32>
    %33 = tpu.matmul %30, %32, %cst_24 {dimension_numbers = #tpu.dot_dimension_numbers<[1], [0], [0], [1], [0, 0, 1, 1], [], []>} : vector<16x256xf32>, vector<256x128xf32>, vector<16x128xf32> -> vector<16x128xf32>
    %cst_25 = arith.constant 0.000000e+00 : f32
    %34 = vector.broadcast %cst_25 : f32 to vector<16x128xf32>
    %35 = arith.maximumf %33, %34 : vector<16x128xf32>
    %c0_26 = arith.constant 0 : index
    %c10 = arith.constant 10 : index
    %36 = vector.load %arg6[%c0_26, %c10] : memref<256x26xf32, #tpu.memory_space<vmem>>, vector<256x16xf32>
    %c16 = arith.constant 16 : index
    %c0_27 = arith.constant 0 : index
    %37 = vector.load %arg7[%c16, %c0_27] : memref<24x256xf32, #tpu.memory_space<vmem>>, vector<8x256xf32>
    %cst_28 = arith.constant dense<0.000000e+00> : vector<256x128xf32>
    %38 = tpu.matmul %36, %35, %cst_28 {dimension_numbers = #tpu.dot_dimension_numbers<[1], [0], [0], [1], [0, 0, 1, 1], [], []>} : vector<256x16xf32>, vector<16x128xf32>, vector<256x128xf32> -> vector<256x128xf32>
    %39 = arith.mulf %38, %27 : vector<256x128xf32>
    %cst_29 = arith.constant dense<0.000000e+00> : vector<8x128xf32>
    %40 = tpu.matmul %37, %39, %cst_29 {dimension_numbers = #tpu.dot_dimension_numbers<[1], [0], [0], [1], [0, 0, 1, 1], [], []>} : vector<8x256xf32>, vector<256x128xf32>, vector<8x128xf32> -> vector<8x128xf32>
    %41 = tpu.iota {dimensions = array<i32: 0>} : vector<8x128xi32>
    %c6_i32 = arith.constant 6 : i32
    %42 = vector.broadcast %c6_i32 : i32 to vector<8x128xi32>
    %43 = arith.cmpi slt, %41, %42 : vector<8x128xi32>
    %cst_30 = arith.constant -3.40282347E+38 : f32
    %44 = vector.broadcast %cst_30 : f32 to vector<8x128xf32>
    %45 = arith.select %43, %40, %44 : vector<8x128xi1>, vector<8x128xf32>
    %cst_31 = arith.constant dense<0xFF800000> : vector<128xf32>
    %46 = vector.multi_reduction <maximumf>, %45, %cst_31 [0] : vector<8x128xf32> to vector<128xf32>
    %47 = vector.shape_cast %46 : vector<128xf32> to vector<1x128xf32>
    %48 = vector.broadcast %47 : vector<1x128xf32> to vector<8x128xf32>
    %49 = arith.subf %45, %48 : vector<8x128xf32>
    %50 = math.exp %49 : vector<8x128xf32>
    %cst_32 = arith.constant dense<0.000000e+00> : vector<128xf32>
    %51 = vector.multi_reduction <add>, %50, %cst_32 [0] : vector<8x128xf32> to vector<128xf32>
    %52 = vector.shape_cast %51 : vector<128xf32> to vector<1x128xf32>
    %53 = tpu.reciprocal %52 : vector<1x128xf32> -> vector<1x128xf32>
    %54 = vector.broadcast %53 : vector<1x128xf32> to vector<8x128xf32>
    %55 = arith.mulf %50, %54 : vector<8x128xf32>
    %c0_33 = arith.constant 0 : index
    %c0_34 = arith.constant 0 : index
    %56 = vector.load %arg8[%c0_33, %c0_34] : memref<8x128xf32, #tpu.memory_space<vmem>>, vector<8x128xf32>
    tpu.vector_store %arg8[%c0_33, %c0_34], %55 {strides = array<i32>} : memref<8x128xf32, #tpu.memory_space<vmem>>, vector<8x128xf32>,
    return
  }
  func.func @transform_0(%arg0: i32) -> (i32, i32) {
    %c0_i32 = arith.constant 0 : i32
    %c0_i32_0 = arith.constant 0 : i32
    return %c0_i32, %arg0 : i32, i32
  }
  func.func @transform_1(%arg0: i32) -> (i32, i32) {
    %c0_i32 = arith.constant 0 : i32
    %c0_i32_0 = arith.constant 0 : i32
    return %c0_i32, %arg0 : i32, i32
  }
  func.func @transform_2(%arg0: i32) -> (i32, i32) {
    %c0_i32 = arith.constant 0 : i32
    %c0_i32_0 = arith.constant 0 : i32
    %c0_i32_1 = arith.constant 0 : i32
    return %c0_i32, %c0_i32_0 : i32, i32
  }
  func.func @transform_3(%arg0: i32) -> (i32, i32) {
    %c0_i32 = arith.constant 0 : i32
    %c0_i32_0 = arith.constant 0 : i32
    %c0_i32_1 = arith.constant 0 : i32
    return %c0_i32, %c0_i32_0 : i32, i32
  }
  func.func @transform_4(%arg0: i32) -> (i32, i32) {
    %c0_i32 = arith.constant 0 : i32
    %c0_i32_0 = arith.constant 0 : i32
    %c0_i32_1 = arith.constant 0 : i32
    return %c0_i32, %c0_i32_0 : i32, i32
  }
  func.func @transform_5(%arg0: i32) -> (i32, i32) {
    %c0_i32 = arith.constant 0 : i32
    %c0_i32_0 = arith.constant 0 : i32
    %c0_i32_1 = arith.constant 0 : i32
    return %c0_i32, %c0_i32_0 : i32, i32
  }
  func.func @transform_6(%arg0: i32) -> (i32, i32) {
    %c0_i32 = arith.constant 0 : i32
    %c0_i32_0 = arith.constant 0 : i32
    %c0_i32_1 = arith.constant 0 : i32
    return %c0_i32, %c0_i32_0 : i32, i32
  }
  func.func @transform_7(%arg0: i32) -> (i32, i32) {
    %c0_i32 = arith.constant 0 : i32
    %c0_i32_0 = arith.constant 0 : i32
    return %c0_i32, %arg0 : i32, i32
  }
}

</mosaic_0001>

<bundles_post_ra>
// kernel: tpu_custom_call.1
= control target key start
LH: loop header
LB: loop body
LE: loop exit
PB: predicated region body
PF: predicated region fallthrough
CT: control target
= control target key end

     0   :  { %vm52_vm0 = vcmask 64512   ;;  %s3397_s0 = inlined_call_operand.vmem [shape: f32[8,128], index: 0, kind: input, shape index: {}]   ;;  %s3398_s1 = inlined_call_operand.vmem [shape: f32[10,128], index: 1, kind: input, shape index: {}]   ;;  %s3399_s2 = inlined_call_operand.vmem [shape: f32[32,10], index: 2, kind: input, shape index: {}]   ;;  %s3400_s3 = inlined_call_operand.vmem [shape: f32[32,34], index: 3, kind: input, shape index: {}]   ;;  %s3401_s4 = inlined_call_operand.vmem [shape: f32[256,33], index: 4, kind: input, shape index: {}]   ;;  %s3402_s5 = inlined_call_operand.vmem [shape: f32[256,26], index: 5, kind: input, shape index: {}]   ;;  %s3403_s6 = inlined_call_operand.vmem [shape: f32[24,256], index: 6, kind: input, shape index: {}]   ;;  %s3404_s7 = inlined_call_operand.hbm [shape: f32[8,128], index: 7, kind: output, shape index: {}]  }
   0x1   :  { %v27_v0 = vld [vmem:[%s3397_s0] sm:$0xff]  ;;  %v29_v2 = vld [vmem:[%s3399_s2 + $0x8] sm:$0xff]  ;;  %v30_v3 = vld [vmem:[%s3399_s2 + $0x10] sm:$0xff] }
   0x2   :  { %v28_v1 = vld [vmem:[%s3399_s2] sm:$0xff]  ;;  %2063 = vmatprep.subr.mxu0 %v27_v0 }
   0x3   :  { %2065 = vmatprep.mubr.msk.f32.mxu0 %vm52_vm0, %v28_v1 }
   0x4   :  { %12 = vsyncpa [#allocation3], 0  ;;  %2064 = vmatpush3.msra.mxu0 %v27_v0  ;;  %v2383_v4 = vmov 8   ;;  %v31_v5 = vld [vmem:[%s3399_s2 + $0x18] sm:$0xff]  ;;  %v2384_v6 = vmov 9   ;;  %v174_v7 = vld [vmem:[%s3400_s3] sm:$0xff] }
   0x5   :  { %2342 = vset.pattern.permute.xlu0 %v2383_v4  ;;  %2066 = vmatmul.mubr.msk.f32.vlgmr.msra.gmra.mrb[0].mxu0 %vm52_vm0, %v29_v2  ;;  %vm198_vm1 = vcmask 261120   ;;  %v175_v8 = vld [vmem:[%s3400_s3 + $0x8] sm:$0xff]  ;;  %v2385_v9 = vmov 32   ;;  %v176_v10 = vld [vmem:[%s3400_s3 + $0x10] sm:$0xff]  ;;  %v2386_v11 = vmov 33   ;;  %v177_v12 = vld [vmem:[%s3400_s3 + $0x18] sm:$0xff] }
   0x6   :  { %34 = vperm.xlu0 %2342, %v28_v1   ;;  %2068 = vmatprep.mubr.msk.f32.mxu0 %vm52_vm0, %v30_v3  ;;  %v801_v39 = vld [vmem:[%s3398_s1] sm:$0xff]  ;;  %v802_v40 = vld [vmem:[%s3398_s1 + $0x8] sm:$0x3]  ;;  %vm936_vm6 = vcmask 1041408   ;;  %vm2387_vm7 = vmmov 1   ;;  %vm839_vm9 = vcmask 80896  }
   0x7   :  { %2343 = vset.pattern.permute.xlu1 %v2384_v6  ;;  %v2261_v41 = vpack.c.bf16 %v802_v40, %v801_v39  ;;  %vm2262_vm8 = vmpackc.low %vm936_vm6, %vm2387_vm7  ;;  %v320_v42 = vld [vmem:[%s3401_s4] sm:$0xff]  ;;  %v2485_v44 = vld [vmem:[%s3402_s5 + $0x8] sm:$0xff]  ;;  %s2388_s14 = smov 118   ;;  %vm1340_vm14 = vcmask 130048  }
   0x8   :  { %151 = vperm.xlu1 %2343, %v28_v1   ;;  %v2478_v43 = vld [vmem:[%s3402_s5] sm:$0xff]  ;;  %v2492_v45 = vld [vmem:[%s3402_s5 + $0x10] sm:$0xff]  ;;  %v2499_v46 = vld [vmem:[%s3402_s5 + $0x18] sm:$0xff] }
   0x9   :  { %2069 = vmatmul.mubr.msk.f32.gmra.mrb[2].mxu0 %vm52_vm0, %v31_v5  ;;  %2263 = vmatprep.subr.msk.bf16.mxu1 %vm2262_vm8, %v2261_v41  ;;  %v2506_v47 = vld [vmem:[%s3402_s5 + $0x20] sm:$0xff]  ;;  %v2513_v48 = vld [vmem:[%s3402_s5 + $0x28] sm:$0xff]  ;;  %v2520_v49 = vld [vmem:[%s3402_s5 + $0x30] sm:$0xff] }
   0xa   :  { %39 = vperm.xlu0 %2342, %v29_v2   ;;  %2079 = vmatprep.mubr.msk.f32.mxu0 %vm198_vm1, %v174_v7  ;;  %v2527_v50 = vld [vmem:[%s3402_s5 + $0x38] sm:$0xff]  ;;  %v2534_v51 = vld [vmem:[%s3402_s5 + $0x40] sm:$0xff]  ;;  %v2541_v52 = vld [vmem:[%s3402_s5 + $0x48] sm:$0xff] }
   0xb   :  { %2266 = vmatpush3.bf16.msk.msra.mxu1 %vm2262_vm8, %v2261_v41  ;;  %2145 = vmatprep.mubr.msk.f32.mxu1 %vm839_vm9, %v2478_v43  ;;  %v2546_v53 = vld [vmem:[%s3401_s4 + $0x80] sm:$0xff]  ;;  %v2554_v54 = vld [vmem:[%s3402_s5 + $0x50] sm:$0xff]  ;;  %v2561_v55 = vld [vmem:[%s3402_s5 + $0x58] sm:$0xff] }
   0xc   :  { %155 = vperm.xlu1 %2343, %v29_v2   ;;  %3436 = vst [vmem:[#allocation5_spill] sm:$0xff] %v2554_v54  ;;  %3437 = vst [vmem:[#allocation6_spill] sm:$0xff] %v2561_v55  ;;  %v2568_v56 = vld [vmem:[%s3402_s5 + $0x60] sm:$0xff]  ;;  %v2573_v57 = vld [vmem:[%s3401_s4 + $0x8] sm:$0xff] }
   0xd   :  { %3438 = vst [vmem:[#allocation7_spill] sm:$0xff] %v2568_v56  ;;  %v2580_v58 = vld [vmem:[%s3402_s5 + $0x68] sm:$0xff]  ;;  %v2588_v59 = vld [vmem:[%s3402_s5 + $0x70] sm:$0xff]  ;;  %v2595_v60 = vld [vmem:[%s3402_s5 + $0x78] sm:$0xff] }
   0xe   :  { %44 = vperm.xlu0 %2342, %v30_v3   ;;  %2146 = vmatmul.mubr.msk.f32.vlgmr.msra.gmra.mrb[0].mxu1 %vm839_vm9, %v2485_v44  ;;  %3439 = vst [vmem:[#allocation8_spill] sm:$0xff] %v2580_v58  ;;  %3440 = vst [vmem:[#allocation9_spill] sm:$0xff] %v2588_v59  ;;  %v2600_v61 = vld [vmem:[%s3401_s4 + $0x98] sm:$0xff]  ;;  %v2608_v62 = vld [vmem:[%s3401_s4 + $0x88] sm:$0xff] }
   0xf   :  { %2148 = vmatprep.mubr.msk.f32.mxu1 %vm839_vm9, %v2492_v45  ;;  %3441 = vst [vmem:[#allocation10_spill] sm:$0xff] %v2595_v60  ;;  %v2614_v63 = vld [vmem:[%s3402_s5 + $0x80] sm:$0xff]  ;;  %v2619_v0 = vld [vmem:[%s3401_s4 + $0x18] sm:$0xff]  ;;  %v2626_v1 = vld [vmem:[%s3402_s5 + $0x88] sm:$0xff] }
  0x10   :  { %2344 = vset.pattern.permute.xlu1 %v2383_v4  ;;  %3442 = vst [vmem:[#allocation11_spill] sm:$0xff] %v2614_v63  ;;  %3443 = vst [vmem:[#allocation12_spill] sm:$0xff] %v2626_v1  ;;  %v2634_v2 = vld [vmem:[%s3401_s4 + $0x90] sm:$0xff]  ;;  %v2647_v4 = vld [vmem:[%s3402_s5 + $0x98] sm:$0xff] }
  0x11   :  { %49 = vperm.xlu1 %2344, %v31_v5   ;;  %3445 = vst [vmem:[#allocation14_spill] sm:$0xff] %v2647_v4  ;;  %v335_v39 = vld [vmem:[%s3401_s4 + $0x78] sm:$0xff]  ;;  %v2864_v40 = vld [vmem:[%s3401_s4 + $0xf0] sm:$0xff] }
  0x12   :  { %2345 = vset.pattern.permute.xlu0 %v2384_v6  ;;  %2149 = vmatmul.mubr.msk.f32.gmra.mrb[2].mxu1 %vm839_vm9, %v2499_v46  ;;  %v334_v41 = vld [vmem:[%s3401_s4 + $0x70] sm:$0xff] }
  0x13   :  { %159 = vperm.xlu0 %2345, %v30_v3   ;;  %2151 = vmatprep.mubr.msk.f32.mxu1 %vm839_vm9, %v2506_v47  ;;  %v2640_v3 = vld [vmem:[%s3402_s5 + $0x90] sm:$0xff] }
  0x14   :  { %3444 = vst [vmem:[#allocation13_spill] sm:$0xff] %v2640_v3 }
  0x15   :  { %2346 = vset.pattern.permute.xlu1 %v2384_v6  ;;  %v2657_v6 = vld [vmem:[%s3401_s4 + $0x10] sm:$0xff] }
  0x16   :  { %163 = vperm.xlu1 %2346, %v31_v5   ;;  %2152 = vmatmul.mubr.msk.f32.gmra.mrb[4].mxu1 %vm839_vm9, %v2513_v48  ;;  %v2652_v5 = vld [vmem:[%s3401_s4 + $0xa8] sm:$0xff] }
  0x17   :  { %2348 = vset.pattern.permute.xlu0 %v2385_v9  ;;  %2154 = vmatprep.mubr.msk.f32.mxu1 %vm839_vm9, %v2520_v49 }
  0x18   :  { %185 = vperm.xlu0 %2348, %v175_v8  }
  0x1a   :  { %2347 = vset.pattern.permute.xlu1 %v2385_v9  ;;  %2155 = vmatmul.mubr.msk.f32.gmra.mrb[6].mxu1 %vm839_vm9, %v2527_v50 }
  0x1b   :  { %180 = vperm.xlu1 %2347, %v174_v7   ;;  %2157 = vmatprep.mubr.msk.f32.mxu1 %vm839_vm9, %v2534_v51 }
  0x1c   :  { %190 = vperm.xlu0 %2348, %v176_v10  }
  0x1e   :  { %2158 = vmatmul.mubr.msk.f32.gmra.mrb[8].mxu1 %vm839_vm9, %v2541_v52 }
  0x1f   :  { %2349 = vset.pattern.permute.xlu1 %v2386_v11  ;;  %2160 = vmatprep.mubr.msk.f32.mxu1 %vm839_vm9, %v2554_v54 }
  0x20   :  { %297 = vperm.xlu1 %2349, %v174_v7   ;;  %2351 = vset.pattern.permute.xlu0 %v2386_v11  ;;  %v2666_v7 = vld [vmem:[%s3402_s5 + $0xa0] sm:$0xff] }
  0x21   :  { %305 = vperm.xlu0 %2351, %v176_v10   ;;  %3446 = vst [vmem:[#allocation15_spill] sm:$0xff] %v2666_v7 }
  0x22   :  { %2161 = vmatmul.mubr.msk.f32.gmra.mrb[10].mxu1 %vm839_vm9, %v2561_v55 }
  0x23   :  { %2163 = vmatprep.mubr.msk.f32.mxu1 %vm839_vm9, %v2568_v56 }
  0x24   :  { %301 = vperm.xlu1 %2349, %v175_v8  }
  0x25   :  { %2354 = vset.pattern.permute.xlu0 %v2385_v9 }
  0x26   :  { %2164 = vmatmul.mubr.msk.f32.gmra.mrb[12].mxu1 %vm839_vm9, %v2580_v58  ;;  %439 = vperm.xlu0 %2354, %v2608_v62  }
  0x27   :  { %2166 = vmatprep.mubr.msk.f32.mxu1 %vm839_vm9, %v2588_v59 }
  0x28   :  { %2350 = vset.pattern.permute.xlu1 %v2385_v9 }
  0x29   :  { %195 = vperm.xlu1 %2350, %v177_v12  }
  0x2a   :  { %2167 = vmatmul.mubr.msk.f32.gmra.mrb[14].mxu1 %vm839_vm9, %v2595_v60  ;;  %444 = vperm.xlu0 %2354, %v2634_v2  }
  0x2b   :  { %2169 = vmatprep.mubr.msk.f32.mxu1 %vm839_vm9, %v2614_v63 }
  0x2d   :  { %2352 = vset.pattern.permute.xlu1 %v2386_v11  ;;  %v2692_v11 = vld [vmem:[%s3402_s5 + $0xb0] sm:$0xff] }
  0x2e   :  { %309 = vperm.xlu1 %2352, %v177_v12   ;;  %2170 = vmatmul.mubr.msk.f32.gmra.mrb[16].mxu1 %vm839_vm9, %v2626_v1  ;;  %3448 = vst [vmem:[#allocation17_spill] sm:$0xff] %v2692_v11 }
  0x2f   :  { %2172 = vmatprep.mubr.msk.f32.mxu1 %vm839_vm9, %v2640_v3  ;;  %364 = vperm.xlu0 %2354, %v2657_v6  }
  0x32   :  { %2353 = vset.pattern.permute.xlu1 %v2385_v9  ;;  %2173 = vmatmul.mubr.msk.f32.gmra.mrb[18].mxu1 %vm839_vm9, %v2647_v4  ;;  %v2678_v9 = vld [vmem:[%s3402_s5 + $0xa8] sm:$0xff] }
  0x33   :  { %434 = vperm.xlu1 %2353, %v2546_v53   ;;  %2175 = vmatprep.mubr.msk.f32.mxu1 %vm839_vm9, %v2666_v7  ;;  %3447 = vst [vmem:[#allocation16_spill] sm:$0xff] %v2678_v9 }
  0x36   :  { %2176 = vmatmul.mubr.msk.f32.gmra.mrb[20].mxu1 %vm839_vm9, %v2678_v9 }
  0x37   :  { %354 = vperm.xlu1 %2353, %v320_v42   ;;  %2178 = vmatprep.mubr.msk.f32.mxu1 %vm839_vm9, %v2692_v11 }
  0x3b   :  { %359 = vperm.xlu1 %2353, %v2573_v57  }
  0x3f   :  { %449 = vperm.xlu1 %2353, %v2600_v61  }
  0x43   :  { %369 = vperm.xlu1 %2353, %v2619_v0  }
  0x47   :  { %459 = vperm.xlu1 %2353, %v2652_v5  }
  0x85   :  { %v35_v14 = vpop.permute.xlu0 %34 }
  0x87   :  { %v152_v13 = vpop.permute.xlu1 %151 }
  0x89   :  { %v40_v16 = vpop.permute.xlu0 %39 }
  0x8b   :  { %v156_v15 = vpop.permute.xlu1 %155 }
  0x8d   :  { %v45_v19 = vpop.permute.xlu0 %44 }
  0x90   :  { %v50_v17 = vpop.permute.xlu1 %49 }
  0x92   :  { %v160_v29 = vpop.permute.xlu0 %159 }
  0x95   :  { %v164_v26 = vpop.permute.xlu1 %163 }
  0xd8   :  { %v2067_v18 = vpop.f32.mrb[0].mxu0 }
  0xd9   :  { %v133_v20 = vadd.f32 %v2067_v18, %v40_v16  ;;  %v127_v21 = vpop.f32.mrb[1].mxu0  ;;  %v2723_v16 = vld [vmem:[%s3401_s4 + $0x38] sm:$0xff]  ;;  %v2735_v18 = vld [vmem:[%s3401_s4 + $0xb0] sm:$0xff] }
  0xda   :  { %v128_v22 = vadd.f32 %v127_v21, %v35_v14  ;;  %v2709_v14 = vld [vmem:[%s3401_s4 + $0x20] sm:$0xff]  ;;  %v2756_v21 = vld [vmem:[%s3402_s5 + $0xd8] sm:$0xff] }
  0xdb   :  { %vm147_vm2 = vcmp.ge.f32.partialorder %v133_v20, 0.0  ;;  %v167_v23 = vmul.f32 %v156_v15, %v133_v20  ;;  %v2718_v15 = vld [vmem:[%s3402_s5 + $0xc0] sm:$0xff]  ;;  %3453 = vst [vmem:[#allocation22_spill] sm:$0xff] %v2756_v21 }
  0xdc   :  { %vm146_vm3 = vcmp.ge.f32.partialorder %v128_v22, 0.0  ;;  %v166_v24 = vmul.f32 %v152_v13, %v128_v22  ;;  %v2070_v25 = vpop.f32.mrb[2].mxu0  ;;  %v2704_v13 = vld [vmem:[%s3402_s5 + $0xb8] sm:$0xff]  ;;  %3450 = vst [vmem:[#allocation19_spill] sm:$0xff] %v2718_v15 }
  0xdd   :  { %v143_v27 = vadd.f32 %v2070_v25, %v50_v17  ;;  %v137_v28 = vpop.f32.mrb[3].mxu0  ;;  %v171_v30 = vsel %vm147_vm2, %v133_v20, %v167_v23  ;;  %3449 = vst [vmem:[#allocation18_spill] sm:$0xff] %v2704_v13  ;;  %2179 = vmatmul.mubr.msk.f32.gmra.mrb[22].mxu1 %vm839_vm9, %v2704_v13  ;;  %v2730_v17 = vld [vmem:[%s3402_s5 + $0xc8] sm:$0xff]  ;;  %v2770_v23 = vld [vmem:[%s3402_s5 + $0xe0] sm:$0xff] }
  0xde   :  { %v138_v31 = vadd.f32 %v137_v28, %v45_v19  ;;  %v170_v32 = vsel %vm146_vm3, %v128_v22, %v166_v24  ;;  %2181 = vmatprep.mubr.msk.f32.mxu1 %vm839_vm9, %v2718_v15  ;;  %3451 = vst [vmem:[#allocation20_spill] sm:$0xff] %v2730_v17  ;;  %v2744_v19 = vld [vmem:[%s3402_s5 + $0xd0] sm:$0xff]  ;;  %v2749_v20 = vld [vmem:[%s3401_s4 + $0xc8] sm:$0xff]  ;;  %3454 = vst [vmem:[#allocation23_spill] sm:$0xff] %v2770_v23 }
  0xdf   :  { %vm149_vm4 = vcmp.ge.f32.partialorder %v143_v27, 0.0  ;;  %v169_v33 = vmul.f32 %v164_v26, %v143_v27  ;;  %v2245_v34 = vpack.c.bf16 %v171_v30, %v170_v32  ;;  %3452 = vst [vmem:[#allocation21_spill] sm:$0xff] %v2744_v19  ;;  %v2761_v22 = vld [vmem:[%s3401_s4 + $0x30] sm:$0xff]  ;;  %v2775_v24 = vld [vmem:[%s3401_s4 + $0x48] sm:$0xff]  ;;  %v2787_v26 = vld [vmem:[%s3401_s4 + $0xc0] sm:$0xff] }
  0xe0   :  { %vm148_vm5 = vcmp.ge.f32.partialorder %v138_v31, 0.0  ;;  %v168_v35 = vmul.f32 %v160_v29, %v138_v31  ;;  %v2782_v25 = vld [vmem:[%s3402_s5 + $0xe8] sm:$0xff]  ;;  %v2801_v28 = vld [vmem:[%s3401_s4 + $0xd8] sm:$0xff]  ;;  %v2813_v30 = vld [vmem:[%s3401_s4 + $0x40] sm:$0xff] }
  0xe1   :  { %2246 = vmatprep.subr.bf16.mxu0 %v2245_v34  ;;  %v173_v36 = vsel %vm149_vm4, %v143_v27, %v169_v33  ;;  %2182 = vmatmul.mubr.msk.f32.gmra.mrb[24].mxu1 %vm839_vm9, %v2730_v17  ;;  %3455 = vst [vmem:[#allocation24_spill] sm:$0xff] %v2782_v25  ;;  %v2796_v27 = vld [vmem:[%s3402_s5 + $0xf0] sm:$0xff]  ;;  %v2808_v29 = vld [vmem:[%s3402_s5 + $0xf8] sm:$0xff]  ;;  %v2834_v33 = vld [vmem:[%s3401_s4 + $0xe8] sm:$0xff] }
  0xe2   :  { %2248 = vmatpush3.bf16.msra.mxu0 %v2245_v34  ;;  %v172_v37 = vsel %vm148_vm5, %v138_v31, %v168_v35  ;;  %2184 = vmatprep.mubr.msk.f32.mxu1 %vm839_vm9, %v2744_v19  ;;  %3456 = vst [vmem:[#allocation25_spill] sm:$0xff] %v2796_v27  ;;  %3457 = vst [vmem:[#allocation26_spill] sm:$0xff] %v2808_v29  ;;  %v2822_v31 = vld [vmem:[%s3401_s4 + $0x58] sm:$0xff]  ;;  %v2827_v32 = vld [vmem:[%s3401_s4 + $0xd0] sm:$0xff] }
  0xe3   :  { %v2249_v38 = vpack.c.bf16 %v173_v36, %v172_v37  ;;  %v330_v34 = vld [vmem:[%s3401_s4 + $0x50] sm:$0xff]  ;;  %v333_v35 = vld [vmem:[%s3401_s4 + $0x68] sm:$0xff]  ;;  %v2846_v36 = vld [vmem:[%s3401_s4 + $0xe0] sm:$0xff] }
  0xe4   :  { %v2852_v37 = vld [vmem:[%s3401_s4 + $0xf8] sm:$0xff] }
  0xe5   :  { %2250 = vmatprep.subr.bf16.mxu0 %v2249_v38  ;;  %2185 = vmatmul.mubr.msk.f32.gmra.mrb[26].mxu1 %vm839_vm9, %v2756_v21 }
  0xe6   :  { %2252 = vmatpush3.bf16.msra.mxu0 %v2249_v38  ;;  %2187 = vmatprep.mubr.msk.f32.mxu1 %vm839_vm9, %v2770_v23  ;;  %v332_v38 = vld [vmem:[%s3401_s4 + $0x60] sm:$0xff] }
  0xe9   :  { %2080 = vmatmul.mubr.msk.f32.vlgmr.msra.gmra.mrb[4].mxu0 %vm198_vm1, %v175_v8  ;;  %v2671_v8 = vld [vmem:[%s3401_s4 + $0x28] sm:$0xff]  ;;  %2188 = vmatmul.mubr.msk.f32.gmra.mrb[28].mxu1 %vm839_vm9, %v2782_v25  ;;  %v186_v25 = vpop.permute.xlu0 %185 }
  0xea   :  { %2082 = vmatprep.mubr.msk.f32.mxu0 %vm198_vm1, %v176_v10  ;;  %v2683_v10 = vld [vmem:[%s3401_s4 + $0xa0] sm:$0xff]  ;;  %379 = vperm.xlu1 %2353, %v2671_v8  }
  0xeb   :  { %454 = vperm.xlu0 %2354, %v2683_v10   ;;  %2190 = vmatprep.mubr.msk.f32.mxu1 %vm839_vm9, %v2796_v27 }
  0xed   :  { %2083 = vmatmul.mubr.msk.f32.gmra.mrb[6].mxu0 %vm198_vm1, %v177_v12  ;;  %v2697_v12 = vld [vmem:[%s3401_s4 + $0xb8] sm:$0xff]  ;;  %2191 = vmatmul.mubr.msk.f32.gmra.mrb[30].mxu1 %vm839_vm9, %v2808_v29  ;;  %v191_v19 = vpop.permute.xlu0 %190 }
  0xee   :  { %2093 = vmatprep.mubr.msk.f32.mxu0 %vm198_vm1, %v320_v42  ;;  %469 = vperm.xlu1 %2353, %v2697_v12   ;;  %v181_v42 = vpop.permute.xlu1 %180 }
  0xef   :  { %374 = vperm.xlu0 %2354, %v2709_v14  }
  0xf1   :  { %v306_v63 = vpop.permute.xlu0 %305 }
  0xf2   :  { %389 = vperm.xlu1 %2353, %v2723_v16   ;;  %v298_v29 = vpop.permute.xlu1 %297 }
  0xf3   :  { %464 = vperm.xlu0 %2354, %v2735_v18  }
  0xf6   :  { %479 = vperm.xlu1 %2353, %v2749_v20   ;;  %v302_v27 = vpop.permute.xlu1 %301 }
  0xf7   :  { %384 = vperm.xlu0 %2354, %v2761_v22  }
  0xfa   :  { %399 = vperm.xlu1 %2353, %v2775_v24   ;;  %v196_v23 = vpop.permute.xlu1 %195 }
  0xfb   :  { %474 = vperm.xlu0 %2354, %v2787_v26  }
  0xfe   :  { %489 = vperm.xlu1 %2353, %v2801_v28   ;;  %v310_v4 = vpop.permute.xlu1 %309 }
  0xff   :  { %394 = vperm.xlu0 %2354, %v2813_v30  }
 0x102   :  { %409 = vperm.xlu1 %2353, %v2822_v31  }
 0x103   :  { %484 = vperm.xlu0 %2354, %v2827_v32  }
 0x106   :  { %499 = vperm.xlu1 %2353, %v2834_v33  }
 0x107   :  { %404 = vperm.xlu0 %2354, %v330_v34  }
 0x10a   :  { %419 = vperm.xlu1 %2353, %v333_v35  }
 0x10b   :  { %494 = vperm.xlu0 %2354, %v2846_v36  }
 0x10e   :  { %509 = vperm.xlu1 %2353, %v2852_v37  }
 0x10f   :  { %414 = vperm.xlu0 %2354, %v332_v38  }
 0x112   :  { %429 = vperm.xlu1 %2353, %v335_v39  }
 0x113   :  { %504 = vperm.xlu0 %2354, %v2864_v40  }
 0x116   :  { %1278 = vrot.lane.b32.xlu1 %v2485_v44, %s2388_s14 }
 0x117   :  { %424 = vperm.xlu0 %2354, %v334_v41  }
 0x11a   :  { %1282 = vrot.lane.b32.xlu1 %v2499_v46, %s2388_s14 }
 0x11b   :  { %1276 = vrot.lane.b32.xlu0 %v2478_v43, %s2388_s14 }
 0x11e   :  { %1286 = vrot.lane.b32.xlu1 %v2513_v48, %s2388_s14  ;;  %v3460_v48 = vld [vmem:[#allocation6_spill] sm:$0xff] }
 0x11f   :  { %1280 = vrot.lane.b32.xlu0 %v2492_v45, %s2388_s14 }
 0x122   :  { %1290 = vrot.lane.b32.xlu1 %v2527_v50, %s2388_s14  ;;  %v3462_v50 = vld [vmem:[#allocation8_spill] sm:$0xff] }
 0x123   :  { %1284 = vrot.lane.b32.xlu0 %v2506_v47, %s2388_s14  ;;  %v3459_v47 = vld [vmem:[#allocation5_spill] sm:$0xff] }
 0x126   :  { %1294 = vrot.lane.b32.xlu1 %v2541_v52, %s2388_s14  ;;  %v3463_v52 = vld [vmem:[#allocation9_spill] sm:$0xff] }
 0x127   :  { %1288 = vrot.lane.b32.xlu0 %v2520_v49, %s2388_s14  ;;  %v3461_v49 = vld [vmem:[#allocation7_spill] sm:$0xff] }
 0x12a   :  { %1298 = vrot.lane.b32.xlu1 %v3460_v48, %s2388_s14  ;;  %v3472_v48 = vld [vmem:[#allocation18_spill] sm:$0xff] }
 0x12b   :  { %1292 = vrot.lane.b32.xlu0 %v2534_v51, %s2388_s14 }
 0x12e   :  { %1302 = vrot.lane.b32.xlu1 %v3462_v50, %s2388_s14  ;;  %v3474_v50 = vld [vmem:[#allocation20_spill] sm:$0xff] }
 0x12f   :  { %1296 = vrot.lane.b32.xlu0 %v3459_v47, %s2388_s14  ;;  %v3471_v47 = vld [vmem:[#allocation17_spill] sm:$0xff] }
 0x133   :  { %1300 = vrot.lane.b32.xlu0 %v3461_v49, %s2388_s14  ;;  %v3473_v49 = vld [vmem:[#allocation19_spill] sm:$0xff] }
 0x137   :  { %1304 = vrot.lane.b32.xlu0 %v3463_v52, %s2388_s14 }
 0x1bc   :  { %v2081_v21 = vpop.f32.mrb[4].mxu0 }
 0x1bd   :  { %v279_v17 = vadd.f32 %v2081_v21, %v186_v25  ;;  %v273_v15 = vpop.f32.mrb[5].mxu0 }
 0x1be   :  { %v274_v13 = vadd.f32 %v273_v15, %v181_v42 }
 0x1bf   :  { %vm293_vm10 = vcmp.ge.f32.partialorder %v279_v17, 0.0  ;;  %v313_v11 = vmul.f32 %v302_v27, %v279_v17 }
 0x1c0   :  { %vm292_vm11 = vcmp.ge.f32.partialorder %v274_v13, 0.0  ;;  %v312_v9 = vmul.f32 %v298_v29, %v274_v13  ;;  %v2084_v7 = vpop.f32.mrb[6].mxu0 }
 0x1c1   :  { %v289_v3 = vadd.f32 %v2084_v7, %v196_v23  ;;  %v283_v1 = vpop.f32.mrb[7].mxu0  ;;  %v317_v60 = vsel %vm293_vm10, %v279_v17, %v313_v11 }
 0x1c2   :  { %v284_v59 = vadd.f32 %v283_v1, %v191_v19  ;;  %v316_v58 = vsel %vm292_vm11, %v274_v13, %v312_v9 }
 0x1c3   :  { %vm295_vm12 = vcmp.ge.f32.partialorder %v289_v3, 0.0  ;;  %v315_v56 = vmul.f32 %v310_v4, %v289_v3  ;;  %v2253_v55 = vpack.c.bf16 %v317_v60, %v316_v58 }
 0x1c4   :  { %vm294_vm13 = vcmp.ge.f32.partialorder %v284_v59, 0.0  ;;  %v314_v54 = vmul.f32 %v306_v63, %v284_v59 }
 0x1c5   :  { %2254 = vmatprep.subr.bf16.mxu0 %v2253_v55  ;;  %v319_v21 = vsel %vm295_vm12, %v289_v3, %v315_v56 }
 0x1c6   :  { %2256 = vmatpush3.bf16.msra.mxu0 %v2253_v55  ;;  %v318_v15 = vsel %vm294_vm13, %v284_v59, %v314_v54 }
 0x1c7   :  { %v2257_v25 = vpack.c.bf16 %v319_v21, %v318_v15  ;;  %v3469_v21 = vld [vmem:[#allocation15_spill] sm:$0xff]  ;;  %v3470_v15 = vld [vmem:[#allocation16_spill] sm:$0xff] }
 0x1c9   :  { %2258 = vmatprep.subr.bf16.mxu0 %v2257_v25 }
 0x1ca   :  { %2260 = vmatpush3.bf16.msra.mxu0 %v2257_v25 }
 0x1cd   :  { %2094 = vmatmul.mubr.msk.f32.vlgmr.msra.gmra.mrb[8].mxu0 %vm198_vm1, %v2573_v57 }
 0x1ce   :  { %2096 = vmatprep.mubr.msk.f32.mxu0 %vm198_vm1, %v2657_v6 }
 0x1d1   :  { %2097 = vmatmul.mubr.msk.f32.gmra.mrb[10].mxu0 %vm198_vm1, %v2619_v0 }
 0x1d2   :  { %2099 = vmatprep.mubr.msk.f32.mxu0 %vm198_vm1, %v2709_v14 }
 0x1d5   :  { %2100 = vmatmul.mubr.msk.f32.gmra.mrb[12].mxu0 %vm198_vm1, %v2671_v8 }
 0x1d6   :  { %2102 = vmatprep.mubr.msk.f32.mxu0 %vm198_vm1, %v2761_v22 }
 0x1d9   :  { %2103 = vmatmul.mubr.msk.f32.gmra.mrb[14].mxu0 %vm198_vm1, %v2723_v16 }
 0x1da   :  { %2105 = vmatprep.mubr.msk.f32.mxu0 %vm198_vm1, %v2813_v30 }
 0x1dd   :  { %2106 = vmatmul.mubr.msk.f32.gmra.mrb[16].mxu0 %vm198_vm1, %v2775_v24 }
 0x1de   :  { %2108 = vmatprep.mubr.msk.f32.mxu0 %vm198_vm1, %v330_v34  ;;  %v3464_v34 = vld [vmem:[#allocation10_spill] sm:$0xff] }
 0x1df   :  { %1306 = vrot.lane.b32.xlu1 %v3464_v34, %s2388_s14 }
 0x1e1   :  { %2109 = vmatmul.mubr.msk.f32.gmra.mrb[18].mxu0 %vm198_vm1, %v2822_v31 }
 0x1e2   :  { %2111 = vmatprep.mubr.msk.f32.mxu0 %vm198_vm1, %v332_v38  ;;  %v3466_v38 = vld [vmem:[#allocation12_spill] sm:$0xff] }
 0x1e3   :  { %1310 = vrot.lane.b32.xlu1 %v3466_v38, %s2388_s14 }
 0x1e5   :  { %2112 = vmatmul.mubr.msk.f32.gmra.mrb[20].mxu0 %vm198_vm1, %v333_v35 }
 0x1e6   :  { %2114 = vmatprep.mubr.msk.f32.mxu0 %vm198_vm1, %v334_v41 }
 0x1e9   :  { %2115 = vmatmul.mubr.msk.f32.gmra.mrb[22].mxu0 %vm198_vm1, %v335_v39  ;;  %v3467_v39 = vld [vmem:[#allocation13_spill] sm:$0xff] }
 0x1ea   :  { %2117 = vmatprep.mubr.msk.f32.mxu0 %vm198_vm1, %v2546_v53  ;;  %v2927_v53 = vpop.f32.mrb[0].mxu1 }
 0x1eb   :  { %v2929_v54 = vpop.f32.mrb[1].mxu1 }
 0x1ec   :  { %v2931_v55 = vpop.f32.mrb[2].mxu1 }
 0x1ed   :  { %2118 = vmatmul.mubr.msk.f32.gmra.mrb[24].mxu0 %vm198_vm1, %v2608_v62  ;;  %v2933_v56 = vpop.f32.mrb[3].mxu1 }
 0x1ee   :  { %2120 = vmatprep.mubr.msk.f32.mxu0 %vm198_vm1, %v2634_v2  ;;  %v2935_v57 = vpop.f32.mrb[4].mxu1 }
 0x1ef   :  { %v2937_v58 = vpop.f32.mrb[5].mxu1 }
 0x1f0   :  { %v2939_v59 = vpop.f32.mrb[6].mxu1 }
 0x1f1   :  { %2121 = vmatmul.mubr.msk.f32.gmra.mrb[26].mxu0 %vm198_vm1, %v2600_v61  ;;  %v2941_v60 = vpop.f32.mrb[7].mxu1 }
 0x1f2   :  { %2123 = vmatprep.mubr.msk.f32.mxu0 %vm198_vm1, %v2683_v10  ;;  %v2943_v61 = vpop.f32.mrb[8].mxu1 }
 0x1f3   :  { %v2945_v62 = vpop.f32.mrb[9].mxu1 }
 0x1f4   :  { %v2947_v63 = vpop.f32.mrb[10].mxu1 }
 0x1f5   :  { %2124 = vmatmul.mubr.msk.f32.gmra.mrb[28].mxu0 %vm198_vm1, %v2652_v5  ;;  %v2949_v0 = vpop.f32.mrb[11].mxu1 }
 0x1f6   :  { %2126 = vmatprep.mubr.msk.f32.mxu0 %vm198_vm1, %v2735_v18  ;;  %v2951_v1 = vpop.f32.mrb[12].mxu1 }
 0x1f7   :  { %v2953_v2 = vpop.f32.mrb[13].mxu1 }
 0x1f8   :  { %v2955_v3 = vpop.f32.mrb[14].mxu1 }
 0x1f9   :  { %2127 = vmatmul.mubr.msk.f32.gmra.mrb[30].mxu0 %vm198_vm1, %v2697_v12  ;;  %v2957_v4 = vpop.f32.mrb[15].mxu1 }
 0x1fa   :  { %2129 = vmatprep.mubr.msk.f32.mxu0 %vm198_vm1, %v2787_v26  ;;  %v2959_v5 = vpop.f32.mrb[16].mxu1  ;;  %v836_v26 = vld [vmem:[%s3403_s6 + $0x8] sm:$0xff] }
 0x1fb   :  { %v2961_v6 = vpop.f32.mrb[17].mxu1 }
 0x1fc   :  { %v2963_v7 = vpop.f32.mrb[18].mxu1 }
 0x1fd   :  { %2130 = vmatmul.mubr.msk.f32.gmra.mrb[32].mxu0 %vm198_vm1, %v2749_v20  ;;  %v2965_v8 = vpop.f32.mrb[19].mxu1  ;;  %v2987_v20 = vpop.permute.xlu1 %434 }
 0x1fe   :  { %2132 = vmatprep.mubr.msk.f32.mxu0 %vm198_vm1, %v2827_v32  ;;  %v2967_v9 = vpop.f32.mrb[20].mxu1 }
 0x1ff   :  { %v2969_v10 = vpop.f32.mrb[21].mxu1 }
 0x200   :  { %v2971_v11 = vpop.f32.mrb[22].mxu1 }
 0x201   :  { %2133 = vmatmul.mubr.msk.f32.gmra.mrb[34].mxu0 %vm198_vm1, %v2801_v28  ;;  %v2973_v12 = vpop.f32.mrb[23].mxu1  ;;  %v355_v24 = vpop.permute.xlu1 %354 }
 0x202   :  { %2135 = vmatprep.mubr.msk.f32.mxu0 %vm198_vm1, %v2846_v36  ;;  %v2975_v13 = vpop.f32.mrb[24].mxu1  ;;  %v2996_v28 = vpop.permute.xlu0 %439 }
 0x203   :  { %v2977_v14 = vpop.f32.mrb[25].mxu1 }
 0x204   :  { %v2979_v16 = vpop.f32.mrb[26].mxu1 }
 0x205   :  { %2136 = vmatmul.mubr.msk.f32.gmra.mrb[36].mxu0 %vm198_vm1, %v2834_v33  ;;  %v2981_v17 = vpop.f32.mrb[27].mxu1  ;;  %v360_v27 = vpop.permute.xlu1 %359 }
 0x206   :  { %2138 = vmatprep.mubr.msk.f32.mxu0 %vm198_vm1, %v2864_v40  ;;  %v2983_v18 = vpop.f32.mrb[28].mxu1  ;;  %v3004_v30 = vpop.permute.xlu0 %444  ;;  %v3468_v40 = vld [vmem:[#allocation14_spill] sm:$0xff] }
 0x207   :  { %v2985_v19 = vpop.f32.mrb[29].mxu1  ;;  %1314 = vrot.lane.b32.xlu1 %v3468_v40, %s2388_s14  ;;  %v3475_v40 = vld [vmem:[#allocation21_spill] sm:$0xff] }
 0x208   :  { %v2989_v22 = vpop.f32.mrb[30].mxu1 }
 0x209   :  { %2139 = vmatmul.mubr.msk.f32.gmra.mrb[38].mxu0 %vm198_vm1, %v2852_v37  ;;  %v2991_v23 = vpop.f32.mrb[31].mxu1  ;;  %v3002_v29 = vpop.permute.xlu1 %449  ;;  %v3465_v37 = vld [vmem:[#allocation11_spill] sm:$0xff] }
 0x20a   :  { %3458 = vst [vmem:[#allocation27_spill] sm:$0xff] %v2991_v23  ;;  %1261 = vmatprep.mubr.f32.mxu0 %v836_v26  ;;  %v365_v32 = vpop.permute.xlu0 %364  ;;  %1308 = vrot.lane.b32.xlu0 %v3465_v37, %s2388_s14 }
 0x20b   :  { %1318 = vrot.lane.b32.xlu1 %v3470_v15, %s2388_s14 }
 0x20d   :  { %v370_v31 = vpop.permute.xlu1 %369 }
 0x20e   :  { %v3020_v44 = vpop.permute.xlu0 %454  ;;  %1312 = vrot.lane.b32.xlu0 %v3467_v39, %s2388_s14 }
 0x20f   :  { %1322 = vrot.lane.b32.xlu1 %v3472_v48, %s2388_s14 }
 0x211   :  { %v3018_v43 = vpop.permute.xlu1 %459 }
 0x212   :  { %v375_v46 = vpop.permute.xlu0 %374  ;;  %1316 = vrot.lane.b32.xlu0 %v3469_v21, %s2388_s14  ;;  %v3476_v21 = vld [vmem:[#allocation22_spill] sm:$0xff] }
 0x213   :  { %1326 = vrot.lane.b32.xlu1 %v3474_v50, %s2388_s14 }
 0x215   :  { %v380_v45 = vpop.permute.xlu1 %379 }
 0x216   :  { %v3036_v51 = vpop.permute.xlu0 %464  ;;  %1320 = vrot.lane.b32.xlu0 %v3471_v47, %s2388_s14 }
 0x217   :  { %1330 = vrot.lane.b32.xlu1 %v3476_v21, %s2388_s14 }
 0x219   :  { %v3034_v33 = vpop.permute.xlu1 %469 }
 0x21a   :  { %v385_v36 = vpop.permute.xlu0 %384  ;;  %1324 = vrot.lane.b32.xlu0 %v3473_v49, %s2388_s14 }
 0x21d   :  { %v390_v35 = vpop.permute.xlu1 %389 }
 0x21e   :  { %v3052_v42 = vpop.permute.xlu0 %474  ;;  %1328 = vrot.lane.b32.xlu0 %v3475_v40, %s2388_s14  ;;  %v3478_v40 = vld [vmem:[#allocation23_spill] sm:$0xff] }
 0x221   :  { %v3050_v41 = vpop.permute.xlu1 %479 }
 0x222   :  { %v395_v26 = vpop.permute.xlu0 %394  ;;  %1332 = vrot.lane.b32.xlu0 %v3478_v40, %s2388_s14 }
 0x225   :  { %v400_v25 = vpop.permute.xlu1 %399 }
 0x226   :  { %v3068_v34 = vpop.permute.xlu0 %484 }
 0x229   :  { %v3066_v52 = vpop.permute.xlu1 %489 }
 0x22a   :  { %v405_v50 = vpop.permute.xlu0 %404 }
 0x22d   :  { %v410_v48 = vpop.permute.xlu1 %409 }
 0x2a0   :  { %v2095_v37 = vpop.f32.mrb[8].mxu0 }
 0x2a1   :  { %v3070_v38 = vadd.f32 %v2095_v37, %v360_v27  ;;  %v642_v39 = vpop.f32.mrb[9].mxu0 }
 0x2a2   :  { %v3076_v15 = vadd.f32 %v642_v39, %v355_v24  ;;  %v3479_v24 = vld [vmem:[#allocation24_spill] sm:$0xff] }
 0x2a3   :  { %v3080_v47 = vmul.f32 %v2927_v53, %v3070_v38  ;;  %1334 = vrot.lane.b32.xlu1 %v3479_v24, %s2388_s14  ;;  %v3483_v24 = vld [vmem:[#allocation26_spill] sm:$0xff]  ;;  %v3116_v53 = vpop.permute.xlu0 %494 }
 0x2a4   :  { %3477 = vst [vmem:[#allocation5_spill] sm:$0xff] %v3076_v15  ;;  %v3084_v49 = vmul.f32 %v2929_v54, %v3076_v15  ;;  %v2098_v27 = vpop.f32.mrb[10].mxu0  ;;  %v3482_v15 = vld [vmem:[#allocation25_spill] sm:$0xff] }
 0x2a5   :  { %v3086_v37 = vadd.f32 %v2098_v27, %v370_v31  ;;  %v652_v23 = vpop.f32.mrb[11].mxu0  ;;  %1336 = vrot.lane.b32.xlu0 %v3482_v15, %s2388_s14 }
 0x2a6   :  { %v3094_v39 = vadd.f32 %v652_v23, %v365_v32  ;;  %v3110_v23 = vpop.permute.xlu1 %499 }
 0x2a7   :  { %v3098_v54 = vmul.f32 %v2931_v55, %v3086_v37  ;;  %1338 = vrot.lane.b32.xlu1 %v3483_v24, %s2388_s14 }
 0x2a8   :  { %3480 = vst [vmem:[#allocation6_spill] sm:$0xff] %v3094_v39  ;;  %v3102_v31 = vmul.f32 %v2933_v56, %v3094_v39  ;;  %v2101_v21 = vpop.f32.mrb[12].mxu0 }
 0x2a9   :  { %v3104_v27 = vadd.f32 %v2101_v21, %v380_v45  ;;  %v662_v40 = vpop.f32.mrb[13].mxu0 }
 0x2aa   :  { %v3114_v32 = vadd.f32 %v662_v40, %v375_v46  ;;  %v420_v40 = vpop.permute.xlu1 %419 }
 0x2ab   :  { %3481 = vst [vmem:[#allocation7_spill] sm:$0xff] %v3104_v27  ;;  %v3120_v56 = vmul.f32 %v2935_v57, %v3104_v27 }
 0x2ac   :  { %3484 = vst [vmem:[#allocation8_spill] sm:$0xff] %v3114_v32  ;;  %v3124_v45 = vmul.f32 %v2937_v58, %v3114_v32  ;;  %v2104_v15 = vpop.f32.mrb[14].mxu0  ;;  %v415_v32 = vpop.permute.xlu0 %414 }
 0x2ad   :  { %v3126_v21 = vadd.f32 %v2104_v15, %v390_v35  ;;  %v672_v24 = vpop.f32.mrb[15].mxu0 }
 0x2ae   :  { %v3130_v55 = vadd.f32 %v672_v24, %v385_v36 }
 0x2af   :  { %v3134_v46 = vmul.f32 %v2939_v59, %v3126_v21 }
 0x2b0   :  { %3485 = vst [vmem:[#allocation9_spill] sm:$0xff] %v3130_v55  ;;  %v3138_v57 = vmul.f32 %v2941_v60, %v3130_v55  ;;  %v2107_v58 = vpop.f32.mrb[16].mxu0 }
 0x2b1   :  { %v3140_v27 = vadd.f32 %v2107_v58, %v400_v25  ;;  %v682_v35 = vpop.f32.mrb[17].mxu0  ;;  %v3156_v25 = vpop.permute.xlu1 %509 }
 0x2b2   :  { %v3144_v39 = vadd.f32 %v682_v35, %v395_v26  ;;  %v3162_v26 = vpop.permute.xlu0 %504 }
 0x2b3   :  { %v3148_v36 = vmul.f32 %v2943_v61, %v3140_v27 }
 0x2b4   :  { %3486 = vst [vmem:[#allocation10_spill] sm:$0xff] %v3144_v39  ;;  %v3152_v59 = vmul.f32 %v2945_v62, %v3144_v39  ;;  %v2110_v60 = vpop.f32.mrb[18].mxu0 }
 0x2b5   :  { %v3154_v24 = vadd.f32 %v2110_v60, %v410_v48  ;;  %v692_v55 = vpop.f32.mrb[19].mxu0 }
 0x2b6   :  { %v3160_v15 = vadd.f32 %v692_v55, %v405_v50  ;;  %v430_v55 = vpop.permute.xlu1 %429 }
 0x2b7   :  { %3487 = vst [vmem:[#allocation11_spill] sm:$0xff] %v3154_v24  ;;  %v3166_v61 = vmul.f32 %v2947_v63, %v3154_v24 }
 0x2b8   :  { %3488 = vst [vmem:[#allocation12_spill] sm:$0xff] %v3160_v15  ;;  %v3170_v62 = vmul.f32 %v2949_v0, %v3160_v15  ;;  %v2113_v48 = vpop.f32.mrb[20].mxu0  ;;  %v425_v15 = vpop.permute.xlu0 %424 }
 0x2b9   :  { %v3172_v35 = vadd.f32 %v2113_v48, %v420_v40  ;;  %v702_v60 = vpop.f32.mrb[21].mxu0 }
 0x2ba   :  { %v3176_v58 = vadd.f32 %v702_v60, %v415_v32 }
 0x2bb   :  { %v3180_v50 = vmul.f32 %v2951_v1, %v3172_v35 }
 0x2bc   :  { %v3184_v63 = vmul.f32 %v2953_v2, %v3176_v58  ;;  %v2116_v0 = vpop.f32.mrb[22].mxu0 }
 0x2bd   :  { %v3186_v24 = vadd.f32 %v2116_v0, %v430_v55  ;;  %v712_v40 = vpop.f32.mrb[23].mxu0 }
 0x2be   :  { %v3190_v39 = vadd.f32 %v712_v40, %v425_v15 }
 0x2bf   :  { %v3194_v32 = vmul.f32 %v2955_v3, %v3186_v24 }
 0x2c0   :  { %3489 = vst [vmem:[#allocation13_spill] sm:$0xff] %v3190_v39  ;;  %v3198_v1 = vmul.f32 %v2957_v4, %v3190_v39  ;;  %v2119_v2 = vpop.f32.mrb[24].mxu0 }
 0x2c1   :  { %v3201_v60 = vadd.f32 %v2119_v2, %v2996_v28  ;;  %v722_v55 = vpop.f32.mrb[25].mxu0 }
 0x2c2   :  { %v3206_v48 = vadd.f32 %v722_v55, %v2987_v20 }
 0x2c3   :  { %v1182_v15 = vmul.f32 %v2959_v5, %v3201_v60 }
 0x2c4   :  { %v1181_v3 = vmul.f32 %v2961_v6, %v3206_v48  ;;  %v2122_v40 = vpop.f32.mrb[26].mxu0 }
 0x2c5   :  { %v3213_v4 = vadd.f32 %v2122_v40, %v3002_v29  ;;  %v732_v39 = vpop.f32.mrb[27].mxu0  ;;  %v3490_v29 = vpack.c.bf16 %v3080_v47, %v3084_v49  ;;  %v3491_v47 = vpack.c.bf16 %v3098_v54, %v3102_v31  ;;  %v3492_v54 = vpack.c.bf16 %v3120_v56, %v3124_v45 }
 0x2c6   :  { %v2267_v28 = vpack.c.bf16 %v1182_v15, %v1181_v3  ;;  %v3216_v2 = vadd.f32 %v732_v39, %v3004_v30  ;;  %v3493_v56 = vpack.c.bf16 %v3134_v46, %v3138_v57  ;;  %v3494_v46 = vpack.c.bf16 %v3148_v36, %v3152_v59 }
 0x2c7   :  { %v1184_v0 = vmul.f32 %v2963_v7, %v3213_v4  ;;  %v3495_v36 = vpack.c.bf16 %v3166_v61, %v3170_v62  ;;  %v3498_v61 = vpack.c.bf16 %v3194_v32, %v3198_v1  ;;  %v837_v62 = vld [vmem:[%s3403_s6 + $0x10] sm:$0xff] }
 0x2c8   :  { %v1183_v20 = vmul.f32 %v2965_v8, %v3216_v2  ;;  %v2125_v55 = vpop.f32.mrb[28].mxu0  ;;  %2268 = vmatprep.subr.bf16.mxu0 %v2267_v28 }
 0x2c9   :  { %v3223_v5 = vadd.f32 %v2125_v55, %v3018_v43  ;;  %v742_v6 = vpop.f32.mrb[29].mxu0  ;;  %2270 = vmatpush3.bf16.msra.mxu0 %v3490_v29 }
 0x2ca   :  { %v2271_v15 = vpack.c.bf16 %v1184_v0, %v1183_v20  ;;  %v3229_v30 = vadd.f32 %v742_v6, %v3020_v44 }
 0x2cb   :  { %v1186_v7 = vmul.f32 %v2967_v9, %v3223_v5 }
 0x2cc   :  { %v1185_v8 = vmul.f32 %v2969_v10, %v3229_v30  ;;  %v2128_v39 = vpop.f32.mrb[30].mxu0  ;;  %2272 = vmatprep.subr.bf16.mxu0 %v2271_v15 }
 0x2cd   :  { %v3236_v43 = vadd.f32 %v2128_v39, %v3034_v33  ;;  %v752_v3 = vpop.f32.mrb[31].mxu0  ;;  %2274 = vmatpush3.bf16.msra.mxu0 %v3491_v47 }
 0x2ce   :  { %v2275_v49 = vpack.c.bf16 %v1186_v7, %v1185_v8  ;;  %v3242_v44 = vadd.f32 %v752_v3, %v3036_v51  ;;  %v3496_v7 = vld [vmem:[#allocation27_spill] sm:$0xff] }
 0x2cf   :  { %v1188_v9 = vmul.f32 %v2971_v11, %v3236_v43 }
 0x2d0   :  { %v1187_v10 = vmul.f32 %v2973_v12, %v3242_v44  ;;  %v2131_v0 = vpop.f32.mrb[32].mxu0  ;;  %2276 = vmatprep.subr.bf16.mxu0 %v2275_v49 }
 0x2d1   :  { %v3249_v33 = vadd.f32 %v2131_v0, %v3050_v41  ;;  %v762_v40 = vpop.f32.mrb[33].mxu0  ;;  %2278 = vmatpush3.bf16.msra.mxu0 %v3492_v54 }
 0x2d2   :  { %v2279_v31 = vpack.c.bf16 %v1188_v9, %v1187_v10  ;;  %v3255_v51 = vadd.f32 %v762_v40, %v3052_v42 }
 0x2d3   :  { %v1190_v11 = vmul.f32 %v2975_v13, %v3249_v33 }
 0x2d4   :  { %v1189_v12 = vmul.f32 %v2977_v14, %v3255_v51  ;;  %v2134_v28 = vpop.f32.mrb[34].mxu0  ;;  %2280 = vmatprep.subr.bf16.mxu0 %v2279_v31 }
 0x2d5   :  { %v3262_v41 = vadd.f32 %v2134_v28, %v3066_v52  ;;  %v772_v20 = vpop.f32.mrb[35].mxu0  ;;  %2282 = vmatpush3.bf16.msra.mxu0 %v3493_v56 }
 0x2d6   :  { %v2283_v45 = vpack.c.bf16 %v1190_v11, %v1189_v12  ;;  %v3268_v42 = vadd.f32 %v772_v20, %v3068_v34 }
 0x2d7   :  { %v1192_v13 = vmul.f32 %v2979_v16, %v3262_v41 }
 0x2d8   :  { %v1191_v14 = vmul.f32 %v2981_v17, %v3268_v42  ;;  %v2137_v55 = vpop.f32.mrb[36].mxu0  ;;  %2284 = vmatprep.subr.bf16.mxu0 %v2283_v45 }
 0x2d9   :  { %v3275_v52 = vadd.f32 %v2137_v55, %v3110_v23  ;;  %v782_v6 = vpop.f32.mrb[37].mxu0  ;;  %2286 = vmatpush3.bf16.msra.mxu0 %v3494_v46 }
 0x2da   :  { %v2287_v57 = vpack.c.bf16 %v1192_v13, %v1191_v14  ;;  %v3281_v34 = vadd.f32 %v782_v6, %v3116_v53 }
 0x2db   :  { %v1194_v16 = vmul.f32 %v2983_v18, %v3275_v52 }
 0x2dc   :  { %v1193_v17 = vmul.f32 %v2985_v19, %v3281_v34  ;;  %v2140_v29 = vpop.f32.mrb[38].mxu0  ;;  %2288 = vmatprep.subr.bf16.mxu0 %v2287_v57 }
 0x2dd   :  { %v3288_v23 = vadd.f32 %v2140_v29, %v3156_v25  ;;  %v792_v15 = vpop.f32.mrb[39].mxu0  ;;  %2290 = vmatpush3.bf16.msra.mxu0 %v3495_v36  ;;  %v3497_v25 = vpack.c.bf16 %v3180_v50, %v3184_v63  ;;  %v1277_v50 = vpop.permute.xlu0 %1276 }
 0x2de   :  { %v2291_v59 = vpack.c.bf16 %v1194_v16, %v1193_v17  ;;  %v3294_v53 = vadd.f32 %v792_v15, %v3162_v26  ;;  %v835_v26 = vld [vmem:[%s3403_s6] sm:$0xff]  ;;  %2197 = vmatprep.mubr.msk.f32.mxu1 %vm1340_vm14, %v1277_v50  ;;  %v1279_v63 = vpop.permute.xlu1 %1278  ;;  %v1275_v50 = vld [vmem:[%s3403_s6 + $0x28] sm:$0xff] }
 0x2df   :  { %v1196_v18 = vmul.f32 %v2989_v22, %v3288_v23  ;;  %v838_v22 = vld [vmem:[%s3403_s6 + $0x18] sm:$0xff] }
 0x2e0   :  { %v1195_v19 = vmul.f32 %v3496_v7, %v3294_v53  ;;  %2292 = vmatprep.subr.bf16.mxu0 %v2291_v59 }
 0x2e1   :  { %2294 = vmatpush3.bf16.msra.mxu0 %v3497_v25  ;;  %v1281_v32 = vpop.permute.xlu0 %1280 }
 0x2e2   :  { %v2295_v8 = vpack.c.bf16 %v1196_v18, %v1195_v19  ;;  %v1283_v1 = vpop.permute.xlu1 %1282 }
 0x2e4   :  { %2296 = vmatprep.subr.bf16.mxu0 %v2295_v8 }
 0x2e5   :  { %2298 = vmatpush3.bf16.msra.mxu0 %v3498_v61  ;;  %v1285_v39 = vpop.permute.xlu0 %1284 }
 0x2e6   :  { %v1287_v3 = vpop.permute.xlu1 %1286 }
 0x2e8   :  { %1262 = vmatmul.mubr.f32.vlgmr.msra.gmra.mrb[40].mxu0 %v835_v26 }
 0x2e9   :  { %1266 = vmatprep.mubr.f32.mxu0 %v838_v22  ;;  %v1289_v47 = vpop.permute.xlu0 %1288 }
 0x2ea   :  { %v1291_v10 = vpop.permute.xlu1 %1290 }
 0x2ec   :  { %1267 = vmatmul.mubr.f32.gmra.mrb[42].mxu0 %v837_v62 }
 0x2ed   :  { %v1293_v54 = vpop.permute.xlu0 %1292  ;;  %1726 = vmatprep.mubr.f32.mxu0 %v1275_v50 }
 0x2ee   :  { %v1295_v12 = vpop.permute.xlu1 %1294 }
 0x2f1   :  { %v1297_v45 = vpop.permute.xlu0 %1296 }
 0x2f2   :  { %v1299_v13 = vpop.permute.xlu1 %1298 }
 0x2f5   :  { %v1301_v14 = vpop.permute.xlu0 %1300 }
 0x2f6   :  { %v1303_v55 = vpop.permute.xlu1 %1302 }
 0x2f9   :  { %v1305_v6 = vpop.permute.xlu0 %1304 }
 0x2fa   :  { %v1307_v46 = vpop.permute.xlu1 %1306 }
 0x2fd   :  { %v1309_v57 = vpop.permute.xlu0 %1308 }
 0x2fe   :  { %v1311_v16 = vpop.permute.xlu1 %1310 }
 0x301   :  { %v1313_v17 = vpop.permute.xlu0 %1312 }
 0x302   :  { %v1315_v29 = vpop.permute.xlu1 %1314 }
 0x305   :  { %v1317_v15 = vpop.permute.xlu0 %1316 }
 0x306   :  { %v1319_v36 = vpop.permute.xlu1 %1318 }
 0x309   :  { %v1321_v59 = vpop.permute.xlu0 %1320 }
 0x30a   :  { %v1323_v18 = vpop.permute.xlu1 %1322 }
 0x30d   :  { %v1325_v7 = vpop.permute.xlu0 %1324 }
 0x30e   :  { %v1327_v19 = vpop.permute.xlu1 %1326 }
 0x311   :  { %v1329_v25 = vpop.permute.xlu0 %1328 }
 0x312   :  { %v1331_v8 = vpop.permute.xlu1 %1330 }
 0x315   :  { %v1333_v61 = vpop.permute.xlu0 %1332 }
 0x316   :  { %v1335_v26 = vpop.permute.xlu1 %1334 }
 0x319   :  { %v1337_v22 = vpop.permute.xlu0 %1336 }
 0x31a   :  { %v1339_v62 = vpop.permute.xlu1 %1338 }
 0x3bb   :  { %v1988_v49 = vpop.f32.mrb[40].mxu0 }
 0x3bc   :  { %v1989_v9 = vpop.f32.mrb[41].mxu0 }
 0x3bd   :  { %v1990_v0 = vadd.f32 %v1989_v9, %v1988_v49 }
 0x3bf   :  { %v1991_v40 = vpop.f32.mrb[42].mxu0  ;;  %v1272_v28 = vmax.f32 %v1990_v0, 0.0  ;;  %v3500_v0 = vld [vmem:[#allocation6_spill] sm:$0xff] }
 0x3c0   :  { %v1992_v31 = vpop.f32.mrb[43].mxu0 }
 0x3c1   :  { %v1993_v11 = vadd.f32 %v1992_v31, %v1991_v40 }
 0x3c3   :  { %v1273_v20 = vmax.f32 %v1993_v11, 0.0  ;;  %v3501_v11 = vld [vmem:[#allocation7_spill] sm:$0xff] }
 0x3c5   :  { %v2299_v56 = vpack.c.bf16 %v1273_v20, %v1272_v28  ;;  %v3502_v20 = vld [vmem:[#allocation8_spill] sm:$0xff] }
 0x3c7   :  { %2300 = vmatprep.subr.bf16.mxu1 %v2299_v56 }
 0x3c8   :  { %2302 = vmatpush3.bf16.msra.mxu1 %v2299_v56 }
 0x3cb   :  { %2198 = vmatmul.mubr.msk.f32.vlgmr.msra.gmra.mrb[32].mxu1 %vm1340_vm14, %v1279_v63 }
 0x3cc   :  { %2200 = vmatprep.mubr.msk.f32.mxu1 %vm1340_vm14, %v1281_v32 }
 0x3cf   :  { %2201 = vmatmul.mubr.msk.f32.gmra.mrb[34].mxu1 %vm1340_vm14, %v1283_v1 }
 0x3d0   :  { %2203 = vmatprep.mubr.msk.f32.mxu1 %vm1340_vm14, %v1285_v39  ;;  %v3499_v39 = vld [vmem:[#allocation5_spill] sm:$0xff] }
 0x3d3   :  { %2204 = vmatmul.mubr.msk.f32.gmra.mrb[36].mxu1 %vm1340_vm14, %v1287_v3 }
 0x3d4   :  { %2206 = vmatprep.mubr.msk.f32.mxu1 %vm1340_vm14, %v1289_v47 }
 0x3d7   :  { %2207 = vmatmul.mubr.msk.f32.gmra.mrb[38].mxu1 %vm1340_vm14, %v1291_v10 }
 0x3d8   :  { %2209 = vmatprep.mubr.msk.f32.mxu1 %vm1340_vm14, %v1293_v54 }
 0x3db   :  { %2210 = vmatmul.mubr.msk.f32.gmra.mrb[40].mxu1 %vm1340_vm14, %v1295_v12 }
 0x3dc   :  { %2212 = vmatprep.mubr.msk.f32.mxu1 %vm1340_vm14, %v1297_v45 }
 0x3df   :  { %2213 = vmatmul.mubr.msk.f32.gmra.mrb[42].mxu1 %vm1340_vm14, %v1299_v13 }
 0x3e0   :  { %2215 = vmatprep.mubr.msk.f32.mxu1 %vm1340_vm14, %v1301_v14 }
 0x3e3   :  { %2216 = vmatmul.mubr.msk.f32.gmra.mrb[44].mxu1 %vm1340_vm14, %v1303_v55  ;;  %v3503_v55 = vld [vmem:[#allocation9_spill] sm:$0xff] }
 0x3e4   :  { %2218 = vmatprep.mubr.msk.f32.mxu1 %vm1340_vm14, %v1305_v6 }
 0x3e7   :  { %2219 = vmatmul.mubr.msk.f32.gmra.mrb[46].mxu1 %vm1340_vm14, %v1307_v46 }
 0x3e8   :  { %2221 = vmatprep.mubr.msk.f32.mxu1 %vm1340_vm14, %v1309_v57 }
 0x3eb   :  { %2222 = vmatmul.mubr.msk.f32.gmra.mrb[48].mxu1 %vm1340_vm14, %v1311_v16 }
 0x3ec   :  { %2224 = vmatprep.mubr.msk.f32.mxu1 %vm1340_vm14, %v1313_v17  ;;  %v3504_v17 = vld [vmem:[#allocation10_spill] sm:$0xff] }
 0x3ef   :  { %2225 = vmatmul.mubr.msk.f32.gmra.mrb[50].mxu1 %vm1340_vm14, %v1315_v29 }
 0x3f0   :  { %2227 = vmatprep.mubr.msk.f32.mxu1 %vm1340_vm14, %v1317_v15 }
 0x3f3   :  { %2228 = vmatmul.mubr.msk.f32.gmra.mrb[52].mxu1 %vm1340_vm14, %v1319_v36 }
 0x3f4   :  { %2230 = vmatprep.mubr.msk.f32.mxu1 %vm1340_vm14, %v1321_v59  ;;  %v3505_v59 = vld [vmem:[#allocation11_spill] sm:$0xff] }
 0x3f7   :  { %2231 = vmatmul.mubr.msk.f32.gmra.mrb[54].mxu1 %vm1340_vm14, %v1323_v18 }
 0x3f8   :  { %2233 = vmatprep.mubr.msk.f32.mxu1 %vm1340_vm14, %v1325_v7 }
 0x3fb   :  { %2234 = vmatmul.mubr.msk.f32.gmra.mrb[56].mxu1 %vm1340_vm14, %v1327_v19  ;;  %v3506_v19 = vld [vmem:[#allocation12_spill] sm:$0xff] }
 0x3fc   :  { %2236 = vmatprep.mubr.msk.f32.mxu1 %vm1340_vm14, %v1329_v25 }
 0x3ff   :  { %2237 = vmatmul.mubr.msk.f32.gmra.mrb[58].mxu1 %vm1340_vm14, %v1331_v8 }
 0x400   :  { %2239 = vmatprep.mubr.msk.f32.mxu1 %vm1340_vm14, %v1333_v61 }
 0x403   :  { %2240 = vmatmul.mubr.msk.f32.gmra.mrb[60].mxu1 %vm1340_vm14, %v1335_v26 }
 0x404   :  { %2242 = vmatprep.mubr.msk.f32.mxu1 %vm1340_vm14, %v1337_v22 }
 0x407   :  { %2243 = vmatmul.mubr.msk.f32.gmra.mrb[62].mxu1 %vm1340_vm14, %v1339_v62 }
 0x49e   :  { %v2199_v63 = vpop.f32.mrb[32].mxu1 }
 0x49f   :  { %v1631_v32 = vmul.f32 %v2199_v63, %v3070_v38  ;;  %v1471_v1 = vpop.f32.mrb[33].mxu1 }
 0x4a0   :  { %v1630_v3 = vmul.f32 %v1471_v1, %v3499_v39 }
 0x4a2   :  { %v2305_v47 = vpack.c.bf16 %v1631_v32, %v1630_v3  ;;  %v2202_v49 = vpop.f32.mrb[34].mxu1  ;;  %v3507_v32 = vld [vmem:[#allocation13_spill] sm:$0xff] }
 0x4a3   :  { %v1633_v9 = vmul.f32 %v2202_v49, %v3086_v37  ;;  %v1481_v10 = vpop.f32.mrb[35].mxu1 }
 0x4a4   :  { %v1632_v40 = vmul.f32 %v1481_v10, %v3500_v0 }
 0x4a6   :  { %v2309_v54 = vpack.c.bf16 %v1633_v9, %v1632_v40  ;;  %v2205_v31 = vpop.f32.mrb[36].mxu1 }
 0x4a7   :  { %v1635_v12 = vmul.f32 %v2205_v31, %v3501_v11  ;;  %v1491_v28 = vpop.f32.mrb[37].mxu1 }
 0x4a8   :  { %v1634_v56 = vmul.f32 %v1491_v28, %v3502_v20 }
 0x4aa   :  { %v2313_v45 = vpack.c.bf16 %v1635_v12, %v1634_v56  ;;  %v2208_v13 = vpop.f32.mrb[38].mxu1 }
 0x4ab   :  { %v1637_v38 = vmul.f32 %v2208_v13, %v3126_v21  ;;  %v1501_v14 = vpop.f32.mrb[39].mxu1 }
 0x4ac   :  { %v1636_v6 = vmul.f32 %v1501_v14, %v3503_v55 }
 0x4ae   :  { %v2317_v46 = vpack.c.bf16 %v1637_v38, %v1636_v6  ;;  %v2211_v57 = vpop.f32.mrb[40].mxu1 }
 0x4af   :  { %v1639_v37 = vmul.f32 %v2211_v57, %v3140_v27  ;;  %v1511_v16 = vpop.f32.mrb[41].mxu1 }
 0x4b0   :  { %v1638_v29 = vmul.f32 %v1511_v16, %v3504_v17 }
 0x4b2   :  { %v2321_v15 = vpack.c.bf16 %v1639_v37, %v1638_v29  ;;  %v2214_v36 = vpop.f32.mrb[42].mxu1 }
 0x4b3   :  { %v1641_v18 = vmul.f32 %v2214_v36, %v3505_v59  ;;  %v1521_v7 = vpop.f32.mrb[43].mxu1 }
 0x4b4   :  { %v1640_v25 = vmul.f32 %v1521_v7, %v3506_v19 }
 0x4b6   :  { %v2325_v8 = vpack.c.bf16 %v1641_v18, %v1640_v25  ;;  %v2217_v61 = vpop.f32.mrb[44].mxu1 }
 0x4b7   :  { %v1643_v21 = vmul.f32 %v2217_v61, %v3172_v35  ;;  %v1531_v26 = vpop.f32.mrb[45].mxu1 }
 0x4b8   :  { %v1642_v22 = vmul.f32 %v1531_v26, %v3176_v58 }
 0x4ba   :  { %v2329_v62 = vpack.c.bf16 %v1643_v21, %v1642_v22  ;;  %v2220_v50 = vpop.f32.mrb[46].mxu1 }
 0x4bb   :  { %v1645_v27 = vmul.f32 %v2220_v50, %v3186_v24  ;;  %v1541_v63 = vpop.f32.mrb[47].mxu1 }
 0x4bc   :  { %v1644_v1 = vmul.f32 %v1541_v63, %v3507_v32 }
 0x4be   :  { %v2333_v39 = vpack.c.bf16 %v1645_v27, %v1644_v1  ;;  %v2223_v3 = vpop.f32.mrb[48].mxu1 }
 0x4bf   :  { %v1647_v49 = vmul.f32 %v2223_v3, %v3201_v60  ;;  %v1551_v9 = vpop.f32.mrb[49].mxu1 }
 0x4c0   :  { %v1646_v10 = vmul.f32 %v1551_v9, %v3206_v48 }
 0x4c2   :  { %v2303_v0 = vpack.c.bf16 %v1647_v49, %v1646_v10  ;;  %v2226_v40 = vpop.f32.mrb[50].mxu1 }
 0x4c3   :  { %v1649_v35 = vmul.f32 %v2226_v40, %v3213_v4  ;;  %v1561_v31 = vpop.f32.mrb[51].mxu1 }
 0x4c4   :  { %v1648_v58 = vmul.f32 %v1561_v31, %v3216_v2  ;;  %2304 = vmatprep.subr.bf16.mxu0 %v2303_v0 }
 0x4c5   :  { %2306 = vmatpush3.bf16.msra.mxu0 %v2305_v47 }
 0x4c6   :  { %v2307_v24 = vpack.c.bf16 %v1649_v35, %v1648_v58  ;;  %v2229_v11 = vpop.f32.mrb[52].mxu1 }
 0x4c7   :  { %v1651_v12 = vmul.f32 %v2229_v11, %v3223_v5  ;;  %v1571_v28 = vpop.f32.mrb[53].mxu1 }
 0x4c8   :  { %v1650_v20 = vmul.f32 %v1571_v28, %v3229_v30  ;;  %2308 = vmatprep.subr.bf16.mxu0 %v2307_v24 }
 0x4c9   :  { %2310 = vmatpush3.bf16.msra.mxu0 %v2309_v54 }
 0x4ca   :  { %v2311_v60 = vpack.c.bf16 %v1651_v12, %v1650_v20  ;;  %v2232_v48 = vpop.f32.mrb[54].mxu1 }
 0x4cb   :  { %v1653_v56 = vmul.f32 %v2232_v48, %v3236_v43  ;;  %v1581_v13 = vpop.f32.mrb[55].mxu1 }
 0x4cc   :  { %v1652_v4 = vmul.f32 %v1581_v13, %v3242_v44  ;;  %2312 = vmatprep.subr.bf16.mxu0 %v2311_v60 }
 0x4cd   :  { %2314 = vmatpush3.bf16.msra.mxu0 %v2313_v45 }
 0x4ce   :  { %v2315_v2 = vpack.c.bf16 %v1653_v56, %v1652_v4  ;;  %v2235_v47 = vpop.f32.mrb[56].mxu1 }
 0x4cf   :  { %v1655_v38 = vmul.f32 %v2235_v47, %v3249_v33  ;;  %v1591_v14 = vpop.f32.mrb[57].mxu1 }
 0x4d0   :  { %v1654_v5 = vmul.f32 %v1591_v14, %v3255_v51  ;;  %2316 = vmatprep.subr.bf16.mxu0 %v2315_v2 }
 0x4d1   :  { %2318 = vmatpush3.bf16.msra.mxu0 %v2317_v46 }
 0x4d2   :  { %v2319_v30 = vpack.c.bf16 %v1655_v38, %v1654_v5  ;;  %v2238_v54 = vpop.f32.mrb[58].mxu1 }
 0x4d3   :  { %v1657_v55 = vmul.f32 %v2238_v54, %v3262_v41  ;;  %v1601_v6 = vpop.f32.mrb[59].mxu1 }
 0x4d4   :  { %v1656_v43 = vmul.f32 %v1601_v6, %v3268_v42  ;;  %2320 = vmatprep.subr.bf16.mxu0 %v2319_v30 }
 0x4d5   :  { %2322 = vmatpush3.bf16.msra.mxu0 %v2321_v15 }
 0x4d6   :  { %v2323_v44 = vpack.c.bf16 %v1657_v55, %v1656_v43  ;;  %v2241_v45 = vpop.f32.mrb[60].mxu1 }
 0x4d7   :  { %v1659_v57 = vmul.f32 %v2241_v45, %v3275_v52  ;;  %v1611_v37 = vpop.f32.mrb[61].mxu1  ;;  %v1274_v52 = vld [vmem:[%s3403_s6 + $0x20] sm:$0xff]  ;;  %s2389_s6 = smov [#allocation2]  }
 0x4d8   :  { %v1658_v33 = vmul.f32 %v1611_v37, %v3281_v34  ;;  %2324 = vmatprep.subr.bf16.mxu0 %v2323_v44  ;;  %v1732_v34 = vlaneseq  ;;  %s1760_s23 = sshll.u32 %s2389_s6, 4  ;;  %s1761_s23 = int_to_ptr.vmem [resolvable:$true] %s1760_s23 }
 0x4d9   :  { %2326 = vmatpush3.bf16.msra.mxu0 %v2325_v8  ;;  %s2359_s1 = scalar_lea.vmem %s1761_s23, 128  ;;  %p2364_p1 = scmp.lt.s32.totalorder %s1761_s23, %s1761_s23 }
 0x4da   :  { %v2327_v51 = vpack.c.bf16 %v1659_v57, %v1658_v33  ;;  %v2244_v46 = vpop.f32.mrb[62].mxu1  ;;  %v1733_v29 = vshrl.u32 %v1732_v34, 7  ;;  %p2360_p0 = scmp.ne.s32.totalorder %s1761_s23, %s2359_s1  ;;  %p2365_p2 = scmp.lt.s32.totalorder %s2359_s1, %s2359_s1 }
 0x4db   :  { %v1661_v16 = vmul.f32 %v2244_v46, %v3288_v23  ;;  %v1621_v17 = vpop.f32.mrb[63].mxu1 }
 0x4dc   :  { %v1660_v41 = vmul.f32 %v1621_v17, %v3294_v53  ;;  %2328 = vmatprep.subr.bf16.mxu0 %v2327_v51  ;;  %vm1734_vm15 = vcmp.lt.s32.totalorder %v1733_v29, 6  ;;  %p2366_p3 = por %p2365_p2, %p2364_p1 }
 0x4dd   :  { %2330 = vmatpush3.bf16.msra.mxu0 %v2329_v62 }
 0x4de   :  { %v2331_v42 = vpack.c.bf16 %v1661_v16, %v1660_v41  ;;  %p2367_p4 = pnand %p2366_p3, %p2360_p0 }
 0x4e0   :  { %2332 = vmatprep.subr.bf16.mxu0 %v2331_v42 }
 0x4e1   :  { %2334 = vmatpush3.bf16.msra.mxu0 %v2333_v39 }
 0x4e4   :  { %1727 = vmatmul.mubr.f32.vlgmr.msra.gmra.mrb[44].mxu0 %v1274_v52 }
 0x5b7   :  { %v2060_v15 = vpop.f32.mrb[44].mxu0 }
 0x5b8   :  { %v2061_v36 = vpop.f32.mrb[45].mxu0 }
 0x5b9   :  { %v2062_v59 = vadd.f32 %v2061_v36, %v2060_v15 }
 0x5bb   :  { %v1735_v23 = vsel %vm1734_vm15, %v2062_v59, -3.4028235e+38 }
 0x5bc   :  { %v1736_v18 = vrot.slane %v1735_v23, 4 }
 0x5be   :  { %v1737_v7 = vmax.f32 %v1735_v23, %v1736_v18 }
 0x5c0   :  { %v1738_v53 = vrot.slane %v1737_v7, 2 }
 0x5c2   :  { %v1739_v19 = vmax.f32 %v1737_v7, %v1738_v53 }
 0x5c4   :  { %v1740_v25 = vrot.slane %v1739_v19, 1 }
 0x5c6   :  { %v1741_v8 = vmax.f32 %v1739_v19, %v1740_v25 }
 0x5c8   :  { %v1742_v61 = vsub.f32 %v1735_v23, %v1741_v8 }
 0x5ca   :  { %v1743_v21 = vmul.f32 1.442695, %v1742_v61 }
 0x5cc   :  { %2355 = vpow2.f32 %v1743_v21 }
 0x5d6   :  { %v2356_v26 = vpop.eup %2355 }
 0x5d7   :  { %v1745_v22 = vrot.slane %v2356_v26, 4 }
 0x5d9   :  { %v1746_v62 = vadd.f32 %v2356_v26, %v1745_v22 }
 0x5db   :  { %v1747_v50 = vrot.slane %v1746_v62, 2 }
 0x5dd   :  { %v1748_v27 = vadd.f32 %v1747_v50, %v1746_v62 }
 0x5df   :  { %v1749_v63 = vrot.slane %v1748_v27, 1 }
 0x5e1   :  { %v1750_v32 = vadd.f32 %v1749_v63, %v1748_v27 }
 0x5e3   :  { %2357 = vrcp.f32 %v1750_v32 }
 0x5ed   :  { %v2358_v1 = vpop.eup %2357 }
 0x5ee   :  { %v1752_v39 = vmul.f32 %v2358_v1, %v2356_v26 }
 0x5f0   :  { %1753 = vst [vmem:[#allocation2] sm:$0xff] %v1752_v39 }
 0x5f1   :  { %2370 = shalt.err (!%p2367_p4)
}
 0x5f2   :  { %s2371_s26 = scalar_lea.hbm %s3404_s7, 128 }
 0x5f3   :  { %p2372_p5 = scmp.ne.s32.totalorder %s3404_s7, %s2371_s26  ;;  %p2375_p6 = scmp.lt.u32.totalorder %s2371_s26, %s3404_s7 }
 0x5f5   :  { %p2377_p7 = pnand %p2375_p6, %p2372_p5 }
 0x5f7   :  { %2380 = shalt.err (!%p2377_p7)
}
 0x5f8   :  { %1763 = dma.vmem_to_hbm [thread:$0]  %s1761_s23, 128, %s3404_s7, [#allocation3]  }
 0x5f9   :  { %2381 = dma.done.wait [#allocation3], 128  }
 0x5fa   :  { %2382 = vsyncadd [#allocation3], 4294967168 }
 0x5fb   :  { %1767 = vsyncpa [#allocation3], 1 }

// kernel: tpu_custom_call.1
= control target key start
LH: loop header
LB: loop body
LE: loop exit
PB: predicated region body
PF: predicated region fallthrough
CT: control target
= control target key end

     0   :  { %vm52_vm0 = vcmask 64512   ;;  %s3397_s0 = inlined_call_operand.vmem [shape: f32[8,128], index: 0, kind: input, shape index: {}]   ;;  %s3398_s1 = inlined_call_operand.vmem [shape: f32[10,128], index: 1, kind: input, shape index: {}]   ;;  %s3399_s2 = inlined_call_operand.vmem [shape: f32[32,10], index: 2, kind: input, shape index: {}]   ;;  %s3400_s3 = inlined_call_operand.vmem [shape: f32[32,34], index: 3, kind: input, shape index: {}]   ;;  %s3401_s4 = inlined_call_operand.vmem [shape: f32[256,33], index: 4, kind: input, shape index: {}]   ;;  %s3402_s5 = inlined_call_operand.vmem [shape: f32[256,26], index: 5, kind: input, shape index: {}]   ;;  %s3403_s6 = inlined_call_operand.vmem [shape: f32[24,256], index: 6, kind: input, shape index: {}]   ;;  %s3404_s7 = inlined_call_operand.hbm [shape: f32[8,128], index: 7, kind: output, shape index: {}]  }
   0x1   :  { %v27_v0 = vld [vmem:[%s3397_s0] sm:$0xff]  ;;  %v29_v2 = vld [vmem:[%s3399_s2 + $0x8] sm:$0xff]  ;;  %v30_v3 = vld [vmem:[%s3399_s2 + $0x10] sm:$0xff] }
   0x2   :  { %v28_v1 = vld [vmem:[%s3399_s2] sm:$0xff]  ;;  %2063 = vmatprep.subr.mxu0 %v27_v0 }
   0x3   :  { %2065 = vmatprep.mubr.msk.f32.mxu0 %vm52_vm0, %v28_v1 }
   0x4   :  { %12 = vsyncpa [#allocation3], 0  ;;  %2064 = vmatpush3.msra.mxu0 %v27_v0  ;;  %v2383_v4 = vmov 8   ;;  %v31_v5 = vld [vmem:[%s3399_s2 + $0x18] sm:$0xff]  ;;  %v2384_v6 = vmov 9   ;;  %v174_v7 = vld [vmem:[%s3400_s3] sm:$0xff] }
   0x5   :  { %2342 = vset.pattern.permute.xlu0 %v2383_v4  ;;  %2066 = vmatmul.mubr.msk.f32.vlgmr.msra.gmra.mrb[0].mxu0 %vm52_vm0, %v29_v2  ;;  %vm198_vm1 = vcmask 261120   ;;  %v175_v8 = vld [vmem:[%s3400_s3 + $0x8] sm:$0xff]  ;;  %v2385_v9 = vmov 32   ;;  %v176_v10 = vld [vmem:[%s3400_s3 + $0x10] sm:$0xff]  ;;  %v2386_v11 = vmov 33   ;;  %v177_v12 = vld [vmem:[%s3400_s3 + $0x18] sm:$0xff] }
   0x6   :  { %34 = vperm.xlu0 %2342, %v28_v1   ;;  %2068 = vmatprep.mubr.msk.f32.mxu0 %vm52_vm0, %v30_v3  ;;  %v801_v39 = vld [vmem:[%s3398_s1] sm:$0xff]  ;;  %v802_v40 = vld [vmem:[%s3398_s1 + $0x8] sm:$0x3]  ;;  %vm936_vm6 = vcmask 1041408   ;;  %vm2387_vm7 = vmmov 1   ;;  %vm839_vm9 = vcmask 80896  }
   0x7   :  { %2343 = vset.pattern.permute.xlu1 %v2384_v6  ;;  %v2261_v41 = vpack.c.bf16 %v802_v40, %v801_v39  ;;  %vm2262_vm8 = vmpackc.low %vm936_vm6, %vm2387_vm7  ;;  %v320_v42 = vld [vmem:[%s3401_s4] sm:$0xff]  ;;  %v2485_v44 = vld [vmem:[%s3402_s5 + $0x8] sm:$0xff]  ;;  %s2388_s14 = smov 118   ;;  %vm1340_vm14 = vcmask 130048  }
   0x8   :  { %151 = vperm.xlu1 %2343, %v28_v1   ;;  %v2478_v43 = vld [vmem:[%s3402_s5] sm:$0xff]  ;;  %v2492_v45 = vld [vmem:[%s3402_s5 + $0x10] sm:$0xff]  ;;  %v2499_v46 = vld [vmem:[%s3402_s5 + $0x18] sm:$0xff] }
   0x9   :  { %2069 = vmatmul.mubr.msk.f32.gmra.mrb[2].mxu0 %vm52_vm0, %v31_v5  ;;  %2263 = vmatprep.subr.msk.bf16.mxu1 %vm2262_vm8, %v2261_v41  ;;  %v2506_v47 = vld [vmem:[%s3402_s5 + $0x20] sm:$0xff]  ;;  %v2513_v48 = vld [vmem:[%s3402_s5 + $0x28] sm:$0xff]  ;;  %v2520_v49 = vld [vmem:[%s3402_s5 + $0x30] sm:$0xff] }
   0xa   :  { %39 = vperm.xlu0 %2342, %v29_v2   ;;  %2079 = vmatprep.mubr.msk.f32.mxu0 %vm198_vm1, %v174_v7  ;;  %v2527_v50 = vld [vmem:[%s3402_s5 + $0x38] sm:$0xff]  ;;  %v2534_v51 = vld [vmem:[%s3402_s5 + $0x40] sm:$0xff]  ;;  %v2541_v52 = vld [vmem:[%s3402_s5 + $0x48] sm:$0xff] }
   0xb   :  { %2266 = vmatpush3.bf16.msk.msra.mxu1 %vm2262_vm8, %v2261_v41  ;;  %2145 = vmatprep.mubr.msk.f32.mxu1 %vm839_vm9, %v2478_v43  ;;  %v2546_v53 = vld [vmem:[%s3401_s4 + $0x80] sm:$0xff]  ;;  %v2554_v54 = vld [vmem:[%s3402_s5 + $0x50] sm:$0xff]  ;;  %v2561_v55 = vld [vmem:[%s3402_s5 + $0x58] sm:$0xff] }
   0xc   :  { %155 = vperm.xlu1 %2343, %v29_v2   ;;  %3436 = vst [vmem:[#allocation5_spill] sm:$0xff] %v2554_v54  ;;  %3437 = vst [vmem:[#allocation6_spill] sm:$0xff] %v2561_v55  ;;  %v2568_v56 = vld [vmem:[%s3402_s5 + $0x60] sm:$0xff]  ;;  %v2573_v57 = vld [vmem:[%s3401_s4 + $0x8] sm:$0xff] }
   0xd   :  { %3438 = vst [vmem:[#allocation7_spill] sm:$0xff] %v2568_v56  ;;  %v2580_v58 = vld [vmem:[%s3402_s5 + $0x68] sm:$0xff]  ;;  %v2588_v59 = vld [vmem:[%s3402_s5 + $0x70] sm:$0xff]  ;;  %v2595_v60 = vld [vmem:[%s3402_s5 + $0x78] sm:$0xff] }
   0xe   :  { %44 = vperm.xlu0 %2342, %v30_v3   ;;  %2146 = vmatmul.mubr.msk.f32.vlgmr.msra.gmra.mrb[0].mxu1 %vm839_vm9, %v2485_v44  ;;  %3439 = vst [vmem:[#allocation8_spill] sm:$0xff] %v2580_v58  ;;  %3440 = vst [vmem:[#allocation9_spill] sm:$0xff] %v2588_v59  ;;  %v2600_v61 = vld [vmem:[%s3401_s4 + $0x98] sm:$0xff]  ;;  %v2608_v62 = vld [vmem:[%s3401_s4 + $0x88] sm:$0xff] }
   0xf   :  { %2148 = vmatprep.mubr.msk.f32.mxu1 %vm839_vm9, %v2492_v45  ;;  %3441 = vst [vmem:[#allocation10_spill] sm:$0xff] %v2595_v60  ;;  %v2614_v63 = vld [vmem:[%s3402_s5 + $0x80] sm:$0xff]  ;;  %v2619_v0 = vld [vmem:[%s3401_s4 + $0x18] sm:$0xff]  ;;  %v2626_v1 = vld [vmem:[%s3402_s5 + $0x88] sm:$0xff] }
  0x10   :  { %2344 = vset.pattern.permute.xlu1 %v2383_v4  ;;  %3442 = vst [vmem:[#allocation11_spill] sm:$0xff] %v2614_v63  ;;  %3443 = vst [vmem:[#allocation12_spill] sm:$0xff] %v2626_v1  ;;  %v2634_v2 = vld [vmem:[%s3401_s4 + $0x90] sm:$0xff]  ;;  %v2647_v4 = vld [vmem:[%s3402_s5 + $0x98] sm:$0xff] }
  0x11   :  { %49 = vperm.xlu1 %2344, %v31_v5   ;;  %3445 = vst [vmem:[#allocation14_spill] sm:$0xff] %v2647_v4  ;;  %v335_v39 = vld [vmem:[%s3401_s4 + $0x78] sm:$0xff]  ;;  %v2864_v40 = vld [vmem:[%s3401_s4 + $0xf0] sm:$0xff] }
  0x12   :  { %2345 = vset.pattern.permute.xlu0 %v2384_v6  ;;  %2149 = vmatmul.mubr.msk.f32.gmra.mrb[2].mxu1 %vm839_vm9, %v2499_v46  ;;  %v334_v41 = vld [vmem:[%s3401_s4 + $0x70] sm:$0xff] }
  0x13   :  { %159 = vperm.xlu0 %2345, %v30_v3   ;;  %2151 = vmatprep.mubr.msk.f32.mxu1 %vm839_vm9, %v2506_v47  ;;  %v2640_v3 = vld [vmem:[%s3402_s5 + $0x90] sm:$0xff] }
  0x14   :  { %3444 = vst [vmem:[#allocation13_spill] sm:$0xff] %v2640_v3 }
  0x15   :  { %2346 = vset.pattern.permute.xlu1 %v2384_v6  ;;  %v2657_v6 = vld [vmem:[%s3401_s4 + $0x10] sm:$0xff] }
  0x16   :  { %163 = vperm.xlu1 %2346, %v31_v5   ;;  %2152 = vmatmul.mubr.msk.f32.gmra.mrb[4].mxu1 %vm839_vm9, %v2513_v48  ;;  %v2652_v5 = vld [vmem:[%s3401_s4 + $0xa8] sm:$0xff] }
  0x17   :  { %2348 = vset.pattern.permute.xlu0 %v2385_v9  ;;  %2154 = vmatprep.mubr.msk.f32.mxu1 %vm839_vm9, %v2520_v49 }
  0x18   :  { %185 = vperm.xlu0 %2348, %v175_v8  }
  0x1a   :  { %2347 = vset.pattern.permute.xlu1 %v2385_v9  ;;  %2155 = vmatmul.mubr.msk.f32.gmra.mrb[6].mxu1 %vm839_vm9, %v2527_v50 }
  0x1b   :  { %180 = vperm.xlu1 %2347, %v174_v7   ;;  %2157 = vmatprep.mubr.msk.f32.mxu1 %vm839_vm9, %v2534_v51 }
  0x1c   :  { %190 = vperm.xlu0 %2348, %v176_v10  }
  0x1e   :  { %2158 = vmatmul.mubr.msk.f32.gmra.mrb[8].mxu1 %vm839_vm9, %v2541_v52 }
  0x1f   :  { %2349 = vset.pattern.permute.xlu1 %v2386_v11  ;;  %2160 = vmatprep.mubr.msk.f32.mxu1 %vm839_vm9, %v2554_v54 }
  0x20   :  { %297 = vperm.xlu1 %2349, %v174_v7   ;;  %2351 = vset.pattern.permute.xlu0 %v2386_v11  ;;  %v2666_v7 = vld [vmem:[%s3402_s5 + $0xa0] sm:$0xff] }
  0x21   :  { %305 = vperm.xlu0 %2351, %v176_v10   ;;  %3446 = vst [vmem:[#allocation15_spill] sm:$0xff] %v2666_v7 }
  0x22   :  { %2161 = vmatmul.mubr.msk.f32.gmra.mrb[10].mxu1 %vm839_vm9, %v2561_v55 }
  0x23   :  { %2163 = vmatprep.mubr.msk.f32.mxu1 %vm839_vm9, %v2568_v56 }
  0x24   :  { %301 = vperm.xlu1 %2349, %v175_v8  }
  0x25   :  { %2354 = vset.pattern.permute.xlu0 %v2385_v9 }
  0x26   :  { %2164 = vmatmul.mubr.msk.f32.gmra.mrb[12].mxu1 %vm839_vm9, %v2580_v58  ;;  %439 = vperm.xlu0 %2354, %v2608_v62  }
  0x27   :  { %2166 = vmatprep.mubr.msk.f32.mxu1 %vm839_vm9, %v2588_v59 }
  0x28   :  { %2350 = vset.pattern.permute.xlu1 %v2385_v9 }
  0x29   :  { %195 = vperm.xlu1 %2350, %v177_v12  }
  0x2a   :  { %2167 = vmatmul.mubr.msk.f32.gmra.mrb[14].mxu1 %vm839_vm9, %v2595_v60  ;;  %444 = vperm.xlu0 %2354, %v2634_v2  }
  0x2b   :  { %2169 = vmatprep.mubr.msk.f32.mxu1 %vm839_vm9, %v2614_v63 }
  0x2d   :  { %2352 = vset.pattern.permute.xlu1 %v2386_v11  ;;  %v2692_v11 = vld [vmem:[%s3402_s5 + $0xb0] sm:$0xff] }
  0x2e   :  { %309 = vperm.xlu1 %2352, %v177_v12   ;;  %2170 = vmatmul.mubr.msk.f32.gmra.mrb[16].mxu1 %vm839_vm9, %v2626_v1  ;;  %3448 = vst [vmem:[#allocation17_spill] sm:$0xff] %v2692_v11 }
  0x2f   :  { %2172 = vmatprep.mubr.msk.f32.mxu1 %vm839_vm9, %v2640_v3  ;;  %364 = vperm.xlu0 %2354, %v2657_v6  }
  0x32   :  { %2353 = vset.pattern.permute.xlu1 %v2385_v9  ;;  %2173 = vmatmul.mubr.msk.f32.gmra.mrb[18].mxu1 %vm839_vm9, %v2647_v4  ;;  %v2678_v9 = vld [vmem:[%s3402_s5 + $0xa8] sm:$0xff] }
  0x33   :  { %434 = vperm.xlu1 %2353, %v2546_v53   ;;  %2175 = vmatprep.mubr.msk.f32.mxu1 %vm839_vm9, %v2666_v7  ;;  %3447 = vst [vmem:[#allocation16_spill] sm:$0xff] %v2678_v9 }
  0x36   :  { %2176 = vmatmul.mubr.msk.f32.gmra.mrb[20].mxu1 %vm839_vm9, %v2678_v9 }
  0x37   :  { %354 = vperm.xlu1 %2353, %v320_v42   ;;  %2178 = vmatprep.mubr.msk.f32.mxu1 %vm839_vm9, %v2692_v11 }
  0x3b   :  { %359 = vperm.xlu1 %2353, %v2573_v57  }
  0x3f   :  { %449 = vperm.xlu1 %2353, %v2600_v61  }
  0x43   :  { %369 = vperm.xlu1 %2353, %v2619_v0  }
  0x47   :  { %459 = vperm.xlu1 %2353, %v2652_v5  }
  0x85   :  { %v35_v14 = vpop.permute.xlu0 %34 }
  0x87   :  { %v152_v13 = vpop.permute.xlu1 %151 }
  0x89   :  { %v40_v16 = vpop.permute.xlu0 %39 }
  0x8b   :  { %v156_v15 = vpop.permute.xlu1 %155 }
  0x8d   :  { %v45_v19 = vpop.permute.xlu0 %44 }
  0x90   :  { %v50_v17 = vpop.permute.xlu1 %49 }
  0x92   :  { %v160_v29 = vpop.permute.xlu0 %159 }
  0x95   :  { %v164_v26 = vpop.permute.xlu1 %163 }
  0xd8   :  { %v2067_v18 = vpop.f32.mrb[0].mxu0 }
  0xd9   :  { %v133_v20 = vadd.f32 %v2067_v18, %v40_v16  ;;  %v127_v21 = vpop.f32.mrb[1].mxu0  ;;  %v2723_v16 = vld [vmem:[%s3401_s4 + $0x38] sm:$0xff]  ;;  %v2735_v18 = vld [vmem:[%s3401_s4 + $0xb0] sm:$0xff] }
  0xda   :  { %v128_v22 = vadd.f32 %v127_v21, %v35_v14  ;;  %v2709_v14 = vld [vmem:[%s3401_s4 + $0x20] sm:$0xff]  ;;  %v2756_v21 = vld [vmem:[%s3402_s5 + $0xd8] sm:$0xff] }
  0xdb   :  { %vm147_vm2 = vcmp.ge.f32.partialorder %v133_v20, 0.0  ;;  %v167_v23 = vmul.f32 %v156_v15, %v133_v20  ;;  %v2718_v15 = vld [vmem:[%s3402_s5 + $0xc0] sm:$0xff]  ;;  %3453 = vst [vmem:[#allocation22_spill] sm:$0xff] %v2756_v21 }
  0xdc   :  { %vm146_vm3 = vcmp.ge.f32.partialorder %v128_v22, 0.0  ;;  %v166_v24 = vmul.f32 %v152_v13, %v128_v22  ;;  %v2070_v25 = vpop.f32.mrb[2].mxu0  ;;  %v2704_v13 = vld [vmem:[%s3402_s5 + $0xb8] sm:$0xff]  ;;  %3450 = vst [vmem:[#allocation19_spill] sm:$0xff] %v2718_v15 }
  0xdd   :  { %v143_v27 = vadd.f32 %v2070_v25, %v50_v17  ;;  %v137_v28 = vpop.f32.mrb[3].mxu0  ;;  %v171_v30 = vsel %vm147_vm2, %v133_v20, %v167_v23  ;;  %3449 = vst [vmem:[#allocation18_spill] sm:$0xff] %v2704_v13  ;;  %2179 = vmatmul.mubr.msk.f32.gmra.mrb[22].mxu1 %vm839_vm9, %v2704_v13  ;;  %v2730_v17 = vld [vmem:[%s3402_s5 + $0xc8] sm:$0xff]  ;;  %v2770_v23 = vld [vmem:[%s3402_s5 + $0xe0] sm:$0xff] }
  0xde   :  { %v138_v31 = vadd.f32 %v137_v28, %v45_v19  ;;  %v170_v32 = vsel %vm146_vm3, %v128_v22, %v166_v24  ;;  %2181 = vmatprep.mubr.msk.f32.mxu1 %vm839_vm9, %v2718_v15  ;;  %3451 = vst [vmem:[#allocation20_spill] sm:$0xff] %v2730_v17  ;;  %v2744_v19 = vld [vmem:[%s3402_s5 + $0xd0] sm:$0xff]  ;;  %v2749_v20 = vld [vmem:[%s3401_s4 + $0xc8] sm:$0xff]  ;;  %3454 = vst [vmem:[#allocation23_spill] sm:$0xff] %v2770_v23 }
  0xdf   :  { %vm149_vm4 = vcmp.ge.f32.partialorder %v143_v27, 0.0  ;;  %v169_v33 = vmul.f32 %v164_v26, %v143_v27  ;;  %v2245_v34 = vpack.c.bf16 %v171_v30, %v170_v32  ;;  %3452 = vst [vmem:[#allocation21_spill] sm:$0xff] %v2744_v19  ;;  %v2761_v22 = vld [vmem:[%s3401_s4 + $0x30] sm:$0xff]  ;;  %v2775_v24 = vld [vmem:[%s3401_s4 + $0x48] sm:$0xff]  ;;  %v2787_v26 = vld [vmem:[%s3401_s4 + $0xc0] sm:$0xff] }
  0xe0   :  { %vm148_vm5 = vcmp.ge.f32.partialorder %v138_v31, 0.0  ;;  %v168_v35 = vmul.f32 %v160_v29, %v138_v31  ;;  %v2782_v25 = vld [vmem:[%s3402_s5 + $0xe8] sm:$0xff]  ;;  %v2801_v28 = vld [vmem:[%s3401_s4 + $0xd8] sm:$0xff]  ;;  %v2813_v30 = vld [vmem:[%s3401_s4 + $0x40] sm:$0xff] }
  0xe1   :  { %2246 = vmatprep.subr.bf16.mxu0 %v2245_v34  ;;  %v173_v36 = vsel %vm149_vm4, %v143_v27, %v169_v33  ;;  %2182 = vmatmul.mubr.msk.f32.gmra.mrb[24].mxu1 %vm839_vm9, %v2730_v17  ;;  %3455 = vst [vmem:[#allocation24_spill] sm:$0xff] %v2782_v25  ;;  %v2796_v27 = vld [vmem:[%s3402_s5 + $0xf0] sm:$0xff]  ;;  %v2808_v29 = vld [vmem:[%s3402_s5 + $0xf8] sm:$0xff]  ;;  %v2834_v33 = vld [vmem:[%s3401_s4 + $0xe8] sm:$0xff] }
  0xe2   :  { %2248 = vmatpush3.bf16.msra.mxu0 %v2245_v34  ;;  %v172_v37 = vsel %vm148_vm5, %v138_v31, %v168_v35  ;;  %2184 = vmatprep.mubr.msk.f32.mxu1 %vm839_vm9, %v2744_v19  ;;  %3456 = vst [vmem:[#allocation25_spill] sm:$0xff] %v2796_v27  ;;  %3457 = vst [vmem:[#allocation26_spill] sm:$0xff] %v2808_v29  ;;  %v2822_v31 = vld [vmem:[%s3401_s4 + $0x58] sm:$0xff]  ;;  %v2827_v32 = vld [vmem:[%s3401_s4 + $0xd0] sm:$0xff] }
  0xe3   :  { %v2249_v38 = vpack.c.bf16 %v173_v36, %v172_v37  ;;  %v330_v34 = vld [vmem:[%s3401_s4 + $0x50] sm:$0xff]  ;;  %v333_v35 = vld [vmem:[%s3401_s4 + $0x68] sm:$0xff]  ;;  %v2846_v36 = vld [vmem:[%s3401_s4 + $0xe0] sm:$0xff] }
  0xe4   :  { %v2852_v37 = vld [vmem:[%s3401_s4 + $0xf8] sm:$0xff] }
  0xe5   :  { %2250 = vmatprep.subr.bf16.mxu0 %v2249_v38  ;;  %2185 = vmatmul.mubr.msk.f32.gmra.mrb[26].mxu1 %vm839_vm9, %v2756_v21 }
  0xe6   :  { %2252 = vmatpush3.bf16.msra.mxu0 %v2249_v38  ;;  %2187 = vmatprep.mubr.msk.f32.mxu1 %vm839_vm9, %v2770_v23  ;;  %v332_v38 = vld [vmem:[%s3401_s4 + $0x60] sm:$0xff] }
  0xe9   :  { %2080 = vmatmul.mubr.msk.f32.vlgmr.msra.gmra.mrb[4].mxu0 %vm198_vm1, %v175_v8  ;;  %v2671_v8 = vld [vmem:[%s3401_s4 + $0x28] sm:$0xff]  ;;  %2188 = vmatmul.mubr.msk.f32.gmra.mrb[28].mxu1 %vm839_vm9, %v2782_v25  ;;  %v186_v25 = vpop.permute.xlu0 %185 }
  0xea   :  { %2082 = vmatprep.mubr.msk.f32.mxu0 %vm198_vm1, %v176_v10  ;;  %v2683_v10 = vld [vmem:[%s3401_s4 + $0xa0] sm:$0xff]  ;;  %379 = vperm.xlu1 %2353, %v2671_v8  }
  0xeb   :  { %454 = vperm.xlu0 %2354, %v2683_v10   ;;  %2190 = vmatprep.mubr.msk.f32.mxu1 %vm839_vm9, %v2796_v27 }
  0xed   :  { %2083 = vmatmul.mubr.msk.f32.gmra.mrb[6].mxu0 %vm198_vm1, %v177_v12  ;;  %v2697_v12 = vld [vmem:[%s3401_s4 + $0xb8] sm:$0xff]  ;;  %2191 = vmatmul.mubr.msk.f32.gmra.mrb[30].mxu1 %vm839_vm9, %v2808_v29  ;;  %v191_v19 = vpop.permute.xlu0 %190 }
  0xee   :  { %2093 = vmatprep.mubr.msk.f32.mxu0 %vm198_vm1, %v320_v42  ;;  %469 = vperm.xlu1 %2353, %v2697_v12   ;;  %v181_v42 = vpop.permute.xlu1 %180 }
  0xef   :  { %374 = vperm.xlu0 %2354, %v2709_v14  }
  0xf1   :  { %v306_v63 = vpop.permute.xlu0 %305 }
  0xf2   :  { %389 = vperm.xlu1 %2353, %v2723_v16   ;;  %v298_v29 = vpop.permute.xlu1 %297 }
  0xf3   :  { %464 = vperm.xlu0 %2354, %v2735_v18  }
  0xf6   :  { %479 = vperm.xlu1 %2353, %v2749_v20   ;;  %v302_v27 = vpop.permute.xlu1 %301 }
  0xf7   :  { %384 = vperm.xlu0 %2354, %v2761_v22  }
  0xfa   :  { %399 = vperm.xlu1 %2353, %v2775_v24   ;;  %v196_v23 = vpop.permute.xlu1 %195 }
  0xfb   :  { %474 = vperm.xlu0 %2354, %v2787_v26  }
  0xfe   :  { %489 = vperm.xlu1 %2353, %v2801_v28   ;;  %v310_v4 = vpop.permute.xlu1 %309 }
  0xff   :  { %394 = vperm.xlu0 %2354, %v2813_v30  }
 0x102   :  { %409 = vperm.xlu1 %2353, %v2822_v31  }
 0x103   :  { %484 = vperm.xlu0 %2354, %v2827_v32  }
 0x106   :  { %499 = vperm.xlu1 %2353, %v2834_v33  }
 0x107   :  { %404 = vperm.xlu0 %2354, %v330_v34  }
 0x10a   :  { %419 = vperm.xlu1 %2353, %v333_v35  }
 0x10b   :  { %494 = vperm.xlu0 %2354, %v2846_v36  }
 0x10e   :  { %509 = vperm.xlu1 %2353, %v2852_v37  }
 0x10f   :  { %414 = vperm.xlu0 %2354, %v332_v38  }
 0x112   :  { %429 = vperm.xlu1 %2353, %v335_v39  }
 0x113   :  { %504 = vperm.xlu0 %2354, %v2864_v40  }
 0x116   :  { %1278 = vrot.lane.b32.xlu1 %v2485_v44, %s2388_s14 }
 0x117   :  { %424 = vperm.xlu0 %2354, %v334_v41  }
 0x11a   :  { %1282 = vrot.lane.b32.xlu1 %v2499_v46, %s2388_s14 }
 0x11b   :  { %1276 = vrot.lane.b32.xlu0 %v2478_v43, %s2388_s14 }
 0x11e   :  { %1286 = vrot.lane.b32.xlu1 %v2513_v48, %s2388_s14  ;;  %v3460_v48 = vld [vmem:[#allocation6_spill] sm:$0xff] }
 0x11f   :  { %1280 = vrot.lane.b32.xlu0 %v2492_v45, %s2388_s14 }
 0x122   :  { %1290 = vrot.lane.b32.xlu1 %v2527_v50, %s2388_s14  ;;  %v3462_v50 = vld [vmem:[#allocation8_spill] sm:$0xff] }
 0x123   :  { %1284 = vrot.lane.b32.xlu0 %v2506_v47, %s2388_s14  ;;  %v3459_v47 = vld [vmem:[#allocation5_spill] sm:$0xff] }
 0x126   :  { %1294 = vrot.lane.b32.xlu1 %v2541_v52, %s2388_s14  ;;  %v3463_v52 = vld [vmem:[#allocation9_spill] sm:$0xff] }
 0x127   :  { %1288 = vrot.lane.b32.xlu0 %v2520_v49, %s2388_s14  ;;  %v3461_v49 = vld [vmem:[#allocation7_spill] sm:$0xff] }
 0x12a   :  { %1298 = vrot.lane.b32.xlu1 %v3460_v48, %s2388_s14  ;;  %v3472_v48 = vld [vmem:[#allocation18_spill] sm:$0xff] }
 0x12b   :  { %1292 = vrot.lane.b32.xlu0 %v2534_v51, %s2388_s14 }
 0x12e   :  { %1302 = vrot.lane.b32.xlu1 %v3462_v50, %s2388_s14  ;;  %v3474_v50 = vld [vmem:[#allocation20_spill] sm:$0xff] }
 0x12f   :  { %1296 = vrot.lane.b32.xlu0 %v3459_v47, %s2388_s14  ;;  %v3471_v47 = vld [vmem:[#allocation17_spill] sm:$0xff] }
 0x133   :  { %1300 = vrot.lane.b32.xlu0 %v3461_v49, %s2388_s14  ;;  %v3473_v49 = vld [vmem:[#allocation19_spill] sm:$0xff] }
 0x137   :  { %1304 = vrot.lane.b32.xlu0 %v3463_v52, %s2388_s14 }
 0x1bc   :  { %v2081_v21 = vpop.f32.mrb[4].mxu0 }
 0x1bd   :  { %v279_v17 = vadd.f32 %v2081_v21, %v186_v25  ;;  %v273_v15 = vpop.f32.mrb[5].mxu0 }
 0x1be   :  { %v274_v13 = vadd.f32 %v273_v15, %v181_v42 }
 0x1bf   :  { %vm293_vm10 = vcmp.ge.f32.partialorder %v279_v17, 0.0  ;;  %v313_v11 = vmul.f32 %v302_v27, %v279_v17 }
 0x1c0   :  { %vm292_vm11 = vcmp.ge.f32.partialorder %v274_v13, 0.0  ;;  %v312_v9 = vmul.f32 %v298_v29, %v274_v13  ;;  %v2084_v7 = vpop.f32.mrb[6].mxu0 }
 0x1c1   :  { %v289_v3 = vadd.f32 %v2084_v7, %v196_v23  ;;  %v283_v1 = vpop.f32.mrb[7].mxu0  ;;  %v317_v60 = vsel %vm293_vm10, %v279_v17, %v313_v11 }
 0x1c2   :  { %v284_v59 = vadd.f32 %v283_v1, %v191_v19  ;;  %v316_v58 = vsel %vm292_vm11, %v274_v13, %v312_v9 }
 0x1c3   :  { %vm295_vm12 = vcmp.ge.f32.partialorder %v289_v3, 0.0  ;;  %v315_v56 = vmul.f32 %v310_v4, %v289_v3  ;;  %v2253_v55 = vpack.c.bf16 %v317_v60, %v316_v58 }
 0x1c4   :  { %vm294_vm13 = vcmp.ge.f32.partialorder %v284_v59, 0.0  ;;  %v314_v54 = vmul.f32 %v306_v63, %v284_v59 }
 0x1c5   :  { %2254 = vmatprep.subr.bf16.mxu0 %v2253_v55  ;;  %v319_v21 = vsel %vm295_vm12, %v289_v3, %v315_v56 }
 0x1c6   :  { %2256 = vmatpush3.bf16.msra.mxu0 %v2253_v55  ;;  %v318_v15 = vsel %vm294_vm13, %v284_v59, %v314_v54 }
 0x1c7   :  { %v2257_v25 = vpack.c.bf16 %v319_v21, %v318_v15  ;;  %v3469_v21 = vld [vmem:[#allocation15_spill] sm:$0xff]  ;;  %v3470_v15 = vld [vmem:[#allocation16_spill] sm:$0xff] }
 0x1c9   :  { %2258 = vmatprep.subr.bf16.mxu0 %v2257_v25 }
 0x1ca   :  { %2260 = vmatpush3.bf16.msra.mxu0 %v2257_v25 }
 0x1cd   :  { %2094 = vmatmul.mubr.msk.f32.vlgmr.msra.gmra.mrb[8].mxu0 %vm198_vm1, %v2573_v57 }
 0x1ce   :  { %2096 = vmatprep.mubr.msk.f32.mxu0 %vm198_vm1, %v2657_v6 }
 0x1d1   :  { %2097 = vmatmul.mubr.msk.f32.gmra.mrb[10].mxu0 %vm198_vm1, %v2619_v0 }
 0x1d2   :  { %2099 = vmatprep.mubr.msk.f32.mxu0 %vm198_vm1, %v2709_v14 }
 0x1d5   :  { %2100 = vmatmul.mubr.msk.f32.gmra.mrb[12].mxu0 %vm198_vm1, %v2671_v8 }
 0x1d6   :  { %2102 = vmatprep.mubr.msk.f32.mxu0 %vm198_vm1, %v2761_v22 }
 0x1d9   :  { %2103 = vmatmul.mubr.msk.f32.gmra.mrb[14].mxu0 %vm198_vm1, %v2723_v16 }
 0x1da   :  { %2105 = vmatprep.mubr.msk.f32.mxu0 %vm198_vm1, %v2813_v30 }
 0x1dd   :  { %2106 = vmatmul.mubr.msk.f32.gmra.mrb[16].mxu0 %vm198_vm1, %v2775_v24 }
 0x1de   :  { %2108 = vmatprep.mubr.msk.f32.mxu0 %vm198_vm1, %v330_v34  ;;  %v3464_v34 = vld [vmem:[#allocation10_spill] sm:$0xff] }
 0x1df   :  { %1306 = vrot.lane.b32.xlu1 %v3464_v34, %s2388_s14 }
 0x1e1   :  { %2109 = vmatmul.mubr.msk.f32.gmra.mrb[18].mxu0 %vm198_vm1, %v2822_v31 }
 0x1e2   :  { %2111 = vmatprep.mubr.msk.f32.mxu0 %vm198_vm1, %v332_v38  ;;  %v3466_v38 = vld [vmem:[#allocation12_spill] sm:$0xff] }
 0x1e3   :  { %1310 = vrot.lane.b32.xlu1 %v3466_v38, %s2388_s14 }
 0x1e5   :  { %2112 = vmatmul.mubr.msk.f32.gmra.mrb[20].mxu0 %vm198_vm1, %v333_v35 }
 0x1e6   :  { %2114 = vmatprep.mubr.msk.f32.mxu0 %vm198_vm1, %v334_v41 }
 0x1e9   :  { %2115 = vmatmul.mubr.msk.f32.gmra.mrb[22].mxu0 %vm198_vm1, %v335_v39  ;;  %v3467_v39 = vld [vmem:[#allocation13_spill] sm:$0xff] }
 0x1ea   :  { %2117 = vmatprep.mubr.msk.f32.mxu0 %vm198_vm1, %v2546_v53  ;;  %v2927_v53 = vpop.f32.mrb[0].mxu1 }
 0x1eb   :  { %v2929_v54 = vpop.f32.mrb[1].mxu1 }
 0x1ec   :  { %v2931_v55 = vpop.f32.mrb[2].mxu1 }
 0x1ed   :  { %2118 = vmatmul.mubr.msk.f32.gmra.mrb[24].mxu0 %vm198_vm1, %v2608_v62  ;;  %v2933_v56 = vpop.f32.mrb[3].mxu1 }
 0x1ee   :  { %2120 = vmatprep.mubr.msk.f32.mxu0 %vm198_vm1, %v2634_v2  ;;  %v2935_v57 = vpop.f32.mrb[4].mxu1 }
 0x1ef   :  { %v2937_v58 = vpop.f32.mrb[5].mxu1 }
 0x1f0   :  { %v2939_v59 = vpop.f32.mrb[6].mxu1 }
 0x1f1   :  { %2121 = vmatmul.mubr.msk.f32.gmra.mrb[26].mxu0 %vm198_vm1, %v2600_v61  ;;  %v2941_v60 = vpop.f32.mrb[7].mxu1 }
 0x1f2   :  { %2123 = vmatprep.mubr.msk.f32.mxu0 %vm198_vm1, %v2683_v10  ;;  %v2943_v61 = vpop.f32.mrb[8].mxu1 }
 0x1f3   :  { %v2945_v62 = vpop.f32.mrb[9].mxu1 }
 0x1f4   :  { %v2947_v63 = vpop.f32.mrb[10].mxu1 }
 0x1f5   :  { %2124 = vmatmul.mubr.msk.f32.gmra.mrb[28].mxu0 %vm198_vm1, %v2652_v5  ;;  %v2949_v0 = vpop.f32.mrb[11].mxu1 }
 0x1f6   :  { %2126 = vmatprep.mubr.msk.f32.mxu0 %vm198_vm1, %v2735_v18  ;;  %v2951_v1 = vpop.f32.mrb[12].mxu1 }
 0x1f7   :  { %v2953_v2 = vpop.f32.mrb[13].mxu1 }
 0x1f8   :  { %v2955_v3 = vpop.f32.mrb[14].mxu1 }
 0x1f9   :  { %2127 = vmatmul.mubr.msk.f32.gmra.mrb[30].mxu0 %vm198_vm1, %v2697_v12  ;;  %v2957_v4 = vpop.f32.mrb[15].mxu1 }
 0x1fa   :  { %2129 = vmatprep.mubr.msk.f32.mxu0 %vm198_vm1, %v2787_v26  ;;  %v2959_v5 = vpop.f32.mrb[16].mxu1  ;;  %v836_v26 = vld [vmem:[%s3403_s6 + $0x8] sm:$0xff] }
 0x1fb   :  { %v2961_v6 = vpop.f32.mrb[17].mxu1 }
 0x1fc   :  { %v2963_v7 = vpop.f32.mrb[18].mxu1 }
 0x1fd   :  { %2130 = vmatmul.mubr.msk.f32.gmra.mrb[32].mxu0 %vm198_vm1, %v2749_v20  ;;  %v2965_v8 = vpop.f32.mrb[19].mxu1  ;;  %v2987_v20 = vpop.permute.xlu1 %434 }
 0x1fe   :  { %2132 = vmatprep.mubr.msk.f32.mxu0 %vm198_vm1, %v2827_v32  ;;  %v2967_v9 = vpop.f32.mrb[20].mxu1 }
 0x1ff   :  { %v2969_v10 = vpop.f32.mrb[21].mxu1 }
 0x200   :  { %v2971_v11 = vpop.f32.mrb[22].mxu1 }
 0x201   :  { %2133 = vmatmul.mubr.msk.f32.gmra.mrb[34].mxu0 %vm198_vm1, %v2801_v28  ;;  %v2973_v12 = vpop.f32.mrb[23].mxu1  ;;  %v355_v24 = vpop.permute.xlu1 %354 }
 0x202   :  { %2135 = vmatprep.mubr.msk.f32.mxu0 %vm198_vm1, %v2846_v36  ;;  %v2975_v13 = vpop.f32.mrb[24].mxu1  ;;  %v2996_v28 = vpop.permute.xlu0 %439 }
 0x203   :  { %v2977_v14 = vpop.f32.mrb[25].mxu1 }
 0x204   :  { %v2979_v16 = vpop.f32.mrb[26].mxu1 }
 0x205   :  { %2136 = vmatmul.mubr.msk.f32.gmra.mrb[36].mxu0 %vm198_vm1, %v2834_v33  ;;  %v2981_v17 = vpop.f32.mrb[27].mxu1  ;;  %v360_v27 = vpop.permute.xlu1 %359 }
 0x206   :  { %2138 = vmatprep.mubr.msk.f32.mxu0 %vm198_vm1, %v2864_v40  ;;  %v2983_v18 = vpop.f32.mrb[28].mxu1  ;;  %v3004_v30 = vpop.permute.xlu0 %444  ;;  %v3468_v40 = vld [vmem:[#allocation14_spill] sm:$0xff] }
 0x207   :  { %v2985_v19 = vpop.f32.mrb[29].mxu1  ;;  %1314 = vrot.lane.b32.xlu1 %v3468_v40, %s2388_s14  ;;  %v3475_v40 = vld [vmem:[#allocation21_spill] sm:$0xff] }
 0x208   :  { %v2989_v22 = vpop.f32.mrb[30].mxu1 }
 0x209   :  { %2139 = vmatmul.mubr.msk.f32.gmra.mrb[38].mxu0 %vm198_vm1, %v2852_v37  ;;  %v2991_v23 = vpop.f32.mrb[31].mxu1  ;;  %v3002_v29 = vpop.permute.xlu1 %449  ;;  %v3465_v37 = vld [vmem:[#allocation11_spill] sm:$0xff] }
 0x20a   :  { %3458 = vst [vmem:[#allocation27_spill] sm:$0xff] %v2991_v23  ;;  %1261 = vmatprep.mubr.f32.mxu0 %v836_v26  ;;  %v365_v32 = vpop.permute.xlu0 %364  ;;  %1308 = vrot.lane.b32.xlu0 %v3465_v37, %s2388_s14 }
 0x20b   :  { %1318 = vrot.lane.b32.xlu1 %v3470_v15, %s2388_s14 }
 0x20d   :  { %v370_v31 = vpop.permute.xlu1 %369 }
 0x20e   :  { %v3020_v44 = vpop.permute.xlu0 %454  ;;  %1312 = vrot.lane.b32.xlu0 %v3467_v39, %s2388_s14 }
 0x20f   :  { %1322 = vrot.lane.b32.xlu1 %v3472_v48, %s2388_s14 }
 0x211   :  { %v3018_v43 = vpop.permute.xlu1 %459 }
 0x212   :  { %v375_v46 = vpop.permute.xlu0 %374  ;;  %1316 = vrot.lane.b32.xlu0 %v3469_v21, %s2388_s14  ;;  %v3476_v21 = vld [vmem:[#allocation22_spill] sm:$0xff] }
 0x213   :  { %1326 = vrot.lane.b32.xlu1 %v3474_v50, %s2388_s14 }
 0x215   :  { %v380_v45 = vpop.permute.xlu1 %379 }
 0x216   :  { %v3036_v51 = vpop.permute.xlu0 %464  ;;  %1320 = vrot.lane.b32.xlu0 %v3471_v47, %s2388_s14 }
 0x217   :  { %1330 = vrot.lane.b32.xlu1 %v3476_v21, %s2388_s14 }
 0x219   :  { %v3034_v33 = vpop.permute.xlu1 %469 }
 0x21a   :  { %v385_v36 = vpop.permute.xlu0 %384  ;;  %1324 = vrot.lane.b32.xlu0 %v3473_v49, %s2388_s14 }
 0x21d   :  { %v390_v35 = vpop.permute.xlu1 %389 }
 0x21e   :  { %v3052_v42 = vpop.permute.xlu0 %474  ;;  %1328 = vrot.lane.b32.xlu0 %v3475_v40, %s2388_s14  ;;  %v3478_v40 = vld [vmem:[#allocation23_spill] sm:$0xff] }
 0x221   :  { %v3050_v41 = vpop.permute.xlu1 %479 }
 0x222   :  { %v395_v26 = vpop.permute.xlu0 %394  ;;  %1332 = vrot.lane.b32.xlu0 %v3478_v40, %s2388_s14 }
 0x225   :  { %v400_v25 = vpop.permute.xlu1 %399 }
 0x226   :  { %v3068_v34 = vpop.permute.xlu0 %484 }
 0x229   :  { %v3066_v52 = vpop.permute.xlu1 %489 }
 0x22a   :  { %v405_v50 = vpop.permute.xlu0 %404 }
 0x22d   :  { %v410_v48 = vpop.permute.xlu1 %409 }
 0x2a0   :  { %v2095_v37 = vpop.f32.mrb[8].mxu0 }
 0x2a1   :  { %v3070_v38 = vadd.f32 %v2095_v37, %v360_v27  ;;  %v642_v39 = vpop.f32.mrb[9].mxu0 }
 0x2a2   :  { %v3076_v15 = vadd.f32 %v642_v39, %v355_v24  ;;  %v3479_v24 = vld [vmem:[#allocation24_spill] sm:$0xff] }
 0x2a3   :  { %v3080_v47 = vmul.f32 %v2927_v53, %v3070_v38  ;;  %1334 = vrot.lane.b32.xlu1 %v3479_v24, %s2388_s14  ;;  %v3483_v24 = vld [vmem:[#allocation26_spill] sm:$0xff]  ;;  %v3116_v53 = vpop.permute.xlu0 %494 }
 0x2a4   :  { %3477 = vst [vmem:[#allocation5_spill] sm:$0xff] %v3076_v15  ;;  %v3084_v49 = vmul.f32 %v2929_v54, %v3076_v15  ;;  %v2098_v27 = vpop.f32.mrb[10].mxu0  ;;  %v3482_v15 = vld [vmem:[#allocation25_spill] sm:$0xff] }
 0x2a5   :  { %v3086_v37 = vadd.f32 %v2098_v27, %v370_v31  ;;  %v652_v23 = vpop.f32.mrb[11].mxu0  ;;  %1336 = vrot.lane.b32.xlu0 %v3482_v15, %s2388_s14 }
 0x2a6   :  { %v3094_v39 = vadd.f32 %v652_v23, %v365_v32  ;;  %v3110_v23 = vpop.permute.xlu1 %499 }
 0x2a7   :  { %v3098_v54 = vmul.f32 %v2931_v55, %v3086_v37  ;;  %1338 = vrot.lane.b32.xlu1 %v3483_v24, %s2388_s14 }
 0x2a8   :  { %3480 = vst [vmem:[#allocation6_spill] sm:$0xff] %v3094_v39  ;;  %v3102_v31 = vmul.f32 %v2933_v56, %v3094_v39  ;;  %v2101_v21 = vpop.f32.mrb[12].mxu0 }
 0x2a9   :  { %v3104_v27 = vadd.f32 %v2101_v21, %v380_v45  ;;  %v662_v40 = vpop.f32.mrb[13].mxu0 }
 0x2aa   :  { %v3114_v32 = vadd.f32 %v662_v40, %v375_v46  ;;  %v420_v40 = vpop.permute.xlu1 %419 }
 0x2ab   :  { %3481 = vst [vmem:[#allocation7_spill] sm:$0xff] %v3104_v27  ;;  %v3120_v56 = vmul.f32 %v2935_v57, %v3104_v27 }
 0x2ac   :  { %3484 = vst [vmem:[#allocation8_spill] sm:$0xff] %v3114_v32  ;;  %v3124_v45 = vmul.f32 %v2937_v58, %v3114_v32  ;;  %v2104_v15 = vpop.f32.mrb[14].mxu0  ;;  %v415_v32 = vpop.permute.xlu0 %414 }
 0x2ad   :  { %v3126_v21 = vadd.f32 %v2104_v15, %v390_v35  ;;  %v672_v24 = vpop.f32.mrb[15].mxu0 }
 0x2ae   :  { %v3130_v55 = vadd.f32 %v672_v24, %v385_v36 }
 0x2af   :  { %v3134_v46 = vmul.f32 %v2939_v59, %v3126_v21 }
 0x2b0   :  { %3485 = vst [vmem:[#allocation9_spill] sm:$0xff] %v3130_v55  ;;  %v3138_v57 = vmul.f32 %v2941_v60, %v3130_v55  ;;  %v2107_v58 = vpop.f32.mrb[16].mxu0 }
 0x2b1   :  { %v3140_v27 = vadd.f32 %v2107_v58, %v400_v25  ;;  %v682_v35 = vpop.f32.mrb[17].mxu0  ;;  %v3156_v25 = vpop.permute.xlu1 %509 }
 0x2b2   :  { %v3144_v39 = vadd.f32 %v682_v35, %v395_v26  ;;  %v3162_v26 = vpop.permute.xlu0 %504 }
 0x2b3   :  { %v3148_v36 = vmul.f32 %v2943_v61, %v3140_v27 }
 0x2b4   :  { %3486 = vst [vmem:[#allocation10_spill] sm:$0xff] %v3144_v39  ;;  %v3152_v59 = vmul.f32 %v2945_v62, %v3144_v39  ;;  %v2110_v60 = vpop.f32.mrb[18].mxu0 }
 0x2b5   :  { %v3154_v24 = vadd.f32 %v2110_v60, %v410_v48  ;;  %v692_v55 = vpop.f32.mrb[19].mxu0 }
 0x2b6   :  { %v3160_v15 = vadd.f32 %v692_v55, %v405_v50  ;;  %v430_v55 = vpop.permute.xlu1 %429 }
 0x2b7   :  { %3487 = vst [vmem:[#allocation11_spill] sm:$0xff] %v3154_v24  ;;  %v3166_v61 = vmul.f32 %v2947_v63, %v3154_v24 }
 0x2b8   :  { %3488 = vst [vmem:[#allocation12_spill] sm:$0xff] %v3160_v15  ;;  %v3170_v62 = vmul.f32 %v2949_v0, %v3160_v15  ;;  %v2113_v48 = vpop.f32.mrb[20].mxu0  ;;  %v425_v15 = vpop.permute.xlu0 %424 }
 0x2b9   :  { %v3172_v35 = vadd.f32 %v2113_v48, %v420_v40  ;;  %v702_v60 = vpop.f32.mrb[21].mxu0 }
 0x2ba   :  { %v3176_v58 = vadd.f32 %v702_v60, %v415_v32 }
 0x2bb   :  { %v3180_v50 = vmul.f32 %v2951_v1, %v3172_v35 }
 0x2bc   :  { %v3184_v63 = vmul.f32 %v2953_v2, %v3176_v58  ;;  %v2116_v0 = vpop.f32.mrb[22].mxu0 }
 0x2bd   :  { %v3186_v24 = vadd.f32 %v2116_v0, %v430_v55  ;;  %v712_v40 = vpop.f32.mrb[23].mxu0 }
 0x2be   :  { %v3190_v39 = vadd.f32 %v712_v40, %v425_v15 }
 0x2bf   :  { %v3194_v32 = vmul.f32 %v2955_v3, %v3186_v24 }
 0x2c0   :  { %3489 = vst [vmem:[#allocation13_spill] sm:$0xff] %v3190_v39  ;;  %v3198_v1 = vmul.f32 %v2957_v4, %v3190_v39  ;;  %v2119_v2 = vpop.f32.mrb[24].mxu0 }
 0x2c1   :  { %v3201_v60 = vadd.f32 %v2119_v2, %v2996_v28  ;;  %v722_v55 = vpop.f32.mrb[25].mxu0 }
 0x2c2   :  { %v3206_v48 = vadd.f32 %v722_v55, %v2987_v20 }
 0x2c3   :  { %v1182_v15 = vmul.f32 %v2959_v5, %v3201_v60 }
 0x2c4   :  { %v1181_v3 = vmul.f32 %v2961_v6, %v3206_v48  ;;  %v2122_v40 = vpop.f32.mrb[26].mxu0 }
 0x2c5   :  { %v3213_v4 = vadd.f32 %v2122_v40, %v3002_v29  ;;  %v732_v39 = vpop.f32.mrb[27].mxu0  ;;  %v3490_v29 = vpack.c.bf16 %v3080_v47, %v3084_v49  ;;  %v3491_v47 = vpack.c.bf16 %v3098_v54, %v3102_v31  ;;  %v3492_v54 = vpack.c.bf16 %v3120_v56, %v3124_v45 }
 0x2c6   :  { %v2267_v28 = vpack.c.bf16 %v1182_v15, %v1181_v3  ;;  %v3216_v2 = vadd.f32 %v732_v39, %v3004_v30  ;;  %v3493_v56 = vpack.c.bf16 %v3134_v46, %v3138_v57  ;;  %v3494_v46 = vpack.c.bf16 %v3148_v36, %v3152_v59 }
 0x2c7   :  { %v1184_v0 = vmul.f32 %v2963_v7, %v3213_v4  ;;  %v3495_v36 = vpack.c.bf16 %v3166_v61, %v3170_v62  ;;  %v3498_v61 = vpack.c.bf16 %v3194_v32, %v3198_v1  ;;  %v837_v62 = vld [vmem:[%s3403_s6 + $0x10] sm:$0xff] }
 0x2c8   :  { %v1183_v20 = vmul.f32 %v2965_v8, %v3216_v2  ;;  %v2125_v55 = vpop.f32.mrb[28].mxu0  ;;  %2268 = vmatprep.subr.bf16.mxu0 %v2267_v28 }
 0x2c9   :  { %v3223_v5 = vadd.f32 %v2125_v55, %v3018_v43  ;;  %v742_v6 = vpop.f32.mrb[29].mxu0  ;;  %2270 = vmatpush3.bf16.msra.mxu0 %v3490_v29 }
 0x2ca   :  { %v2271_v15 = vpack.c.bf16 %v1184_v0, %v1183_v20  ;;  %v3229_v30 = vadd.f32 %v742_v6, %v3020_v44 }
 0x2cb   :  { %v1186_v7 = vmul.f32 %v2967_v9, %v3223_v5 }
 0x2cc   :  { %v1185_v8 = vmul.f32 %v2969_v10, %v3229_v30  ;;  %v2128_v39 = vpop.f32.mrb[30].mxu0  ;;  %2272 = vmatprep.subr.bf16.mxu0 %v2271_v15 }
 0x2cd   :  { %v3236_v43 = vadd.f32 %v2128_v39, %v3034_v33  ;;  %v752_v3 = vpop.f32.mrb[31].mxu0  ;;  %2274 = vmatpush3.bf16.msra.mxu0 %v3491_v47 }
 0x2ce   :  { %v2275_v49 = vpack.c.bf16 %v1186_v7, %v1185_v8  ;;  %v3242_v44 = vadd.f32 %v752_v3, %v3036_v51  ;;  %v3496_v7 = vld [vmem:[#allocation27_spill] sm:$0xff] }
 0x2cf   :  { %v1188_v9 = vmul.f32 %v2971_v11, %v3236_v43 }
 0x2d0   :  { %v1187_v10 = vmul.f32 %v2973_v12, %v3242_v44  ;;  %v2131_v0 = vpop.f32.mrb[32].mxu0  ;;  %2276 = vmatprep.subr.bf16.mxu0 %v2275_v49 }
 0x2d1   :  { %v3249_v33 = vadd.f32 %v2131_v0, %v3050_v41  ;;  %v762_v40 = vpop.f32.mrb[33].mxu0  ;;  %2278 = vmatpush3.bf16.msra.mxu0 %v3492_v54 }
 0x2d2   :  { %v2279_v31 = vpack.c.bf16 %v1188_v9, %v1187_v10  ;;  %v3255_v51 = vadd.f32 %v762_v40, %v3052_v42 }
 0x2d3   :  { %v1190_v11 = vmul.f32 %v2975_v13, %v3249_v33 }
 0x2d4   :  { %v1189_v12 = vmul.f32 %v2977_v14, %v3255_v51  ;;  %v2134_v28 = vpop.f32.mrb[34].mxu0  ;;  %2280 = vmatprep.subr.bf16.mxu0 %v2279_v31 }
 0x2d5   :  { %v3262_v41 = vadd.f32 %v2134_v28, %v3066_v52  ;;  %v772_v20 = vpop.f32.mrb[35].mxu0  ;;  %2282 = vmatpush3.bf16.msra.mxu0 %v3493_v56 }
 0x2d6   :  { %v2283_v45 = vpack.c.bf16 %v1190_v11, %v1189_v12  ;;  %v3268_v42 = vadd.f32 %v772_v20, %v3068_v34 }
 0x2d7   :  { %v1192_v13 = vmul.f32 %v2979_v16, %v3262_v41 }
 0x2d8   :  { %v1191_v14 = vmul.f32 %v2981_v17, %v3268_v42  ;;  %v2137_v55 = vpop.f32.mrb[36].mxu0  ;;  %2284 = vmatprep.subr.bf16.mxu0 %v2283_v45 }
 0x2d9   :  { %v3275_v52 = vadd.f32 %v2137_v55, %v3110_v23  ;;  %v782_v6 = vpop.f32.mrb[37].mxu0  ;;  %2286 = vmatpush3.bf16.msra.mxu0 %v3494_v46 }
 0x2da   :  { %v2287_v57 = vpack.c.bf16 %v1192_v13, %v1191_v14  ;;  %v3281_v34 = vadd.f32 %v782_v6, %v3116_v53 }
 0x2db   :  { %v1194_v16 = vmul.f32 %v2983_v18, %v3275_v52 }
 0x2dc   :  { %v1193_v17 = vmul.f32 %v2985_v19, %v3281_v34  ;;  %v2140_v29 = vpop.f32.mrb[38].mxu0  ;;  %2288 = vmatprep.subr.bf16.mxu0 %v2287_v57 }
 0x2dd   :  { %v3288_v23 = vadd.f32 %v2140_v29, %v3156_v25  ;;  %v792_v15 = vpop.f32.mrb[39].mxu0  ;;  %2290 = vmatpush3.bf16.msra.mxu0 %v3495_v36  ;;  %v3497_v25 = vpack.c.bf16 %v3180_v50, %v3184_v63  ;;  %v1277_v50 = vpop.permute.xlu0 %1276 }
 0x2de   :  { %v2291_v59 = vpack.c.bf16 %v1194_v16, %v1193_v17  ;;  %v3294_v53 = vadd.f32 %v792_v15, %v3162_v26  ;;  %v835_v26 = vld [vmem:[%s3403_s6] sm:$0xff]  ;;  %2197 = vmatprep.mubr.msk.f32.mxu1 %vm1340_vm14, %v1277_v50  ;;  %v1279_v63 = vpop.permute.xlu1 %1278  ;;  %v1275_v50 = vld [vmem:[%s3403_s6 + $0x28] sm:$0xff] }
 0x2df   :  { %v1196_v18 = vmul.f32 %v2989_v22, %v3288_v23  ;;  %v838_v22 = vld [vmem:[%s3403_s6 + $0x18] sm:$0xff] }
 0x2e0   :  { %v1195_v19 = vmul.f32 %v3496_v7, %v3294_v53  ;;  %2292 = vmatprep.subr.bf16.mxu0 %v2291_v59 }
 0x2e1   :  { %2294 = vmatpush3.bf16.msra.mxu0 %v3497_v25  ;;  %v1281_v32 = vpop.permute.xlu0 %1280 }
 0x2e2   :  { %v2295_v8 = vpack.c.bf16 %v1196_v18, %v1195_v19  ;;  %v1283_v1 = vpop.permute.xlu1 %1282 }
 0x2e4   :  { %2296 = vmatprep.subr.bf16.mxu0 %v2295_v8 }
 0x2e5   :  { %2298 = vmatpush3.bf16.msra.mxu0 %v3498_v61  ;;  %v1285_v39 = vpop.permute.xlu0 %1284 }
 0x2e6   :  { %v1287_v3 = vpop.permute.xlu1 %1286 }
 0x2e8   :  { %1262 = vmatmul.mubr.f32.vlgmr.msra.gmra.mrb[40].mxu0 %v835_v26 }
 0x2e9   :  { %1266 = vmatprep.mubr.f32.mxu0 %v838_v22  ;;  %v1289_v47 = vpop.permute.xlu0 %1288 }
 0x2ea   :  { %v1291_v10 = vpop.permute.xlu1 %1290 }
 0x2ec   :  { %1267 = vmatmul.mubr.f32.gmra.mrb[42].mxu0 %v837_v62 }
 0x2ed   :  { %v1293_v54 = vpop.permute.xlu0 %1292  ;;  %1726 = vmatprep.mubr.f32.mxu0 %v1275_v50 }
 0x2ee   :  { %v1295_v12 = vpop.permute.xlu1 %1294 }
 0x2f1   :  { %v1297_v45 = vpop.permute.xlu0 %1296 }
 0x2f2   :  { %v1299_v13 = vpop.permute.xlu1 %1298 }
 0x2f5   :  { %v1301_v14 = vpop.permute.xlu0 %1300 }
 0x2f6   :  { %v1303_v55 = vpop.permute.xlu1 %1302 }
 0x2f9   :  { %v1305_v6 = vpop.permute.xlu0 %1304 }
 0x2fa   :  { %v1307_v46 = vpop.permute.xlu1 %1306 }
 0x2fd   :  { %v1309_v57 = vpop.permute.xlu0 %1308 }
 0x2fe   :  { %v1311_v16 = vpop.permute.xlu1 %1310 }
 0x301   :  { %v1313_v17 = vpop.permute.xlu0 %1312 }
 0x302   :  { %v1315_v29 = vpop.permute.xlu1 %1314 }
 0x305   :  { %v1317_v15 = vpop.permute.xlu0 %1316 }
 0x306   :  { %v1319_v36 = vpop.permute.xlu1 %1318 }
 0x309   :  { %v1321_v59 = vpop.permute.xlu0 %1320 }
 0x30a   :  { %v1323_v18 = vpop.permute.xlu1 %1322 }
 0x30d   :  { %v1325_v7 = vpop.permute.xlu0 %1324 }
 0x30e   :  { %v1327_v19 = vpop.permute.xlu1 %1326 }
 0x311   :  { %v1329_v25 = vpop.permute.xlu0 %1328 }
 0x312   :  { %v1331_v8 = vpop.permute.xlu1 %1330 }
 0x315   :  { %v1333_v61 = vpop.permute.xlu0 %1332 }
 0x316   :  { %v1335_v26 = vpop.permute.xlu1 %1334 }
 0x319   :  { %v1337_v22 = vpop.permute.xlu0 %1336 }
 0x31a   :  { %v1339_v62 = vpop.permute.xlu1 %1338 }
 0x3bb   :  { %v1988_v49 = vpop.f32.mrb[40].mxu0 }
 0x3bc   :  { %v1989_v9 = vpop.f32.mrb[41].mxu0 }
 0x3bd   :  { %v1990_v0 = vadd.f32 %v1989_v9, %v1988_v49 }
 0x3bf   :  { %v1991_v40 = vpop.f32.mrb[42].mxu0  ;;  %v1272_v28 = vmax.f32 %v1990_v0, 0.0  ;;  %v3500_v0 = vld [vmem:[#allocation6_spill] sm:$0xff] }
 0x3c0   :  { %v1992_v31 = vpop.f32.mrb[43].mxu0 }
 0x3c1   :  { %v1993_v11 = vadd.f32 %v1992_v31, %v1991_v40 }
 0x3c3   :  { %v1273_v20 = vmax.f32 %v1993_v11, 0.0  ;;  %v3501_v11 = vld [vmem:[#allocation7_spill] sm:$0xff] }
 0x3c5   :  { %v2299_v56 = vpack.c.bf16 %v1273_v20, %v1272_v28  ;;  %v3502_v20 = vld [vmem:[#allocation8_spill] sm:$0xff] }
 0x3c7   :  { %2300 = vmatprep.subr.bf16.mxu1 %v2299_v56 }
 0x3c8   :  { %2302 = vmatpush3.bf16.msra.mxu1 %v2299_v56 }
 0x3cb   :  { %2198 = vmatmul.mubr.msk.f32.vlgmr.msra.gmra.mrb[32].mxu1 %vm1340_vm14, %v1279_v63 }
 0x3cc   :  { %2200 = vmatprep.mubr.msk.f32.mxu1 %vm1340_vm14, %v1281_v32 }
 0x3cf   :  { %2201 = vmatmul.mubr.msk.f32.gmra.mrb[34].mxu1 %vm1340_vm14, %v1283_v1 }
 0x3d0   :  { %2203 = vmatprep.mubr.msk.f32.mxu1 %vm1340_vm14, %v1285_v39  ;;  %v3499_v39 = vld [vmem:[#allocation5_spill] sm:$0xff] }
 0x3d3   :  { %2204 = vmatmul.mubr.msk.f32.gmra.mrb[36].mxu1 %vm1340_vm14, %v1287_v3 }
 0x3d4   :  { %2206 = vmatprep.mubr.msk.f32.mxu1 %vm1340_vm14, %v1289_v47 }
 0x3d7   :  { %2207 = vmatmul.mubr.msk.f32.gmra.mrb[38].mxu1 %vm1340_vm14, %v1291_v10 }
 0x3d8   :  { %2209 = vmatprep.mubr.msk.f32.mxu1 %vm1340_vm14, %v1293_v54 }
 0x3db   :  { %2210 = vmatmul.mubr.msk.f32.gmra.mrb[40].mxu1 %vm1340_vm14, %v1295_v12 }
 0x3dc   :  { %2212 = vmatprep.mubr.msk.f32.mxu1 %vm1340_vm14, %v1297_v45 }
 0x3df   :  { %2213 = vmatmul.mubr.msk.f32.gmra.mrb[42].mxu1 %vm1340_vm14, %v1299_v13 }
 0x3e0   :  { %2215 = vmatprep.mubr.msk.f32.mxu1 %vm1340_vm14, %v1301_v14 }
 0x3e3   :  { %2216 = vmatmul.mubr.msk.f32.gmra.mrb[44].mxu1 %vm1340_vm14, %v1303_v55  ;;  %v3503_v55 = vld [vmem:[#allocation9_spill] sm:$0xff] }
 0x3e4   :  { %2218 = vmatprep.mubr.msk.f32.mxu1 %vm1340_vm14, %v1305_v6 }
 0x3e7   :  { %2219 = vmatmul.mubr.msk.f32.gmra.mrb[46].mxu1 %vm1340_vm14, %v1307_v46 }
 0x3e8   :  { %2221 = vmatprep.mubr.msk.f32.mxu1 %vm1340_vm14, %v1309_v57 }
 0x3eb   :  { %2222 = vmatmul.mubr.msk.f32.gmra.mrb[48].mxu1 %vm1340_vm14, %v1311_v16 }
 0x3ec   :  { %2224 = vmatprep.mubr.msk.f32.mxu1 %vm1340_vm14, %v1313_v17  ;;  %v3504_v17 = vld [vmem:[#allocation10_spill] sm:$0xff] }
 0x3ef   :  { %2225 = vmatmul.mubr.msk.f32.gmra.mrb[50].mxu1 %vm1340_vm14, %v1315_v29 }
 0x3f0   :  { %2227 = vmatprep.mubr.msk.f32.mxu1 %vm1340_vm14, %v1317_v15 }
 0x3f3   :  { %2228 = vmatmul.mubr.msk.f32.gmra.mrb[52].mxu1 %vm1340_vm14, %v1319_v36 }
 0x3f4   :  { %2230 = vmatprep.mubr.msk.f32.mxu1 %vm1340_vm14, %v1321_v59  ;;  %v3505_v59 = vld [vmem:[#allocation11_spill] sm:$0xff] }
 0x3f7   :  { %2231 = vmatmul.mubr.msk.f32.gmra.mrb[54].mxu1 %vm1340_vm14, %v1323_v18 }
 0x3f8   :  { %2233 = vmatprep.mubr.msk.f32.mxu1 %vm1340_vm14, %v1325_v7 }
 0x3fb   :  { %2234 = vmatmul.mubr.msk.f32.gmra.mrb[56].mxu1 %vm1340_vm14, %v1327_v19  ;;  %v3506_v19 = vld [vmem:[#allocation12_spill] sm:$0xff] }
 0x3fc   :  { %2236 = vmatprep.mubr.msk.f32.mxu1 %vm1340_vm14, %v1329_v25 }
 0x3ff   :  { %2237 = vmatmul.mubr.msk.f32.gmra.mrb[58].mxu1 %vm1340_vm14, %v1331_v8 }
 0x400   :  { %2239 = vmatprep.mubr.msk.f32.mxu1 %vm1340_vm14, %v1333_v61 }
 0x403   :  { %2240 = vmatmul.mubr.msk.f32.gmra.mrb[60].mxu1 %vm1340_vm14, %v1335_v26 }
 0x404   :  { %2242 = vmatprep.mubr.msk.f32.mxu1 %vm1340_vm14, %v1337_v22 }
 0x407   :  { %2243 = vmatmul.mubr.msk.f32.gmra.mrb[62].mxu1 %vm1340_vm14, %v1339_v62 }
 0x49e   :  { %v2199_v63 = vpop.f32.mrb[32].mxu1 }
 0x49f   :  { %v1631_v32 = vmul.f32 %v2199_v63, %v3070_v38  ;;  %v1471_v1 = vpop.f32.mrb[33].mxu1 }
 0x4a0   :  { %v1630_v3 = vmul.f32 %v1471_v1, %v3499_v39 }
 0x4a2   :  { %v2305_v47 = vpack.c.bf16 %v1631_v32, %v1630_v3  ;;  %v2202_v49 = vpop.f32.mrb[34].mxu1  ;;  %v3507_v32 = vld [vmem:[#allocation13_spill] sm:$0xff] }
 0x4a3   :  { %v1633_v9 = vmul.f32 %v2202_v49, %v3086_v37  ;;  %v1481_v10 = vpop.f32.mrb[35].mxu1 }
 0x4a4   :  { %v1632_v40 = vmul.f32 %v1481_v10, %v3500_v0 }
 0x4a6   :  { %v2309_v54 = vpack.c.bf16 %v1633_v9, %v1632_v40  ;;  %v2205_v31 = vpop.f32.mrb[36].mxu1 }
 0x4a7   :  { %v1635_v12 = vmul.f32 %v2205_v31, %v3501_v11  ;;  %v1491_v28 = vpop.f32.mrb[37].mxu1 }
 0x4a8   :  { %v1634_v56 = vmul.f32 %v1491_v28, %v3502_v20 }
 0x4aa   :  { %v2313_v45 = vpack.c.bf16 %v1635_v12, %v1634_v56  ;;  %v2208_v13 = vpop.f32.mrb[38].mxu1 }
 0x4ab   :  { %v1637_v38 = vmul.f32 %v2208_v13, %v3126_v21  ;;  %v1501_v14 = vpop.f32.mrb[39].mxu1 }
 0x4ac   :  { %v1636_v6 = vmul.f32 %v1501_v14, %v3503_v55 }
 0x4ae   :  { %v2317_v46 = vpack.c.bf16 %v1637_v38, %v1636_v6  ;;  %v2211_v57 = vpop.f32.mrb[40].mxu1 }
 0x4af   :  { %v1639_v37 = vmul.f32 %v2211_v57, %v3140_v27  ;;  %v1511_v16 = vpop.f32.mrb[41].mxu1 }
 0x4b0   :  { %v1638_v29 = vmul.f32 %v1511_v16, %v3504_v17 }
 0x4b2   :  { %v2321_v15 = vpack.c.bf16 %v1639_v37, %v1638_v29  ;;  %v2214_v36 = vpop.f32.mrb[42].mxu1 }
 0x4b3   :  { %v1641_v18 = vmul.f32 %v2214_v36, %v3505_v59  ;;  %v1521_v7 = vpop.f32.mrb[43].mxu1 }
 0x4b4   :  { %v1640_v25 = vmul.f32 %v1521_v7, %v3506_v19 }
 0x4b6   :  { %v2325_v8 = vpack.c.bf16 %v1641_v18, %v1640_v25  ;;  %v2217_v61 = vpop.f32.mrb[44].mxu1 }
 0x4b7   :  { %v1643_v21 = vmul.f32 %v2217_v61, %v3172_v35  ;;  %v1531_v26 = vpop.f32.mrb[45].mxu1 }
 0x4b8   :  { %v1642_v22 = vmul.f32 %v1531_v26, %v3176_v58 }
 0x4ba   :  { %v2329_v62 = vpack.c.bf16 %v1643_v21, %v1642_v22  ;;  %v2220_v50 = vpop.f32.mrb[46].mxu1 }
 0x4bb   :  { %v1645_v27 = vmul.f32 %v2220_v50, %v3186_v24  ;;  %v1541_v63 = vpop.f32.mrb[47].mxu1 }
 0x4bc   :  { %v1644_v1 = vmul.f32 %v1541_v63, %v3507_v32 }
 0x4be   :  { %v2333_v39 = vpack.c.bf16 %v1645_v27, %v1644_v1  ;;  %v2223_v3 = vpop.f32.mrb[48].mxu1 }
 0x4bf   :  { %v1647_v49 = vmul.f32 %v2223_v3, %v3201_v60  ;;  %v1551_v9 = vpop.f32.mrb[49].mxu1 }
 0x4c0   :  { %v1646_v10 = vmul.f32 %v1551_v9, %v3206_v48 }
 0x4c2   :  { %v2303_v0 = vpack.c.bf16 %v1647_v49, %v1646_v10  ;;  %v2226_v40 = vpop.f32.mrb[50].mxu1 }
 0x4c3   :  { %v1649_v35 = vmul.f32 %v2226_v40, %v3213_v4  ;;  %v1561_v31 = vpop.f32.mrb[51].mxu1 }
 0x4c4   :  { %v1648_v58 = vmul.f32 %v1561_v31, %v3216_v2  ;;  %2304 = vmatprep.subr.bf16.mxu0 %v2303_v0 }
 0x4c5   :  { %2306 = vmatpush3.bf16.msra.mxu0 %v2305_v47 }
 0x4c6   :  { %v2307_v24 = vpack.c.bf16 %v1649_v35, %v1648_v58  ;;  %v2229_v11 = vpop.f32.mrb[52].mxu1 }
 0x4c7   :  { %v1651_v12 = vmul.f32 %v2229_v11, %v3223_v5  ;;  %v1571_v28 = vpop.f32.mrb[53].mxu1 }
 0x4c8   :  { %v1650_v20 = vmul.f32 %v1571_v28, %v3229_v30  ;;  %2308 = vmatprep.subr.bf16.mxu0 %v2307_v24 }
 0x4c9   :  { %2310 = vmatpush3.bf16.msra.mxu0 %v2309_v54 }
 0x4ca   :  { %v2311_v60 = vpack.c.bf16 %v1651_v12, %v1650_v20  ;;  %v2232_v48 = vpop.f32.mrb[54].mxu1 }
 0x4cb   :  { %v1653_v56 = vmul.f32 %v2232_v48, %v3236_v43  ;;  %v1581_v13 = vpop.f32.mrb[55].mxu1 }
 0x4cc   :  { %v1652_v4 = vmul.f32 %v1581_v13, %v3242_v44  ;;  %2312 = vmatprep.subr.bf16.mxu0 %v2311_v60 }
 0x4cd   :  { %2314 = vmatpush3.bf16.msra.mxu0 %v2313_v45 }
 0x4ce   :  { %v2315_v2 = vpack.c.bf16 %v1653_v56, %v1652_v4  ;;  %v2235_v47 = vpop.f32.mrb[56].mxu1 }
 0x4cf   :  { %v1655_v38 = vmul.f32 %v2235_v47, %v3249_v33  ;;  %v1591_v14 = vpop.f32.mrb[57].mxu1 }
 0x4d0   :  { %v1654_v5 = vmul.f32 %v1591_v14, %v3255_v51  ;;  %2316 = vmatprep.subr.bf16.mxu0 %v2315_v2 }
 0x4d1   :  { %2318 = vmatpush3.bf16.msra.mxu0 %v2317_v46 }
 0x4d2   :  { %v2319_v30 = vpack.c.bf16 %v1655_v38, %v1654_v5  ;;  %v2238_v54 = vpop.f32.mrb[58].mxu1 }
 0x4d3   :  { %v1657_v55 = vmul.f32 %v2238_v54, %v3262_v41  ;;  %v1601_v6 = vpop.f32.mrb[59].mxu1 }
 0x4d4   :  { %v1656_v43 = vmul.f32 %v1601_v6, %v3268_v42  ;;  %2320 = vmatprep.subr.bf16.mxu0 %v2319_v30 }
 0x4d5   :  { %2322 = vmatpush3.bf16.msra.mxu0 %v2321_v15 }
 0x4d6   :  { %v2323_v44 = vpack.c.bf16 %v1657_v55, %v1656_v43  ;;  %v2241_v45 = vpop.f32.mrb[60].mxu1 }
 0x4d7   :  { %v1659_v57 = vmul.f32 %v2241_v45, %v3275_v52  ;;  %v1611_v37 = vpop.f32.mrb[61].mxu1  ;;  %v1274_v52 = vld [vmem:[%s3403_s6 + $0x20] sm:$0xff]  ;;  %s2389_s6 = smov [#allocation2]  }
 0x4d8   :  { %v1658_v33 = vmul.f32 %v1611_v37, %v3281_v34  ;;  %2324 = vmatprep.subr.bf16.mxu0 %v2323_v44  ;;  %v1732_v34 = vlaneseq  ;;  %s1760_s23 = sshll.u32 %s2389_s6, 4  ;;  %s1761_s23 = int_to_ptr.vmem [resolvable:$true] %s1760_s23 }
 0x4d9   :  { %2326 = vmatpush3.bf16.msra.mxu0 %v2325_v8  ;;  %s2359_s1 = scalar_lea.vmem %s1761_s23, 128  ;;  %p2364_p1 = scmp.lt.s32.totalorder %s1761_s23, %s1761_s23 }
 0x4da   :  { %v2327_v51 = vpack.c.bf16 %v1659_v57, %v1658_v33  ;;  %v2244_v46 = vpop.f32.mrb[62].mxu1  ;;  %v1733_v29 = vshrl.u32 %v1732_v34, 7  ;;  %p2360_p0 = scmp.ne.s32.totalorder %s1761_s23, %s2359_s1  ;;  %p2365_p2 = scmp.lt.s32.totalorder %s2359_s1, %s2359_s1 }
 0x4db   :  { %v1661_v16 = vmul.f32 %v2244_v46, %v3288_v23  ;;  %v1621_v17 = vpop.f32.mrb[63].mxu1 }
 0x4dc   :  { %v1660_v41 = vmul.f32 %v1621_v17, %v3294_v53  ;;  %2328 = vmatprep.subr.bf16.mxu0 %v2327_v51  ;;  %vm1734_vm15 = vcmp.lt.s32.totalorder %v1733_v29, 6  ;;  %p2366_p3 = por %p2365_p2, %p2364_p1 }
 0x4dd   :  { %2330 = vmatpush3.bf16.msra.mxu0 %v2329_v62 }
 0x4de   :  { %v2331_v42 = vpack.c.bf16 %v1661_v16, %v1660_v41  ;;  %p2367_p4 = pnand %p2366_p3, %p2360_p0 }
 0x4e0   :  { %2332 = vmatprep.subr.bf16.mxu0 %v2331_v42 }
 0x4e1   :  { %2334 = vmatpush3.bf16.msra.mxu0 %v2333_v39 }
 0x4e4   :  { %1727 = vmatmul.mubr.f32.vlgmr.msra.gmra.mrb[44].mxu0 %v1274_v52 }
 0x5b7   :  { %v2060_v15 = vpop.f32.mrb[44].mxu0 }
 0x5b8   :  { %v2061_v36 = vpop.f32.mrb[45].mxu0 }
 0x5b9   :  { %v2062_v59 = vadd.f32 %v2061_v36, %v2060_v15 }
 0x5bb   :  { %v1735_v23 = vsel %vm1734_vm15, %v2062_v59, -3.4028235e+38 }
 0x5bc   :  { %v1736_v18 = vrot.slane %v1735_v23, 4 }
 0x5be   :  { %v1737_v7 = vmax.f32 %v1735_v23, %v1736_v18 }
 0x5c0   :  { %v1738_v53 = vrot.slane %v1737_v7, 2 }
 0x5c2   :  { %v1739_v19 = vmax.f32 %v1737_v7, %v1738_v53 }
 0x5c4   :  { %v1740_v25 = vrot.slane %v1739_v19, 1 }
 0x5c6   :  { %v1741_v8 = vmax.f32 %v1739_v19, %v1740_v25 }
 0x5c8   :  { %v1742_v61 = vsub.f32 %v1735_v23, %v1741_v8 }
 0x5ca   :  { %v1743_v21 = vmul.f32 1.442695, %v1742_v61 }
 0x5cc   :  { %2355 = vpow2.f32 %v1743_v21 }
 0x5d6   :  { %v2356_v26 = vpop.eup %2355 }
 0x5d7   :  { %v1745_v22 = vrot.slane %v2356_v26, 4 }
 0x5d9   :  { %v1746_v62 = vadd.f32 %v2356_v26, %v1745_v22 }
 0x5db   :  { %v1747_v50 = vrot.slane %v1746_v62, 2 }
 0x5dd   :  { %v1748_v27 = vadd.f32 %v1747_v50, %v1746_v62 }
 0x5df   :  { %v1749_v63 = vrot.slane %v1748_v27, 1 }
 0x5e1   :  { %v1750_v32 = vadd.f32 %v1749_v63, %v1748_v27 }
 0x5e3   :  { %2357 = vrcp.f32 %v1750_v32 }
 0x5ed   :  { %v2358_v1 = vpop.eup %2357 }
 0x5ee   :  { %v1752_v39 = vmul.f32 %v2358_v1, %v2356_v26 }
 0x5f0   :  { %1753 = vst [vmem:[#allocation2] sm:$0xff] %v1752_v39 }
 0x5f1   :  { %2370 = shalt.err (!%p2367_p4)
}
 0x5f2   :  { %s2371_s26 = scalar_lea.hbm %s3404_s7, 128 }
 0x5f3   :  { %p2372_p5 = scmp.ne.s32.totalorder %s3404_s7, %s2371_s26  ;;  %p2375_p6 = scmp.lt.u32.totalorder %s2371_s26, %s3404_s7 }
 0x5f5   :  { %p2377_p7 = pnand %p2375_p6, %p2372_p5 }
 0x5f7   :  { %2380 = shalt.err (!%p2377_p7)
}
 0x5f8   :  { %1763 = dma.vmem_to_hbm [thread:$0]  %s1761_s23, 128, %s3404_s7, [#allocation3]  }
 0x5f9   :  { %2381 = dma.done.wait [#allocation3], 128  }
 0x5fa   :  { %2382 = vsyncadd [#allocation3], 4294967168 }
 0x5fb   :  { %1767 = vsyncpa [#allocation3], 1 }

</bundles_post_ra>
